<compile_context>
chip_gen: v7x
topology: tpu7x:2x2x1
jax: 0.10.0
libtpu: 0.0.40
codegen_flags: <defaults>
</compile_context>

<pallas_src>
import jax
import jax.numpy as jnp
import numpy as np
from jax import lax
from jax.experimental import pallas as pl
from jax.experimental.pallas import tpu as pltpu


def _leaky(x, slope):
    return jnp.where(x > 0, x, slope * x)


# tap order matches the (ky, kx, cin, cout) weight flattening below
_SHIFTS = tuple((dy, dx) for dy in (-1, 0, 1) for dx in (-1, 0, 1))


def _make_kernel(H, W, C, tile_h, slope):
    M = tile_h * W          # conv2 output rows per grid step (flattened h*W+w)
    M2 = M + 2 * W          # conv1 rows per step (1 halo image-row each side)
    OFF = 2 * W + 1         # rows in padded-flat input before original row 0
    SOFF = 8                # sublane-aligned guard offset inside the y1 scratch
    HW = H * W

    def kernel(xpf_ref, w1_ref, b1_ref, w2_ref, b2_ref, o_ref, y1_ref):
        # first output row (flattened) of this row tile
        p0 = pl.multiple_of(pl.program_id(1) * M, M)

        # --- iota border masks (only dx taps that would wrap across the W edge) ---
        i2 = lax.broadcasted_iota(jnp.int32, (M2, 1), 0)          # conv1 rows
        wpos2 = i2 % W
        not_left2 = wpos2 != 0
        not_right2 = wpos2 != (W - 1)
        # conv1 halo rows that lie outside the image must end up exactly zero
        glob2 = (p0 - W) + i2
        row_ok = (glob2 >= 0) & (glob2 < HW)

        i1 = lax.broadcasted_iota(jnp.int32, (M, 1), 0)           # conv2 rows
        wpos1 = i1 % W
        not_left1 = wpos1 != 0
        not_right1 = wpos1 != (W - 1)

        # --- conv1 on tile_h+2 rows: 9 row-shifted taps -> 9 accumulating matmuls ---
        acc1 = jnp.zeros((M2, C), jnp.float32)
        for t, (dy, dx) in enumerate(_SHIFTS):
            s = dy * W + dx
            tap = xpf_ref[pl.ds(p0 + W + 1 + s, M2), :]
            if dx == -1:
                tap = jnp.where(not_left2, tap, 0.0)
            elif dx == 1:
                tap = jnp.where(not_right2, tap, 0.0)
            acc1 = acc1 + jnp.dot(tap, w1_ref[t * C:(t + 1) * C, :],
                                  preferred_element_type=jnp.float32)
        y1 = _leaky(acc1 + b1_ref[...], slope)
        y1 = jnp.where(row_ok, y1, 0.0)          # conv2 sees zeros outside the image
        # single aligned scratch store; guard rows [0:SOFF) / [SOFF+M2:] are only
        # ever read by taps that are masked, so no per-step memset is needed.
        y1_ref[SOFF:SOFF + M2, :] = y1

        # --- conv2 on tile_h rows: static slices into the y1 scratch ---
        acc2 = jnp.zeros((M, C), jnp.float32)
        for t, (dy, dx) in enumerate(_SHIFTS):
            s = dy * W + dx
            start = SOFF + W + s                  # python int -> static slice
            tap = y1_ref[start:start + M, :]
            if dx == -1:
                tap = jnp.where(not_left1, tap, 0.0)
            elif dx == 1:
                tap = jnp.where(not_right1, tap, 0.0)
            acc2 = acc2 + jnp.dot(tap, w2_ref[t * C:(t + 1) * C, :],
                                  preferred_element_type=jnp.float32)
        y2 = _leaky(acc2 + b2_ref[...], slope)

        # --- residual add: re-derive identity just before the add ---
        ident = xpf_ref[pl.ds(p0 + OFF, M), :]
        o_ref[...] = (y2 + ident).astype(o_ref.dtype)

    return kernel


def residual_block_nhwc(x_nhwc, params, *, slope=0.01, tile_h=None):
    """NHWC-native entry point (lets a surrounding NHWC model skip the
    NCHW<->NHWC transposes entirely, per the perf review)."""
    w1, b1, w2, b2 = params                  # PyTorch layouts: (Cout,Cin,3,3), (Cout,)
    N, H, W, Cin = x_nhwc.shape
    Cout = w1.shape[0]
    if Cin != Cout:
        raise ValueError("ResidualBlock residual add requires in_ch == out_ch")
    C = Cout

    if tile_h is None:
        tile_h = next((c for c in (8, 4, 2, 1)
                       if H % c == 0 and (c * W) % 8 == 0), H)
    assert H % tile_h == 0
    T = H // tile_h
    M = tile_h * W
    M2 = M + 2 * W
    R = (H + 4) * W + 2

    # padded-flattened input: 2 zero image-rows above/below (so dy taps on the
    # 1-row conv1 halo never read out of bounds) + 1 guard row at each end for
    # the corner-tap overshoot.  Shape (N, R, C), channels on the lane axis.
    xp = jnp.pad(x_nhwc, ((0, 0), (2, 2), (0, 0), (0, 0)))
    xpf = jnp.pad(xp.reshape(N, (H + 4) * W, C), ((0, 0), (1, 1), (0, 0)))

    # weights flattened to tap-major layout: row block t = (dy+1)*3 + (dx+1)
    w1k = jnp.transpose(w1, (2, 3, 1, 0)).reshape(9 * C, C)
    w2k = jnp.transpose(w2, (2, 3, 1, 0)).reshape(9 * C, C)
    b1k = b1.reshape(1, C)
    b2k = b2.reshape(1, C)

    kernel = _make_kernel(H, W, C, tile_h, slope)

    flops = 2 * N * T * 9 * C * C * (M2 + M)
    bytes_accessed = 4 * (N * R * C + N * H * W * C + 2 * 9 * C * C + 2 * C)

    out_flat = pl.pallas_call(
        kernel,
        out_shape=jax.ShapeDtypeStruct((N, H * W, C), x_nhwc.dtype),
        grid_spec=pltpu.PrefetchScalarGridSpec(
            num_scalar_prefetch=0,
            grid=(N, T),
            in_specs=[
                # whole padded image resident per batch (index constant over t
                # -> fetched once per image, next image prefetched during the
                # last row tile of the current one)
                pl.BlockSpec((None, R, C), lambda b, t: (b, 0, 0)),
                pl.BlockSpec((9 * C, C), lambda b, t: (0, 0)),
                pl.BlockSpec((1, C), lambda b, t: (0, 0)),
                pl.BlockSpec((9 * C, C), lambda b, t: (0, 0)),
                pl.BlockSpec((1, C), lambda b, t: (0, 0)),
            ],
            out_specs=pl.BlockSpec((None, M, C), lambda b, t: (b, t, 0)),
            scratch_shapes=[pltpu.VMEM((M2 + 16, C), jnp.float32)],  # conv1 result
        ),
        compiler_params=pltpu.CompilerParams(
            dimension_semantics=("parallel", "arbitrary"),   # batch across TCs (v7x)
            vmem_limit_bytes=16 * 1024 * 1024),               # well under v7x 64 MiB
        cost_estimate=pl.CostEstimate(
            flops=flops, transcendentals=0, bytes_accessed=bytes_accessed),
    )(xpf, w1k, b1k, w2k, b2k)

    return out_flat.reshape(N, H, W, C)


def residual_block(x_nchw, params, *, slope=0.01, tile_h=None):
    """Forward of ResidualBlock with the PyTorch NCHW interface."""
    x = jnp.transpose(x_nchw, (0, 2, 3, 1))                        # NCHW -> NHWC
    out = residual_block_nhwc(x, params, slope=slope, tile_h=tile_h)
    return jnp.transpose(out, (0, 3, 1, 2))                        # back to NCHW


def _reference(x, params, slope=0.01):
    """Pure-JAX NCHW reference matching the PyTorch module."""
    w1, b1, w2, b2 = params
    dn = ('NCHW', 'OIHW', 'NCHW')
    out = lax.conv_general_dilated(
        x, w1, (1, 1), ((1, 1), (1, 1)), dimension_numbers=dn,
        precision=lax.Precision.HIGHEST) + b1.reshape(1, -1, 1, 1)
    out = jnp.where(out > 0, out, slope * out)
    out = lax.conv_general_dilated(
        out, w2, (1, 1), ((1, 1), (1, 1)), dimension_numbers=dn,
        precision=lax.Precision.HIGHEST) + b2.reshape(1, -1, 1, 1)
    out = jnp.where(out > 0, out, slope * out)
    return out + x


if __name__ == "__main__":
    key = jax.random.PRNGKey(0)
    N, C, H, W = 2, 32, 16, 16                # in_ch == out_ch; tile_h=8 -> grid (2, 2)
    ks = jax.random.split(key, 5)

    x = jax.random.normal(ks[0], (N, C, H, W), jnp.float32)
    w1 = 0.1 * jax.random.normal(ks[1], (C, C, 3, 3), jnp.float32)
    b1 = 0.1 * jax.random.normal(ks[2], (C,), jnp.float32)
    w2 = 0.1 * jax.random.normal(ks[3], (C, C, 3, 3), jnp.float32)
    b2 = 0.1 * jax.random.normal(ks[4], (C,), jnp.float32)
    params = (w1, b1, w2, b2)

    out = jax.block_until_ready(jax.jit(residual_block)(x, params))

    ref = _reference(x, params)
    np.testing.assert_allclose(np.asarray(out), np.asarray(ref),
                               rtol=1e-3, atol=2e-3)
    print("KERNEL_OK")
</pallas_src>

<mosaic_0001>
module attributes {stable_mosaic.version = 11 : i64} {
  func.func @kernel(%arg0: i32, %arg1: i32, %arg2: memref<1x322x32xf32, #tpu.memory_space<vmem>>, %arg3: memref<288x32xf32, #tpu.memory_space<vmem>>, %arg4: memref<1x32xf32, #tpu.memory_space<vmem>>, %arg5: memref<288x32xf32, #tpu.memory_space<vmem>>, %arg6: memref<1x32xf32, #tpu.memory_space<vmem>>, %arg7: memref<1x128x32xf32, #tpu.memory_space<vmem>>, %arg8: memref<176x32xf32, #tpu.memory_space<vmem>>) attributes {dimension_semantics = [#tpu.dimension_semantics<parallel>, #tpu.dimension_semantics<arbitrary>], iteration_bounds = array<i64: 2, 2>, scalar_prefetch = 0 : i64, scratch_operands = 1 : i64, tpu.core_type = #tpu.core_type<tc>, window_params = [{transform_indices = @transform_0, window_bounds = array<i64: 1, 322, 32>}, {pipeline_mode = #tpu.pipeline_mode<synchronous>, transform_indices = @transform_1, window_bounds = array<i64: 288, 32>}, {pipeline_mode = #tpu.pipeline_mode<synchronous>, transform_indices = @transform_2, window_bounds = array<i64: 1, 32>}, {pipeline_mode = #tpu.pipeline_mode<synchronous>, transform_indices = @transform_3, window_bounds = array<i64: 288, 32>}, {pipeline_mode = #tpu.pipeline_mode<synchronous>, transform_indices = @transform_4, window_bounds = array<i64: 1, 32>}, {transform_indices = @transform_5, window_bounds = array<i64: 1, 128, 32>}]} {
    %c128_i32 = arith.constant 128 : i32
    %0 = arith.muli %arg1, %c128_i32 : i32
    %1 = tpu.assume_multiple %0, 128 : i32
    %2 = tpu.iota {dimensions = array<i32: 0>} : vector<160x1xi32>
    %c16_i32 = arith.constant 16 : i32
    %c0_i32 = arith.constant 0 : i32
    %3 = arith.cmpi eq, %c16_i32, %c0_i32 : i32
    %c1_i32 = arith.constant 1 : i32
    %4 = arith.select %3, %c1_i32, %c16_i32 : i32
    %5 = vector.broadcast %4 : i32 to vector<160x1xi32>
    %6 = arith.remsi %2, %5 : vector<160x1xi32>
    %c0_i32_0 = arith.constant 0 : i32
    %7 = vector.broadcast %c0_i32_0 : i32 to vector<160x1xi32>
    %8 = arith.cmpi ne, %6, %7 : vector<160x1xi32>
    %c0_i32_1 = arith.constant 0 : i32
    %9 = vector.broadcast %c0_i32_1 : i32 to vector<160x1xi32>
    %10 = arith.cmpi slt, %6, %9 : vector<160x1xi32>
    %c0_i32_2 = arith.constant 0 : i32
    %11 = arith.cmpi slt, %4, %c0_i32_2 : i32
    %12 = vector.broadcast %11 : i1 to vector<160x1xi1>
    %13 = vector.broadcast %12 : vector<160x1xi1> to vector<160x1xi1>
    %14 = arith.xori %10, %13 : vector<160x1xi1>
    %15 = arith.andi %14, %8 : vector<160x1xi1>
    %16 = vector.broadcast %4 : i32 to vector<160x1xi32>
    %17 = arith.addi %6, %16 : vector<160x1xi32>
    %18 = arith.select %15, %17, %6 : vector<160x1xi1>, vector<160x1xi32>
    %c0_i32_3 = arith.constant 0 : i32
    %19 = vector.broadcast %c0_i32_3 : i32 to vector<160x1xi32>
    %20 = arith.cmpi ne, %18, %19 : vector<160x1xi32>
    %c15_i32 = arith.constant 15 : i32
    %21 = vector.broadcast %c15_i32 : i32 to vector<160x1xi32>
    %22 = arith.cmpi ne, %18, %21 : vector<160x1xi32>
    %c16_i32_4 = arith.constant 16 : i32
    %23 = arith.subi %1, %c16_i32_4 : i32
    %24 = vector.broadcast %23 : i32 to vector<160x1xi32>
    %25 = arith.addi %24, %2 : vector<160x1xi32>
    %c0_i32_5 = arith.constant 0 : i32
    %26 = vector.broadcast %c0_i32_5 : i32 to vector<160x1xi32>
    %27 = arith.cmpi sge, %25, %26 : vector<160x1xi32>
    %c256_i32 = arith.constant 256 : i32
    %28 = vector.broadcast %c256_i32 : i32 to vector<160x1xi32>
    %29 = arith.cmpi slt, %25, %28 : vector<160x1xi32>
    %30 = arith.andi %27, %29 : vector<160x1xi1>
    %31 = tpu.iota {dimensions = array<i32: 0>} : vector<128x1xi32>
    %c16_i32_6 = arith.constant 16 : i32
    %c0_i32_7 = arith.constant 0 : i32
    %32 = arith.cmpi eq, %c16_i32_6, %c0_i32_7 : i32
    %c1_i32_8 = arith.constant 1 : i32
    %33 = arith.select %32, %c1_i32_8, %c16_i32_6 : i32
    %34 = vector.broadcast %33 : i32 to vector<128x1xi32>
    %35 = arith.remsi %31, %34 : vector<128x1xi32>
    %c0_i32_9 = arith.constant 0 : i32
    %36 = vector.broadcast %c0_i32_9 : i32 to vector<128x1xi32>
    %37 = arith.cmpi ne, %35, %36 : vector<128x1xi32>
    %c0_i32_10 = arith.constant 0 : i32
    %38 = vector.broadcast %c0_i32_10 : i32 to vector<128x1xi32>
    %39 = arith.cmpi slt, %35, %38 : vector<128x1xi32>
    %c0_i32_11 = arith.constant 0 : i32
    %40 = arith.cmpi slt, %33, %c0_i32_11 : i32
    %41 = vector.broadcast %40 : i1 to vector<128x1xi1>
    %42 = vector.broadcast %41 : vector<128x1xi1> to vector<128x1xi1>
    %43 = arith.xori %39, %42 : vector<128x1xi1>
    %44 = arith.andi %43, %37 : vector<128x1xi1>
    %45 = vector.broadcast %33 : i32 to vector<128x1xi32>
    %46 = arith.addi %35, %45 : vector<128x1xi32>
    %47 = arith.select %44, %46, %35 : vector<128x1xi1>, vector<128x1xi32>
    %c0_i32_12 = arith.constant 0 : i32
    %48 = vector.broadcast %c0_i32_12 : i32 to vector<128x1xi32>
    %49 = arith.cmpi ne, %47, %48 : vector<128x1xi32>
    %c15_i32_13 = arith.constant 15 : i32
    %50 = vector.broadcast %c15_i32_13 : i32 to vector<128x1xi32>
    %51 = arith.cmpi ne, %47, %50 : vector<128x1xi32>
    %cst = arith.constant 0.000000e+00 : f32
    %52 = vector.broadcast %cst : f32 to vector<160x32xf32>
    %c16_i32_14 = arith.constant 16 : i32
    %53 = arith.addi %1, %c16_i32_14 : i32
    %c1_i32_15 = arith.constant 1 : i32
    %54 = arith.addi %53, %c1_i32_15 : i32
    %c-17_i32 = arith.constant -17 : i32
    %55 = arith.addi %54, %c-17_i32 : i32
    %c0 = arith.constant 0 : index
    %56 = arith.index_cast %55 : i32 to index
    %c0_16 = arith.constant 0 : index
    %57 = vector.load %arg2[%c0, %56, %c0_16] : memref<1x322x32xf32, #tpu.memory_space<vmem>>, vector<1x160x32xf32>
    %58 = vector.shape_cast %57 : vector<1x160x32xf32> to vector<160x32xf32>
    %cst_17 = arith.constant 0.000000e+00 : f32
    %59 = vector.shape_cast %20 : vector<160x1xi1> to vector<160x1xi1>
    %60 = vector.broadcast %59 : vector<160x1xi1> to vector<160x32xi1>
    %61 = vector.broadcast %cst_17 : f32 to vector<160x32xf32>
    %62 = arith.select %60, %58, %61 : vector<160x32xi1>, vector<160x32xf32>
    %c0_18 = arith.constant 0 : index
    %c0_19 = arith.constant 0 : index
    %63 = vector.load %arg3[%c0_18, %c0_19] : memref<288x32xf32, #tpu.memory_space<vmem>>, vector<32x32xf32>
    %cst_20 = arith.constant dense<0.000000e+00> : vector<160x32xf32>
    %64 = tpu.matmul %62, %63, %cst_20 {dimension_numbers = #tpu.dot_dimension_numbers<[1], [0], [0], [1], [0, 0, 1, 1], [], []>} : vector<160x32xf32>, vector<32x32xf32>, vector<160x32xf32> -> vector<160x32xf32>
    %65 = arith.addf %52, %64 : vector<160x32xf32>
    %c16_i32_21 = arith.constant 16 : i32
    %66 = arith.addi %1, %c16_i32_21 : i32
    %c1_i32_22 = arith.constant 1 : i32
    %67 = arith.addi %66, %c1_i32_22 : i32
    %c-16_i32 = arith.constant -16 : i32
    %68 = arith.addi %67, %c-16_i32 : i32
    %c0_23 = arith.constant 0 : index
    %69 = arith.index_cast %68 : i32 to index
    %c0_24 = arith.constant 0 : index
    %70 = vector.load %arg2[%c0_23, %69, %c0_24] : memref<1x322x32xf32, #tpu.memory_space<vmem>>, vector<1x160x32xf32>
    %71 = vector.shape_cast %70 : vector<1x160x32xf32> to vector<160x32xf32>
    %c32 = arith.constant 32 : index
    %c0_25 = arith.constant 0 : index
    %72 = vector.load %arg3[%c32, %c0_25] : memref<288x32xf32, #tpu.memory_space<vmem>>, vector<32x32xf32>
    %cst_26 = arith.constant dense<0.000000e+00> : vector<160x32xf32>
    %73 = tpu.matmul %71, %72, %cst_26 {dimension_numbers = #tpu.dot_dimension_numbers<[1], [0], [0], [1], [0, 0, 1, 1], [], []>} : vector<160x32xf32>, vector<32x32xf32>, vector<160x32xf32> -> vector<160x32xf32>
    %74 = arith.addf %65, %73 : vector<160x32xf32>
    %c16_i32_27 = arith.constant 16 : i32
    %75 = arith.addi %1, %c16_i32_27 : i32
    %c1_i32_28 = arith.constant 1 : i32
    %76 = arith.addi %75, %c1_i32_28 : i32
    %c-15_i32 = arith.constant -15 : i32
    %77 = arith.addi %76, %c-15_i32 : i32
    %c0_29 = arith.constant 0 : index
    %78 = arith.index_cast %77 : i32 to index
    %c0_30 = arith.constant 0 : index
    %79 = vector.load %arg2[%c0_29, %78, %c0_30] : memref<1x322x32xf32, #tpu.memory_space<vmem>>, vector<1x160x32xf32>
    %80 = vector.shape_cast %79 : vector<1x160x32xf32> to vector<160x32xf32>
    %cst_31 = arith.constant 0.000000e+00 : f32
    %81 = vector.shape_cast %22 : vector<160x1xi1> to vector<160x1xi1>
    %82 = vector.broadcast %81 : vector<160x1xi1> to vector<160x32xi1>
    %83 = vector.broadcast %cst_31 : f32 to vector<160x32xf32>
    %84 = arith.select %82, %80, %83 : vector<160x32xi1>, vector<160x32xf32>
    %c64 = arith.constant 64 : index
    %c0_32 = arith.constant 0 : index
    %85 = vector.load %arg3[%c64, %c0_32] : memref<288x32xf32, #tpu.memory_space<vmem>>, vector<32x32xf32>
    %cst_33 = arith.constant dense<0.000000e+00> : vector<160x32xf32>
    %86 = tpu.matmul %84, %85, %cst_33 {dimension_numbers = #tpu.dot_dimension_numbers<[1], [0], [0], [1], [0, 0, 1, 1], [], []>} : vector<160x32xf32>, vector<32x32xf32>, vector<160x32xf32> -> vector<160x32xf32>
    %87 = arith.addf %74, %86 : vector<160x32xf32>
    %c16_i32_34 = arith.constant 16 : i32
    %88 = arith.addi %1, %c16_i32_34 : i32
    %c1_i32_35 = arith.constant 1 : i32
    %89 = arith.addi %88, %c1_i32_35 : i32
    %c-1_i32 = arith.constant -1 : i32
    %90 = arith.addi %89, %c-1_i32 : i32
    %c0_36 = arith.constant 0 : index
    %91 = arith.index_cast %90 : i32 to index
    %c0_37 = arith.constant 0 : index
    %92 = vector.load %arg2[%c0_36, %91, %c0_37] : memref<1x322x32xf32, #tpu.memory_space<vmem>>, vector<1x160x32xf32>
    %93 = vector.shape_cast %92 : vector<1x160x32xf32> to vector<160x32xf32>
    %cst_38 = arith.constant 0.000000e+00 : f32
    %94 = vector.shape_cast %20 : vector<160x1xi1> to vector<160x1xi1>
    %95 = vector.broadcast %94 : vector<160x1xi1> to vector<160x32xi1>
    %96 = vector.broadcast %cst_38 : f32 to vector<160x32xf32>
    %97 = arith.select %95, %93, %96 : vector<160x32xi1>, vector<160x32xf32>
    %c96 = arith.constant 96 : index
    %c0_39 = arith.constant 0 : index
    %98 = vector.load %arg3[%c96, %c0_39] : memref<288x32xf32, #tpu.memory_space<vmem>>, vector<32x32xf32>
    %cst_40 = arith.constant dense<0.000000e+00> : vector<160x32xf32>
    %99 = tpu.matmul %97, %98, %cst_40 {dimension_numbers = #tpu.dot_dimension_numbers<[1], [0], [0], [1], [0, 0, 1, 1], [], []>} : vector<160x32xf32>, vector<32x32xf32>, vector<160x32xf32> -> vector<160x32xf32>
    %100 = arith.addf %87, %99 : vector<160x32xf32>
    %c16_i32_41 = arith.constant 16 : i32
    %101 = arith.addi %1, %c16_i32_41 : i32
    %c1_i32_42 = arith.constant 1 : i32
    %102 = arith.addi %101, %c1_i32_42 : i32
    %c0_i32_43 = arith.constant 0 : i32
    %103 = arith.addi %102, %c0_i32_43 : i32
    %c0_44 = arith.constant 0 : index
    %104 = arith.index_cast %103 : i32 to index
    %c0_45 = arith.constant 0 : index
    %105 = vector.load %arg2[%c0_44, %104, %c0_45] : memref<1x322x32xf32, #tpu.memory_space<vmem>>, vector<1x160x32xf32>
    %106 = vector.shape_cast %105 : vector<1x160x32xf32> to vector<160x32xf32>
    %c128 = arith.constant 128 : index
    %c0_46 = arith.constant 0 : index
    %107 = vector.load %arg3[%c128, %c0_46] : memref<288x32xf32, #tpu.memory_space<vmem>>, vector<32x32xf32>
    %cst_47 = arith.constant dense<0.000000e+00> : vector<160x32xf32>
    %108 = tpu.matmul %106, %107, %cst_47 {dimension_numbers = #tpu.dot_dimension_numbers<[1], [0], [0], [1], [0, 0, 1, 1], [], []>} : vector<160x32xf32>, vector<32x32xf32>, vector<160x32xf32> -> vector<160x32xf32>
    %109 = arith.addf %100, %108 : vector<160x32xf32>
    %c16_i32_48 = arith.constant 16 : i32
    %110 = arith.addi %1, %c16_i32_48 : i32
    %c1_i32_49 = arith.constant 1 : i32
    %111 = arith.addi %110, %c1_i32_49 : i32
    %c1_i32_50 = arith.constant 1 : i32
    %112 = arith.addi %111, %c1_i32_50 : i32
    %c0_51 = arith.constant 0 : index
    %113 = arith.index_cast %112 : i32 to index
    %c0_52 = arith.constant 0 : index
    %114 = vector.load %arg2[%c0_51, %113, %c0_52] : memref<1x322x32xf32, #tpu.memory_space<vmem>>, vector<1x160x32xf32>
    %115 = vector.shape_cast %114 : vector<1x160x32xf32> to vector<160x32xf32>
    %cst_53 = arith.constant 0.000000e+00 : f32
    %116 = vector.shape_cast %22 : vector<160x1xi1> to vector<160x1xi1>
    %117 = vector.broadcast %116 : vector<160x1xi1> to vector<160x32xi1>
    %118 = vector.broadcast %cst_53 : f32 to vector<160x32xf32>
    %119 = arith.select %117, %115, %118 : vector<160x32xi1>, vector<160x32xf32>
    %c160 = arith.constant 160 : index
    %c0_54 = arith.constant 0 : index
    %120 = vector.load %arg3[%c160, %c0_54] : memref<288x32xf32, #tpu.memory_space<vmem>>, vector<32x32xf32>
    %cst_55 = arith.constant dense<0.000000e+00> : vector<160x32xf32>
    %121 = tpu.matmul %119, %120, %cst_55 {dimension_numbers = #tpu.dot_dimension_numbers<[1], [0], [0], [1], [0, 0, 1, 1], [], []>} : vector<160x32xf32>, vector<32x32xf32>, vector<160x32xf32> -> vector<160x32xf32>
    %122 = arith.addf %109, %121 : vector<160x32xf32>
    %c16_i32_56 = arith.constant 16 : i32
    %123 = arith.addi %1, %c16_i32_56 : i32
    %c1_i32_57 = arith.constant 1 : i32
    %124 = arith.addi %123, %c1_i32_57 : i32
    %c15_i32_58 = arith.constant 15 : i32
    %125 = arith.addi %124, %c15_i32_58 : i32
    %c0_59 = arith.constant 0 : index
    %126 = arith.index_cast %125 : i32 to index
    %c0_60 = arith.constant 0 : index
    %127 = vector.load %arg2[%c0_59, %126, %c0_60] : memref<1x322x32xf32, #tpu.memory_space<vmem>>, vector<1x160x32xf32>
    %128 = vector.shape_cast %127 : vector<1x160x32xf32> to vector<160x32xf32>
    %cst_61 = arith.constant 0.000000e+00 : f32
    %129 = vector.shape_cast %20 : vector<160x1xi1> to vector<160x1xi1>
    %130 = vector.broadcast %129 : vector<160x1xi1> to vector<160x32xi1>
    %131 = vector.broadcast %cst_61 : f32 to vector<160x32xf32>
    %132 = arith.select %130, %128, %131 : vector<160x32xi1>, vector<160x32xf32>
    %c192 = arith.constant 192 : index
    %c0_62 = arith.constant 0 : index
    %133 = vector.load %arg3[%c192, %c0_62] : memref<288x32xf32, #tpu.memory_space<vmem>>, vector<32x32xf32>
    %cst_63 = arith.constant dense<0.000000e+00> : vector<160x32xf32>
    %134 = tpu.matmul %132, %133, %cst_63 {dimension_numbers = #tpu.dot_dimension_numbers<[1], [0], [0], [1], [0, 0, 1, 1], [], []>} : vector<160x32xf32>, vector<32x32xf32>, vector<160x32xf32> -> vector<160x32xf32>
    %135 = arith.addf %122, %134 : vector<160x32xf32>
    %c16_i32_64 = arith.constant 16 : i32
    %136 = arith.addi %1, %c16_i32_64 : i32
    %c1_i32_65 = arith.constant 1 : i32
    %137 = arith.addi %136, %c1_i32_65 : i32
    %c16_i32_66 = arith.constant 16 : i32
    %138 = arith.addi %137, %c16_i32_66 : i32
    %c0_67 = arith.constant 0 : index
    %139 = arith.index_cast %138 : i32 to index
    %c0_68 = arith.constant 0 : index
    %140 = vector.load %arg2[%c0_67, %139, %c0_68] : memref<1x322x32xf32, #tpu.memory_space<vmem>>, vector<1x160x32xf32>
    %141 = vector.shape_cast %140 : vector<1x160x32xf32> to vector<160x32xf32>
    %c224 = arith.constant 224 : index
    %c0_69 = arith.constant 0 : index
    %142 = vector.load %arg3[%c224, %c0_69] : memref<288x32xf32, #tpu.memory_space<vmem>>, vector<32x32xf32>
    %cst_70 = arith.constant dense<0.000000e+00> : vector<160x32xf32>
    %143 = tpu.matmul %141, %142, %cst_70 {dimension_numbers = #tpu.dot_dimension_numbers<[1], [0], [0], [1], [0, 0, 1, 1], [], []>} : vector<160x32xf32>, vector<32x32xf32>, vector<160x32xf32> -> vector<160x32xf32>
    %144 = arith.addf %135, %143 : vector<160x32xf32>
    %c16_i32_71 = arith.constant 16 : i32
    %145 = arith.addi %1, %c16_i32_71 : i32
    %c1_i32_72 = arith.constant 1 : i32
    %146 = arith.addi %145, %c1_i32_72 : i32
    %c17_i32 = arith.constant 17 : i32
    %147 = arith.addi %146, %c17_i32 : i32
    %c0_73 = arith.constant 0 : index
    %148 = arith.index_cast %147 : i32 to index
    %c0_74 = arith.constant 0 : index
    %149 = vector.load %arg2[%c0_73, %148, %c0_74] : memref<1x322x32xf32, #tpu.memory_space<vmem>>, vector<1x160x32xf32>
    %150 = vector.shape_cast %149 : vector<1x160x32xf32> to vector<160x32xf32>
    %cst_75 = arith.constant 0.000000e+00 : f32
    %151 = vector.shape_cast %22 : vector<160x1xi1> to vector<160x1xi1>
    %152 = vector.broadcast %151 : vector<160x1xi1> to vector<160x32xi1>
    %153 = vector.broadcast %cst_75 : f32 to vector<160x32xf32>
    %154 = arith.select %152, %150, %153 : vector<160x32xi1>, vector<160x32xf32>
    %c256 = arith.constant 256 : index
    %c0_76 = arith.constant 0 : index
    %155 = vector.load %arg3[%c256, %c0_76] : memref<288x32xf32, #tpu.memory_space<vmem>>, vector<32x32xf32>
    %cst_77 = arith.constant dense<0.000000e+00> : vector<160x32xf32>
    %156 = tpu.matmul %154, %155, %cst_77 {dimension_numbers = #tpu.dot_dimension_numbers<[1], [0], [0], [1], [0, 0, 1, 1], [], []>} : vector<160x32xf32>, vector<32x32xf32>, vector<160x32xf32> -> vector<160x32xf32>
    %157 = arith.addf %144, %156 : vector<160x32xf32>
    %c0_78 = arith.constant 0 : index
    %c0_79 = arith.constant 0 : index
    %158 = vector.load %arg4[%c0_78, %c0_79] : memref<1x32xf32, #tpu.memory_space<vmem>>, vector<1x32xf32>
    %159 = vector.broadcast %158 : vector<1x32xf32> to vector<160x32xf32>
    %160 = arith.addf %157, %159 : vector<160x32xf32>
    %cst_80 = arith.constant 0.000000e+00 : f32
    %161 = vector.broadcast %cst_80 : f32 to vector<160x32xf32>
    %162 = arith.cmpf ogt, %160, %161 : vector<160x32xf32>
    %cst_81 = arith.constant 0.00999999977 : f32
    %163 = vector.broadcast %cst_81 : f32 to vector<160x32xf32>
    %164 = arith.mulf %163, %160 : vector<160x32xf32>
    %165 = arith.select %162, %160, %164 : vector<160x32xi1>, vector<160x32xf32>
    %cst_82 = arith.constant 0.000000e+00 : f32
    %166 = vector.shape_cast %30 : vector<160x1xi1> to vector<160x1xi1>
    %167 = vector.broadcast %166 : vector<160x1xi1> to vector<160x32xi1>
    %168 = vector.broadcast %cst_82 : f32 to vector<160x32xf32>
    %169 = arith.select %167, %165, %168 : vector<160x32xi1>, vector<160x32xf32>
    %c8 = arith.constant 8 : index
    %c0_83 = arith.constant 0 : index
    %170 = vector.load %arg8[%c8, %c0_83] : memref<176x32xf32, #tpu.memory_space<vmem>>, vector<160x32xf32>
    tpu.vector_store %arg8[%c8, %c0_83], %169 {strides = array<i32>} : memref<176x32xf32, #tpu.memory_space<vmem>>, vector<160x32xf32>,
    %cst_84 = arith.constant 0.000000e+00 : f32
    %171 = vector.broadcast %cst_84 : f32 to vector<128x32xf32>
    %c7 = arith.constant 7 : index
    %c0_85 = arith.constant 0 : index
    %172 = vector.load %arg8[%c7, %c0_85] : memref<176x32xf32, #tpu.memory_space<vmem>>, vector<128x32xf32>
    %cst_86 = arith.constant 0.000000e+00 : f32
    %173 = vector.shape_cast %49 : vector<128x1xi1> to vector<128x1xi1>
    %174 = vector.broadcast %173 : vector<128x1xi1> to vector<128x32xi1>
    %175 = vector.broadcast %cst_86 : f32 to vector<128x32xf32>
    %176 = arith.select %174, %172, %175 : vector<128x32xi1>, vector<128x32xf32>
    %c0_87 = arith.constant 0 : index
    %c0_88 = arith.constant 0 : index
    %177 = vector.load %arg5[%c0_87, %c0_88] : memref<288x32xf32, #tpu.memory_space<vmem>>, vector<32x32xf32>
    %cst_89 = arith.constant dense<0.000000e+00> : vector<128x32xf32>
    %178 = tpu.matmul %176, %177, %cst_89 {dimension_numbers = #tpu.dot_dimension_numbers<[1], [0], [0], [1], [0, 0, 1, 1], [], []>} : vector<128x32xf32>, vector<32x32xf32>, vector<128x32xf32> -> vector<128x32xf32>
    %179 = arith.addf %171, %178 : vector<128x32xf32>
    %c8_90 = arith.constant 8 : index
    %c0_91 = arith.constant 0 : index
    %180 = vector.load %arg8[%c8_90, %c0_91] : memref<176x32xf32, #tpu.memory_space<vmem>>, vector<128x32xf32>
    %c32_92 = arith.constant 32 : index
    %c0_93 = arith.constant 0 : index
    %181 = vector.load %arg5[%c32_92, %c0_93] : memref<288x32xf32, #tpu.memory_space<vmem>>, vector<32x32xf32>
    %cst_94 = arith.constant dense<0.000000e+00> : vector<128x32xf32>
    %182 = tpu.matmul %180, %181, %cst_94 {dimension_numbers = #tpu.dot_dimension_numbers<[1], [0], [0], [1], [0, 0, 1, 1], [], []>} : vector<128x32xf32>, vector<32x32xf32>, vector<128x32xf32> -> vector<128x32xf32>
    %183 = arith.addf %179, %182 : vector<128x32xf32>
    %c9 = arith.constant 9 : index
    %c0_95 = arith.constant 0 : index
    %184 = vector.load %arg8[%c9, %c0_95] : memref<176x32xf32, #tpu.memory_space<vmem>>, vector<128x32xf32>
    %cst_96 = arith.constant 0.000000e+00 : f32
    %185 = vector.shape_cast %51 : vector<128x1xi1> to vector<128x1xi1>
    %186 = vector.broadcast %185 : vector<128x1xi1> to vector<128x32xi1>
    %187 = vector.broadcast %cst_96 : f32 to vector<128x32xf32>
    %188 = arith.select %186, %184, %187 : vector<128x32xi1>, vector<128x32xf32>
    %c64_97 = arith.constant 64 : index
    %c0_98 = arith.constant 0 : index
    %189 = vector.load %arg5[%c64_97, %c0_98] : memref<288x32xf32, #tpu.memory_space<vmem>>, vector<32x32xf32>
    %cst_99 = arith.constant dense<0.000000e+00> : vector<128x32xf32>
    %190 = tpu.matmul %188, %189, %cst_99 {dimension_numbers = #tpu.dot_dimension_numbers<[1], [0], [0], [1], [0, 0, 1, 1], [], []>} : vector<128x32xf32>, vector<32x32xf32>, vector<128x32xf32> -> vector<128x32xf32>
    %191 = arith.addf %183, %190 : vector<128x32xf32>
    %c23 = arith.constant 23 : index
    %c0_100 = arith.constant 0 : index
    %192 = vector.load %arg8[%c23, %c0_100] : memref<176x32xf32, #tpu.memory_space<vmem>>, vector<128x32xf32>
    %cst_101 = arith.constant 0.000000e+00 : f32
    %193 = vector.shape_cast %49 : vector<128x1xi1> to vector<128x1xi1>
    %194 = vector.broadcast %193 : vector<128x1xi1> to vector<128x32xi1>
    %195 = vector.broadcast %cst_101 : f32 to vector<128x32xf32>
    %196 = arith.select %194, %192, %195 : vector<128x32xi1>, vector<128x32xf32>
    %c96_102 = arith.constant 96 : index
    %c0_103 = arith.constant 0 : index
    %197 = vector.load %arg5[%c96_102, %c0_103] : memref<288x32xf32, #tpu.memory_space<vmem>>, vector<32x32xf32>
    %cst_104 = arith.constant dense<0.000000e+00> : vector<128x32xf32>
    %198 = tpu.matmul %196, %197, %cst_104 {dimension_numbers = #tpu.dot_dimension_numbers<[1], [0], [0], [1], [0, 0, 1, 1], [], []>} : vector<128x32xf32>, vector<32x32xf32>, vector<128x32xf32> -> vector<128x32xf32>
    %199 = arith.addf %191, %198 : vector<128x32xf32>
    %c24 = arith.constant 24 : index
    %c0_105 = arith.constant 0 : index
    %200 = vector.load %arg8[%c24, %c0_105] : memref<176x32xf32, #tpu.memory_space<vmem>>, vector<128x32xf32>
    %c128_106 = arith.constant 128 : index
    %c0_107 = arith.constant 0 : index
    %201 = vector.load %arg5[%c128_106, %c0_107] : memref<288x32xf32, #tpu.memory_space<vmem>>, vector<32x32xf32>
    %cst_108 = arith.constant dense<0.000000e+00> : vector<128x32xf32>
    %202 = tpu.matmul %200, %201, %cst_108 {dimension_numbers = #tpu.dot_dimension_numbers<[1], [0], [0], [1], [0, 0, 1, 1], [], []>} : vector<128x32xf32>, vector<32x32xf32>, vector<128x32xf32> -> vector<128x32xf32>
    %203 = arith.addf %199, %202 : vector<128x32xf32>
    %c25 = arith.constant 25 : index
    %c0_109 = arith.constant 0 : index
    %204 = vector.load %arg8[%c25, %c0_109] : memref<176x32xf32, #tpu.memory_space<vmem>>, vector<128x32xf32>
    %cst_110 = arith.constant 0.000000e+00 : f32
    %205 = vector.shape_cast %51 : vector<128x1xi1> to vector<128x1xi1>
    %206 = vector.broadcast %205 : vector<128x1xi1> to vector<128x32xi1>
    %207 = vector.broadcast %cst_110 : f32 to vector<128x32xf32>
    %208 = arith.select %206, %204, %207 : vector<128x32xi1>, vector<128x32xf32>
    %c160_111 = arith.constant 160 : index
    %c0_112 = arith.constant 0 : index
    %209 = vector.load %arg5[%c160_111, %c0_112] : memref<288x32xf32, #tpu.memory_space<vmem>>, vector<32x32xf32>
    %cst_113 = arith.constant dense<0.000000e+00> : vector<128x32xf32>
    %210 = tpu.matmul %208, %209, %cst_113 {dimension_numbers = #tpu.dot_dimension_numbers<[1], [0], [0], [1], [0, 0, 1, 1], [], []>} : vector<128x32xf32>, vector<32x32xf32>, vector<128x32xf32> -> vector<128x32xf32>
    %211 = arith.addf %203, %210 : vector<128x32xf32>
    %c39 = arith.constant 39 : index
    %c0_114 = arith.constant 0 : index
    %212 = vector.load %arg8[%c39, %c0_114] : memref<176x32xf32, #tpu.memory_space<vmem>>, vector<128x32xf32>
    %cst_115 = arith.constant 0.000000e+00 : f32
    %213 = vector.shape_cast %49 : vector<128x1xi1> to vector<128x1xi1>
    %214 = vector.broadcast %213 : vector<128x1xi1> to vector<128x32xi1>
    %215 = vector.broadcast %cst_115 : f32 to vector<128x32xf32>
    %216 = arith.select %214, %212, %215 : vector<128x32xi1>, vector<128x32xf32>
    %c192_116 = arith.constant 192 : index
    %c0_117 = arith.constant 0 : index
    %217 = vector.load %arg5[%c192_116, %c0_117] : memref<288x32xf32, #tpu.memory_space<vmem>>, vector<32x32xf32>
    %cst_118 = arith.constant dense<0.000000e+00> : vector<128x32xf32>
    %218 = tpu.matmul %216, %217, %cst_118 {dimension_numbers = #tpu.dot_dimension_numbers<[1], [0], [0], [1], [0, 0, 1, 1], [], []>} : vector<128x32xf32>, vector<32x32xf32>, vector<128x32xf32> -> vector<128x32xf32>
    %219 = arith.addf %211, %218 : vector<128x32xf32>
    %c40 = arith.constant 40 : index
    %c0_119 = arith.constant 0 : index
    %220 = vector.load %arg8[%c40, %c0_119] : memref<176x32xf32, #tpu.memory_space<vmem>>, vector<128x32xf32>
    %c224_120 = arith.constant 224 : index
    %c0_121 = arith.constant 0 : index
    %221 = vector.load %arg5[%c224_120, %c0_121] : memref<288x32xf32, #tpu.memory_space<vmem>>, vector<32x32xf32>
    %cst_122 = arith.constant dense<0.000000e+00> : vector<128x32xf32>
    %222 = tpu.matmul %220, %221, %cst_122 {dimension_numbers = #tpu.dot_dimension_numbers<[1], [0], [0], [1], [0, 0, 1, 1], [], []>} : vector<128x32xf32>, vector<32x32xf32>, vector<128x32xf32> -> vector<128x32xf32>
    %223 = arith.addf %219, %222 : vector<128x32xf32>
    %c41 = arith.constant 41 : index
    %c0_123 = arith.constant 0 : index
    %224 = vector.load %arg8[%c41, %c0_123] : memref<176x32xf32, #tpu.memory_space<vmem>>, vector<128x32xf32>
    %cst_124 = arith.constant 0.000000e+00 : f32
    %225 = vector.shape_cast %51 : vector<128x1xi1> to vector<128x1xi1>
    %226 = vector.broadcast %225 : vector<128x1xi1> to vector<128x32xi1>
    %227 = vector.broadcast %cst_124 : f32 to vector<128x32xf32>
    %228 = arith.select %226, %224, %227 : vector<128x32xi1>, vector<128x32xf32>
    %c256_125 = arith.constant 256 : index
    %c0_126 = arith.constant 0 : index
    %229 = vector.load %arg5[%c256_125, %c0_126] : memref<288x32xf32, #tpu.memory_space<vmem>>, vector<32x32xf32>
    %cst_127 = arith.constant dense<0.000000e+00> : vector<128x32xf32>
    %230 = tpu.matmul %228, %229, %cst_127 {dimension_numbers = #tpu.dot_dimension_numbers<[1], [0], [0], [1], [0, 0, 1, 1], [], []>} : vector<128x32xf32>, vector<32x32xf32>, vector<128x32xf32> -> vector<128x32xf32>
    %231 = arith.addf %223, %230 : vector<128x32xf32>
    %c0_128 = arith.constant 0 : index
    %c0_129 = arith.constant 0 : index
    %232 = vector.load %arg6[%c0_128, %c0_129] : memref<1x32xf32, #tpu.memory_space<vmem>>, vector<1x32xf32>
    %233 = vector.broadcast %232 : vector<1x32xf32> to vector<128x32xf32>
    %234 = arith.addf %231, %233 : vector<128x32xf32>
    %cst_130 = arith.constant 0.000000e+00 : f32
    %235 = vector.broadcast %cst_130 : f32 to vector<128x32xf32>
    %236 = arith.cmpf ogt, %234, %235 : vector<128x32xf32>
    %cst_131 = arith.constant 0.00999999977 : f32
    %237 = vector.broadcast %cst_131 : f32 to vector<128x32xf32>
    %238 = arith.mulf %237, %234 : vector<128x32xf32>
    %239 = arith.select %236, %234, %238 : vector<128x32xi1>, vector<128x32xf32>
    %c33_i32 = arith.constant 33 : i32
    %240 = arith.addi %1, %c33_i32 : i32
    %c0_132 = arith.constant 0 : index
    %241 = arith.index_cast %240 : i32 to index
    %c0_133 = arith.constant 0 : index
    %242 = vector.load %arg2[%c0_132, %241, %c0_133] : memref<1x322x32xf32, #tpu.memory_space<vmem>>, vector<1x128x32xf32>
    %243 = vector.shape_cast %242 : vector<1x128x32xf32> to vector<128x32xf32>
    %244 = arith.addf %239, %243 : vector<128x32xf32>
    %c0_134 = arith.constant 0 : index
    %c0_135 = arith.constant 0 : index
    %c0_136 = arith.constant 0 : index
    %245 = vector.load %arg7[%c0_134, %c0_135, %c0_136] : memref<1x128x32xf32, #tpu.memory_space<vmem>>, vector<1x128x32xf32>
    %246 = vector.shape_cast %245 : vector<1x128x32xf32> to vector<128x32xf32>
    %247 = vector.shape_cast %244 : vector<128x32xf32> to vector<1x128x32xf32>
    tpu.vector_store %arg7[%c0_134, %c0_135, %c0_136], %247 {strides = array<i32>} : memref<1x128x32xf32, #tpu.memory_space<vmem>>, vector<1x128x32xf32>,
    return
  }
  func.func @transform_0(%arg0: i32, %arg1: i32) -> (i32, i32, i32) {
    %c0_i32 = arith.constant 0 : i32
    %c0_i32_0 = arith.constant 0 : i32
    %c0_i32_1 = arith.constant 0 : i32
    return %arg0, %c0_i32, %c0_i32_0 : i32, i32, i32
  }
  func.func @transform_1(%arg0: i32, %arg1: i32) -> (i32, i32) {
    %c0_i32 = arith.constant 0 : i32
    %c0_i32_0 = arith.constant 0 : i32
    %c0_i32_1 = arith.constant 0 : i32
    return %c0_i32, %c0_i32_0 : i32, i32
  }
  func.func @transform_2(%arg0: i32, %arg1: i32) -> (i32, i32) {
    %c0_i32 = arith.constant 0 : i32
    %c0_i32_0 = arith.constant 0 : i32
    %c0_i32_1 = arith.constant 0 : i32
    return %c0_i32, %c0_i32_0 : i32, i32
  }
  func.func @transform_3(%arg0: i32, %arg1: i32) -> (i32, i32) {
    %c0_i32 = arith.constant 0 : i32
    %c0_i32_0 = arith.constant 0 : i32
    %c0_i32_1 = arith.constant 0 : i32
    return %c0_i32, %c0_i32_0 : i32, i32
  }
  func.func @transform_4(%arg0: i32, %arg1: i32) -> (i32, i32) {
    %c0_i32 = arith.constant 0 : i32
    %c0_i32_0 = arith.constant 0 : i32
    %c0_i32_1 = arith.constant 0 : i32
    return %c0_i32, %c0_i32_0 : i32, i32
  }
  func.func @transform_5(%arg0: i32, %arg1: i32) -> (i32, i32, i32) {
    %c0_i32 = arith.constant 0 : i32
    %c0_i32_0 = arith.constant 0 : i32
    return %arg0, %arg1, %c0_i32 : i32, i32, i32
  }
}

</mosaic_0001>

<bundles_post_ra>
// kernel: residual_block.1
= control target key start
LH: loop header
LB: loop body
LE: loop exit
PB: predicated region body
PF: predicated region fallthrough
CT: control target
= control target key end

     0   :  { %10 = vsyncpa [#allocation4], 0  ;;  %s10038_s0 = inlined_call_operand.vmem [shape: f32[2,322,32], index: 0, kind: input, shape index: {}]   ;;  %s10039_s1 = inlined_call_operand.vmem [shape: f32[288,32], index: 1, kind: input, shape index: {}]   ;;  %s10040_s2 = inlined_call_operand.vmem [shape: f32[1,32], index: 2, kind: input, shape index: {}]   ;;  %s10041_s3 = inlined_call_operand.vmem [shape: f32[288,32], index: 3, kind: input, shape index: {}]   ;;  %s10042_s4 = inlined_call_operand.vmem [shape: f32[1,32], index: 4, kind: input, shape index: {}]   ;;  %s10043_s5 = inlined_call_operand.hbm [shape: f32[2,256,32], index: 5, kind: output, shape index: {}]  }
   0x1   :  { %12 = vsyncpa [#allocation4 + $0x1], 0  ;;  %s7940_s18 = smov 0   ;;  %s7942_s19 = smov 0  }
   0x2   :  { %s7944_s20 = smov 0   ;;  %s7946_s21 = smov 0  }
   0x3   :  { %s7948_s22 = smov 0   ;;  %s7950_s23 = smov 0  }
   0x4   :  { %s7952_s24 = smov 0   ;;  %s7954_s25 = smov 0  }
   0x5 LB: > { %s5750_s26 = sadd.s32 4294967295, %s7905_s25   ;;  %s5751_s27 = sadd.s32 4294967294, %s7905_s25   ;;  %s7905_s25 = sphi %s7954_s25, %s18_s25   ;;  %s7901_s24 = sphi %s7952_s24, %s10566_s24   ;;  %s7897_s23 = sphi %s7950_s23, %s10565_s23   ;;  %s7893_s22 = sphi %s7948_s22, %s10564_s22   ;;  %s7889_s21 = sphi %s7946_s21, %s10563_s21   ;;  %s7885_s20 = sphi %s7944_s20, %s10562_s20   ;;  %s7881_s19 = sphi %s7942_s19, %s10561_s19   ;;  %s7877_s18 = sphi %s7940_s18, %s10560_s18  }
   0x6   : > { %s27_s28 = sadd.s32 1, %s7897_s23  ;;  %s30_s29 = sadd.s32 1, %s7901_s24 }
   0x7   : > { %p28_p0 = scmp.ge.s32.totalorder %s27_s28, 2  ;;  %p159_p1 = scmp.ne.s32.totalorder %s7885_s20, %s7881_s19 }
   0x8   : > { %p160_p2 = scmp.eq.s32.totalorder %s5750_s26, 3  ;;  %p165_p5 = scmp.ne.s32.totalorder %s7881_s19, %s7877_s18 }
   0x9   : > { %s10568_s28 = smov (%p28_p0, %s27_s28), 0  ;;  %s10570_s29 = smov (!%p28_p0, %s30_s29), %s7901_s24 }
   0xa   : > { %s145_s30 = ssub.s32 %s7897_s23, %s10568_s28  ;;  %p7991_p3 = por %p160_p2, %p159_p1 }
   0xb   : > { %p32_p4 = scmp.ge.s32.totalorder %s10570_s29, 2  ;;  %p166_p6 = scmp.eq.s32.totalorder %s5751_s27, 3 }
   0xc   : > { %p5754_p7 = scmp.ge.s32.totalorder %s7905_s25, 1  ;;  %p204_p9 = scmp.lt.s32.totalorder %s7905_s25, 5 }
   0xd   : > { %s10572_s29 = smov (%p32_p4, %s10570_s29), 0  ;;  %p8000_p8 = por %p166_p6, %p165_p5 }
   0xe   : > { %s144_s8 = ssub.s32 %s7901_s24, %s10572_s29  ;;  %s149_s9 = sadd.s32 1, %s7885_s20 }
   0xf   : > { %s146_s10 = sor.u32 %s145_s30, %s144_s8  ;;  %p205_p10 = pnand %p5754_p7, %p204_p9 }
  0x10   : > { %p147_p11 = scmp.eq.s32.totalorder %s146_s10, 0 }
  0x11   : > { %208 = sbr.rel (%p205_p10) target bundleno = 1104 (0x450), region = 40 }
  0x12   : > { %s8009_s11 = scalar_select %p147_p11, %s7885_s20, %s149_s9  }
  0x18   : > { %v729_v0 = vld [vmem:[%s10039_s1 + $0x20] sm:$0xff]  ;;  %v730_v1 = vld [vmem:[%s10039_s1 + $0x28] sm:$0xff]  ;;  %v731_v2 = vld [vmem:[%s10039_s1 + $0x30] sm:$0xff]  ;;  %p232_p12 = scmp.lt.s32.totalorder %s7893_s22, 1  ;;  %s5757_s14 = sshll.u32 %s7889_s21, 7  ;;  %v239_v8 = vlaneseq  ;;  %vm10131_vm0 = vcmask 261120  }
  0x19   : > { %v7301_v3 = vpack.c.bf16 %v730_v1, %v729_v0  ;;  %v732_v4 = vld [vmem:[%s10039_s1 + $0x38] sm:$0xff]  ;;  %v703_v6 = vld [vmem:[%s10039_s1] sm:$0xff]  ;;  %v704_v7 = vld [vmem:[%s10039_s1 + $0x8] sm:$0xff]  ;;  %v10175_v48 = vmov 0  ;;  %v10180_v54 = vmov 0  ;;  %s229_s12 = sand.u32 1, %s7881_s19  }
  0x1a   : > { %v7305_v5 = vpack.c.bf16 %v732_v4, %v731_v2  ;;  %s233_s30 = scalar_select %p232_p12, %s7893_s22, 1  ;;  %v7309_v9 = vpack.c.bf16 %v704_v7, %v703_v6  ;;  %v705_v10 = vld [vmem:[%s10039_s1 + $0x10] sm:$0xff]  ;;  %v706_v11 = vld [vmem:[%s10039_s1 + $0x18] sm:$0xff]  ;;  %v8045_v14 = vshrl.u32 %v239_v8, 7  ;;  %v1266_v17 = vld [vmem:[%s10039_s1 + $0x40] sm:$0xff]  ;;  %v10186_v8 = vmov 0 }
  0x1b   : > { %7302 = vmatprep.subr.bf16.mxu0 %v7301_v3  ;;  %v7313_v16 = vpack.c.bf16 %v706_v11, %v705_v10  ;;  %v1267_v18 = vld [vmem:[%s10039_s1 + $0x48] sm:$0xff]  ;;  %v1268_v58 = vld [vmem:[%s10039_s1 + $0x50] sm:$0xff]  ;;  %v1269_v59 = vld [vmem:[%s10039_s1 + $0x58] sm:$0xff]  ;;  %s6270_s16 = sshll.u32 %s7889_s21, 4 }
  0x1c   : > { %7304 = vmatpush3.bf16.msra.mxu0 %v7301_v3  ;;  %s7737_s13 = smul.u32 328, %s233_s30  ;;  %10154 = vst [vmem:[#allocation6_spill] sm:$0xff] %v8045_v14  ;;  %s5758_s30 = sadd.s32 4294967280, %s5757_s14  ;;  %v8058_v19 = vadd.s32 128, %v8045_v14  ;;  %v8064_v21 = vadd.s32 144, %v8045_v14  ;;  %v8078_v25 = vpack.c.bf16 %v1267_v18, %v1266_v17  ;;  %v8116_v33 = vadd.s32 136, %v8045_v14 }
  0x1d   : > { %7306 = vmatprep.subr.bf16.mxu0 %v7305_v5  ;;  %v8061_v20 = vstv %s5758_s30  ;;  %v8130_v36 = vadd.s32 152, %v8045_v14  ;;  %v264_v44 = vand.u32 15, %v8045_v14  ;;  %v8166_v45 = vadd.s32 16, %v8045_v14  ;;  %v1557_v3 = vld [vmem:[%s10039_s1 + $0x60] sm:$0xff]  ;;  %v1558_v4 = vld [vmem:[%s10039_s1 + $0x68] sm:$0xff]  ;;  %s7907_s30 = smov [#allocation3]  }
  0x1e   : > { %s236_s17 = scalar_lea.vmem %s10038_s0, %s7737_s13  ;;  %10155 = vst [vmem:[#allocation7_spill] sm:$0xff] %v8061_v20  ;;  %v8073_v23 = vadd.s32 %v8061_v20, %v8058_v19  ;;  %v8082_v26 = vadd.s32 %v8061_v20, %v8064_v21  ;;  %v8125_v35 = vadd.s32 %v8061_v20, %v8116_v33  ;;  %v8185_v51 = vadd.s32 32, %v8045_v14  ;;  %s5755_s13 = sshll.u32 %s229_s12, 7 }
  0x1f   : > { %s8041_s10 = scalar_lea.vmem %s236_s17, %s5757_s14  ;;  %v8142_v39 = vadd.s32 %v8061_v20, %v8130_v36  ;;  %10172 = vst [vmem:[#allocation24_spill] sm:$0xff] %v8166_v45  ;;  %vm8178_vm1 = vcmp.ne.s32.totalorder %v264_v44, 0  ;;  %v278_v50 = vand.u32 15, %v8166_v45  ;;  %v8205_v57 = vadd.s32 48, %v8045_v14  ;;  %s9915_s15 = scalar_lea.vmem [#allocation3], %s5755_s13 }
  0x20   : > { %7308 = vmatpush3.bf16.msra.mxu0 %v7305_v5  ;;  %v5760_v12 = vld [vmem:[%s8041_s10 + $0x1] sm:$0xff]  ;;  %v5761_v13 = vld [vmem:[%s8041_s10 + $0x9] sm:$0xff]  ;;  %v8049_v15 = vld [vmem:[%s8041_s10 + $0x11] sm:$0xff]  ;;  %10156 = vst [vmem:[#allocation8_spill] sm:$0xff] %v8073_v23  ;;  %v10176_v48 = vsel %vm8178_vm1, 4294967295, %v10175_v48  ;;  %v292_v56 = vand.u32 15, %v8185_v51  ;;  %v7321_v62 = vpack.c.bf16 %v1269_v59, %v1268_v58  ;;  %v8246_v7 = vpack.c.bf16 %v1558_v4, %v1557_v3 }
  0x21   : > { %6679 = vmatprep.mubr.msk.f32.mxu0 %vm10131_vm0, %v5760_v12  ;;  %7310 = vmatprep.subr.bf16.mxu0 %v7309_v9  ;;  %v8069_v22 = vld [vmem:[%s8041_s10 + $0x19] sm:$0xff]  ;;  %v8076_v24 = vld [vmem:[%s8041_s10 + $0x21] sm:$0xff]  ;;  %10157 = vst [vmem:[#allocation9_spill] sm:$0xff] %v8082_v26  ;;  %v8089_v27 = vld [vmem:[%s8041_s10 + $0x29] sm:$0xff]  ;;  %vm8196_vm2 = vcmp.ne.s32.totalorder %v278_v50, 0  ;;  %v306_v1 = vand.u32 15, %v8205_v57 }
  0x22   : > { %v8092_v28 = vld [vmem:[%s8041_s10 + $0x31] sm:$0xff]  ;;  %v8100_v29 = vld [vmem:[%s8041_s10 + $0x39] sm:$0xff]  ;;  %v8103_v30 = vld [vmem:[%s8041_s10 + $0x41] sm:$0xff]  ;;  %10164 = vst [vmem:[#allocation16_spill] sm:$0xff] %v8125_v35  ;;  %v10181_v54 = vsel %vm8196_vm2, 4294967295, %v10180_v54  ;;  %vm8220_vm3 = vcmp.ne.s32.totalorder %v292_v56, 0 }
  0x23   : > { %6680 = vmatmul.mubr.msk.f32.vlgmr.msra.gmra.mrb[0].mxu0 %vm10131_vm0, %v5761_v13  ;;  %10158 = vst [vmem:[#allocation10_spill] sm:$0xff] %v8092_v28  ;;  %10159 = vst [vmem:[#allocation11_spill] sm:$0xff] %v8100_v29  ;;  %v8108_v31 = vld [vmem:[%s8041_s10 + $0x32] sm:$0xff]  ;;  %v8113_v32 = vld [vmem:[%s8041_s10 + $0x49] sm:$0xff]  ;;  %v8229_v2 = vadd.s32 64, %v8045_v14  ;;  %vm8248_vm4 = vcmp.ne.s32.totalorder %v306_v1, 0 }
  0x24   : > { %7312 = vmatpush3.bf16.msra.mxu0 %v7309_v9  ;;  %6682 = vmatprep.mubr.msk.f32.mxu0 %vm10131_vm0, %v8049_v15  ;;  %10160 = vst [vmem:[#allocation12_spill] sm:$0xff] %v8103_v30  ;;  %10161 = vst [vmem:[#allocation13_spill] sm:$0xff] %v8108_v31  ;;  %v8121_v34 = vld [vmem:[%s8041_s10 + $0x51] sm:$0xff]  ;;  %v8135_v37 = vld [vmem:[%s8041_s10 + $0x59] sm:$0xff]  ;;  %v10187_v8 = vsel %vm8248_vm4, 4294967295, %v10186_v8  ;;  %v8257_v11 = vadd.s32 80, %v8045_v14 }
  0x25   : > { %7314 = vmatprep.subr.bf16.mxu0 %v7313_v16  ;;  %10162 = vst [vmem:[#allocation14_spill] sm:$0xff] %v8113_v32  ;;  %6986 = vmatprep.mubr.msk.f32.mxu1 %vm10131_vm0, %v8108_v31  ;;  %10163 = vst [vmem:[#allocation15_spill] sm:$0xff] %v8121_v34  ;;  %v8138_v38 = vld [vmem:[%s8041_s10 + $0x61] sm:$0xff]  ;;  %v8149_v40 = vld [vmem:[%s8041_s10 + $0x69] sm:$0xff]  ;;  %v320_v10 = vand.u32 15, %v8229_v2  ;;  %v10192_v50 = vmov 0 }
  0x26   : > { %10165 = vst [vmem:[#allocation17_spill] sm:$0xff] %v8135_v37  ;;  %10166 = vst [vmem:[#allocation18_spill] sm:$0xff] %v8138_v38  ;;  %v8152_v41 = vld [vmem:[%s8041_s10 + $0x71] sm:$0xff]  ;;  %v8159_v42 = vld [vmem:[%s8041_s10 + $0x79] sm:$0xff]  ;;  %v334_v18 = vand.u32 15, %v8257_v11  ;;  %v8298_v58 = vadd.s32 112, %v8045_v14 }
  0x27   : > { %6683 = vmatmul.mubr.msk.f32.gmra.mrb[2].mxu0 %vm10131_vm0, %v8069_v22  ;;  %10167 = vst [vmem:[#allocation19_spill] sm:$0xff] %v8142_v39  ;;  %10168 = vst [vmem:[#allocation20_spill] sm:$0xff] %v8149_v40  ;;  %v8162_v43 = vld [vmem:[%s8041_s10 + $0x81] sm:$0xff]  ;;  %v8173_v46 = vld [vmem:[%s8041_s10 + $0x89] sm:$0xff]  ;;  %vm8269_vm5 = vcmp.ne.s32.totalorder %v320_v10, 0  ;;  %v10202_v26 = vmov 0 }
  0x28   : > { %6685 = vmatprep.mubr.msk.f32.mxu0 %vm10131_vm0, %v8076_v24  ;;  %7316 = vmatpush3.bf16.msra.mxu0 %v7313_v16  ;;  %10169 = vst [vmem:[#allocation21_spill] sm:$0xff] %v8152_v41  ;;  %10170 = vst [vmem:[#allocation22_spill] sm:$0xff] %v8159_v42  ;;  %v8176_v47 = vld [vmem:[%s8041_s10 + $0x91] sm:$0xff]  ;;  %v623_v49 = vld [vmem:[%s8041_s10] sm:$0xff]  ;;  %v10189_v16 = vmov 0  ;;  %vm8289_vm6 = vcmp.ne.s32.totalorder %v334_v18, 0 }
  0x29   : > { %7318 = vmatprep.subr.bf16.mxu0 %v8078_v25  ;;  %10171 = vst [vmem:[#allocation23_spill] sm:$0xff] %v8162_v43  ;;  %10173 = vst [vmem:[#allocation25_spill] sm:$0xff] %v8173_v46  ;;  %v8192_v52 = vld [vmem:[%s8041_s10 + $0x99] sm:$0xff]  ;;  %v683_v53 = vsel %vm8178_vm1, %v623_v49, 0.0  ;;  %v8201_v55 = vld [vmem:[%s8041_s10 + $0x10] sm:$0xff]  ;;  %v10190_v16 = vsel %vm8269_vm5, 4294967295, %v10189_v16 }
  0x2a   : > { %10174 = vst [vmem:[#allocation26_spill] sm:$0xff] %v8176_v47  ;;  %10177 = vst [vmem:[#allocation27_spill] sm:$0xff] %v10176_v48  ;;  %v624_v60 = vld [vmem:[%s8041_s10 + $0x8] sm:$0xff]  ;;  %v685_v61 = vsel %vm8196_vm2, %v8201_v55, 0.0  ;;  %v8225_v0 = vld [vmem:[%s8041_s10 + $0x20] sm:$0xff]  ;;  %v10193_v50 = vsel %vm8289_vm6, 4294967295, %v10192_v50 }
  0x2b   : > { %6686 = vmatmul.mubr.msk.f32.gmra.mrb[4].mxu0 %vm10131_vm0, %v8089_v27  ;;  %10178 = vst [vmem:[#allocation28_spill] sm:$0xff] %v8185_v51  ;;  %10179 = vst [vmem:[#allocation29_spill] sm:$0xff] %v8192_v52  ;;  %v8241_v5 = vld [vmem:[%s8041_s10 + $0x18] sm:$0xff]  ;;  %v687_v6 = vsel %vm8220_vm3, %v8225_v0, 0.0  ;;  %v8253_v9 = vld [vmem:[%s8041_s10 + $0x30] sm:$0xff]  ;;  %v362_v1 = vand.u32 15, %v8298_v58 }
  0x2c   : > { %6688 = vmatprep.mubr.msk.f32.mxu0 %vm10131_vm0, %v8092_v28  ;;  %10182 = vst [vmem:[#allocation30_spill] sm:$0xff] %v8205_v57  ;;  %10185 = vst [vmem:[#allocation31_spill] sm:$0xff] %v8229_v2  ;;  %v8263_v12 = vld [vmem:[%s8041_s10 + $0x28] sm:$0xff]  ;;  %v689_v13 = vsel %vm8248_vm4, %v8253_v9, 0.0  ;;  %v8274_v17 = vld [vmem:[%s8041_s10 + $0x40] sm:$0xff]  ;;  %v10210_v51 = vmov 0 }
  0x2d   : > { %10188 = vst [vmem:[#allocation32_spill] sm:$0xff] %v8257_v11  ;;  %v8284_v44 = vld [vmem:[%s8041_s10 + $0x38] sm:$0xff]  ;;  %v691_v49 = vsel %vm8269_vm5, %v8274_v17, 0.0  ;;  %10194 = vst [vmem:[#allocation34_spill] sm:$0xff] %v8298_v58  ;;  %v8304_v59 = vld [vmem:[%s8041_s10 + $0x48] sm:$0xff]  ;;  %vm8326_vm8 = vcmp.ne.s32.totalorder %v362_v1, 0 }
  0x2e   : > { %v8321_v3 = vld [vmem:[%s8041_s10 + $0x58] sm:$0xff]  ;;  %v8331_v10 = vld [vmem:[%s8041_s10 + $0x70] sm:$0xff]  ;;  %v8338_v18 = vld [vmem:[%s8041_s10 + $0x68] sm:$0xff]  ;;  %v10205_v58 = vmov 0  ;;  %s6271_s14 = sshll.u32 %s7893_s22, 5  ;;  %s5648_s22 = sshll.u32 %s9915_s15, 4  ;;  %s9978_s22 = int_to_ptr.vmem [resolvable:$true] %s5648_s22 }
  0x2f   : > { %6689 = vmatmul.mubr.msk.f32.gmra.mrb[6].mxu0 %vm10131_vm0, %v8100_v29  ;;  %v8355_v1 = vld [vmem:[%s8041_s10 + $0x78] sm:$0xff]  ;;  %v1559_v2 = vld [vmem:[%s10039_s1 + $0x70] sm:$0xff]  ;;  %v2120_v48 = vld [vmem:[%s10039_s1 + $0xa8] sm:$0xff]  ;;  %s5645_s17 = sadd.s32 %s6271_s14, %s6270_s16  ;;  %s7811_s9 = scalar_lea.vmem %s9978_s22, 2048 }
  0x30   : > { %6691 = vmatprep.mubr.msk.f32.mxu0 %vm10131_vm0, %v8103_v30  ;;  %v8387_v35 = vld [vmem:[%s8041_s10 + $0x98] sm:$0xff]  ;;  %s6272_s21 = sshll.u32 %s5645_s17, 7  ;;  %p7812_p13 = scmp.ne.s32.totalorder %s9978_s22, %s7811_s9 }
  0x31   : > { %v8411_v57 = vld [vmem:[%s8041_s10 + $0x12] sm:$0xff]  ;;  %v8418_v45 = vld [vmem:[%s8041_s10 + $0x1a] sm:$0xff]  ;;  %s9976_s8 = scalar_lea.hbm %s10043_s5, %s6272_s21  ;;  %s7815_s13 = sshll.u32 %s7907_s30, 4  ;;  %s7816_s13 = int_to_ptr.vmem [resolvable:$false] %s7815_s13 }
  0x32   : > { %10209 = vst [vmem:[#allocation39_spill] sm:$0xff] %v8411_v57  ;;  %10212 = vst [vmem:[#allocation40_spill] sm:$0xff] %v8418_v45  ;;  %p7813_p0 = pnand %p7812_p13, %p7991_p3  ;;  %s7817_s16 = scalar_lea.vmem %s7816_s13, 4096 }
  0x33   : > { %6692 = vmatmul.mubr.msk.f32.gmra.mrb[8].mxu0 %vm10131_vm0, %v8113_v32  ;;  %p7818_p2 = scmp.lt.s32.totalorder %s9978_s22, %s7816_s13  ;;  %p7819_p4 = scmp.lt.s32.totalorder %s7817_s16, %s7811_s9 }
  0x34   : > { %6694 = vmatprep.mubr.msk.f32.mxu0 %vm10131_vm0, %v8121_v34  ;;  %p7814_p1 = pneg %p7813_p0 }
  0x35   : > { %p7820_p5 = por %p7819_p4, %p7818_p2 }
  0x37   : > { %6695 = vmatmul.mubr.msk.f32.gmra.mrb[10].mxu0 %vm10131_vm0, %v8135_v37  ;;  %p7821_p6 = pnand %p7820_p5, %p7814_p1 }
  0x38   : > { %6697 = vmatprep.mubr.msk.f32.mxu0 %vm10131_vm0, %v8138_v38  ;;  %v397_v38 = vand.u32 15, %v8130_v36 }
  0x3b   : > { %6698 = vmatmul.mubr.msk.f32.gmra.mrb[12].mxu0 %vm10131_vm0, %v8149_v40  ;;  %v8559_v40 = vld [vmem:[%s8041_s10 + $0x8a] sm:$0xff] }
  0x3c   : > { %6700 = vmatprep.mubr.msk.f32.mxu0 %vm10131_vm0, %v8152_v41  ;;  %v8552_v41 = vld [vmem:[%s8041_s10 + $0x82] sm:$0xff] }
  0x3f   : > { %6701 = vmatmul.mubr.msk.f32.gmra.mrb[14].mxu0 %vm10131_vm0, %v8159_v42  ;;  %v8542_v42 = vld [vmem:[%s8041_s10 + $0x7a] sm:$0xff] }
  0x40   : > { %6703 = vmatprep.mubr.msk.f32.mxu0 %vm10131_vm0, %v8162_v43  ;;  %v8535_v43 = vld [vmem:[%s8041_s10 + $0x72] sm:$0xff] }
  0x43   : > { %6704 = vmatmul.mubr.msk.f32.gmra.mrb[16].mxu0 %vm10131_vm0, %v8173_v46  ;;  %v10228_v46 = vmov 0 }
  0x44   : > { %6706 = vmatprep.mubr.msk.f32.mxu0 %vm10131_vm0, %v8176_v47  ;;  %v8518_v47 = vld [vmem:[%s8041_s10 + $0x62] sm:$0xff] }
  0x47   : > { %6707 = vmatmul.mubr.msk.f32.gmra.mrb[18].mxu0 %vm10131_vm0, %v8192_v52 }
  0x48   : > { %6717 = vmatprep.mubr.msk.f32.mxu0 %vm10131_vm0, %v683_v53  ;;  %v8294_v53 = vld [vmem:[%s8041_s10 + $0x50] sm:$0xff] }
  0x4b   : > { %6718 = vmatmul.mubr.msk.f32.vlgmr.msra.gmra.mrb[0].mxu0 %vm10131_vm0, %v624_v60  ;;  %v693_v60 = vsel %vm8289_vm6, %v8294_v53, 0.0 }
  0x4c   : > { %7320 = vmatpush3.bf16.msra.mxu0 %v8078_v25  ;;  %6720 = vmatprep.mubr.msk.f32.mxu0 %vm10131_vm0, %v685_v61  ;;  %v8278_v25 = vadd.s32 96, %v8045_v14  ;;  %v10195_v61 = vmov 0 }
  0x4d   : > { %7322 = vmatprep.subr.bf16.mxu0 %v7321_v62 }
  0x4e   : > { %10191 = vst [vmem:[#allocation33_spill] sm:$0xff] %v8278_v25  ;;  %v348_v56 = vand.u32 15, %v8278_v25  ;;  %v5822_v25 = vld [vmem:[%s8041_s10 + $0xa] sm:$0xff] }
  0x4f   : > { %6721 = vmatmul.mubr.msk.f32.gmra.mrb[2].mxu0 %vm10131_vm0, %v8241_v5 }
  0x50   : > { %6723 = vmatprep.mubr.msk.f32.mxu0 %vm10131_vm0, %v687_v6  ;;  %7324 = vmatpush3.bf16.msra.mxu0 %v7321_v62  ;;  %vm8309_vm7 = vcmp.ne.s32.totalorder %v348_v56, 0  ;;  %v8314_v62 = vld [vmem:[%s8041_s10 + $0x60] sm:$0xff]  ;;  %v10197_v6 = vmov 0  ;;  %v10199_v56 = vmov 0 }
  0x51   : > { %7326 = vmatprep.subr.bf16.mxu0 %v8246_v7  ;;  %v10196_v61 = vsel %vm8309_vm7, 4294967295, %v10195_v61  ;;  %v695_v4 = vsel %vm8309_vm7, %v8314_v62, 0.0  ;;  %v10198_v6 = vsel %vm8326_vm8, 4294967295, %v10197_v6 }
  0x53   : > { %6724 = vmatmul.mubr.msk.f32.gmra.mrb[4].mxu0 %vm10131_vm0, %v8263_v12 }
  0x54   : > { %6726 = vmatprep.mubr.msk.f32.mxu0 %vm10131_vm0, %v689_v13  ;;  %v376_v13 = vand.u32 15, %v8058_v19  ;;  %v390_v19 = vand.u32 15, %v8064_v21  ;;  %v8368_v21 = vld [vmem:[%s8041_s10 + $0x90] sm:$0xff] }
  0x56   : > { %vm8343_vm9 = vcmp.ne.s32.totalorder %v376_v13, 0  ;;  %v8361_v13 = vadd.s32 8, %v8045_v14  ;;  %vm8363_vm10 = vcmp.ne.s32.totalorder %v390_v19, 0  ;;  %v8381_v19 = vadd.s32 24, %v8045_v14 }
  0x57   : > { %6727 = vmatmul.mubr.msk.f32.gmra.mrb[6].mxu0 %vm10131_vm0, %v8284_v44  ;;  %v10200_v56 = vsel %vm8343_vm9, 4294967295, %v10199_v56  ;;  %v10203_v26 = vsel %vm8363_vm10, 4294967295, %v10202_v26  ;;  %v701_v39 = vsel %vm8363_vm10, %v8368_v21, 0.0 }
  0x58   : > { %6729 = vmatprep.mubr.msk.f32.mxu0 %vm10131_vm0, %v691_v49  ;;  %v697_v49 = vsel %vm8326_vm8, %v8331_v10, 0.0  ;;  %10201 = vst [vmem:[#allocation35_spill] sm:$0xff] %v8361_v13  ;;  %v271_v23 = vand.u32 15, %v8361_v13  ;;  %10204 = vst [vmem:[#allocation36_spill] sm:$0xff] %v8381_v19  ;;  %v285_v11 = vand.u32 15, %v8381_v19  ;;  %v8397_v13 = vadd.s32 40, %v8045_v14 }
  0x59   : > { %v8422_v19 = vadd.s32 56, %v8045_v14 }
  0x5a   : > { %vm8390_vm11 = vcmp.ne.s32.totalorder %v271_v23, 15  ;;  %10208 = vst [vmem:[#allocation38_spill] sm:$0xff] %v8397_v13  ;;  %vm8413_vm12 = vcmp.ne.s32.totalorder %v285_v11, 15  ;;  %v299_v20 = vand.u32 15, %v8397_v13  ;;  %v8438_v11 = vld [vmem:[%s8041_s10 + $0x22] sm:$0xff]  ;;  %v8445_v13 = vld [vmem:[%s8041_s10 + $0x2a] sm:$0xff] }
  0x5b   : > { %6730 = vmatmul.mubr.msk.f32.gmra.mrb[8].mxu0 %vm10131_vm0, %v8304_v59  ;;  %v10206_v58 = vsel %vm8390_vm11, 4294967295, %v10205_v58  ;;  %v1247_v23 = vsel %vm8390_vm11, %v5822_v25, 0.0  ;;  %v10211_v51 = vsel %vm8413_vm12, 4294967295, %v10210_v51  ;;  %10213 = vst [vmem:[#allocation41_spill] sm:$0xff] %v8422_v19  ;;  %v1829_v25 = vld [vmem:[%s10039_s1 + $0x88] sm:$0xff]  ;;  %10214 = vst [vmem:[#allocation42_spill] sm:$0xff] %v8438_v11 }
  0x5c   : > { %6732 = vmatprep.mubr.msk.f32.mxu0 %vm10131_vm0, %v693_v60  ;;  %v8348_v60 = vld [vmem:[%s8041_s10 + $0x80] sm:$0xff]  ;;  %10207 = vst [vmem:[#allocation37_spill] sm:$0xff] %v10206_v58  ;;  %vm8440_vm13 = vcmp.ne.s32.totalorder %v299_v20, 15  ;;  %10217 = vst [vmem:[#allocation43_spill] sm:$0xff] %v8445_v13 }
  0x5d   : > { %v1251_v20 = vsel %vm8440_vm13, %v8445_v13, 0.0 }
  0x5f   : > { %6733 = vmatmul.mubr.msk.f32.gmra.mrb[10].mxu0 %vm10131_vm0, %v8321_v3 }
  0x60   : > { %6735 = vmatprep.mubr.msk.f32.mxu0 %vm10131_vm0, %v695_v4  ;;  %v699_v4 = vsel %vm8343_vm9, %v8348_v60, 0.0 }
  0x63   : > { %6736 = vmatmul.mubr.msk.f32.gmra.mrb[12].mxu0 %vm10131_vm0, %v8338_v18 }
  0x64   : > { %6738 = vmatprep.mubr.msk.f32.mxu0 %vm10131_vm0, %v697_v49  ;;  %v8374_v49 = vld [vmem:[%s8041_s10 + $0x88] sm:$0xff] }
  0x67   : > { %6739 = vmatmul.mubr.msk.f32.gmra.mrb[14].mxu0 %vm10131_vm0, %v8355_v1 }
  0x68   : > { %6741 = vmatprep.mubr.msk.f32.mxu0 %vm10131_vm0, %v699_v4  ;;  %v5821_v4 = vld [vmem:[%s8041_s10 + $0x2] sm:$0xff] }
  0x6b   : > { %6742 = vmatmul.mubr.msk.f32.gmra.mrb[16].mxu0 %vm10131_vm0, %v8374_v49 }
  0x6c   : > { %6744 = vmatprep.mubr.msk.f32.mxu0 %vm10131_vm0, %v701_v39  ;;  %v1560_v39 = vld [vmem:[%s10039_s1 + $0x78] sm:$0xff] }
  0x6d   : > { %v7329_v52 = vpack.c.bf16 %v1560_v39, %v1559_v2  ;;  %v1249_v2 = vsel %vm8413_vm12, %v8418_v45, 0.0  ;;  %v10215_v39 = vmov 0  ;;  %v8464_v45 = vld [vmem:[%s8041_s10 + $0x3a] sm:$0xff] }
  0x6e   : > { %v10216_v39 = vsel %vm8440_vm13, 4294967295, %v10215_v39 }
  0x6f   : > { %6745 = vmatmul.mubr.msk.f32.gmra.mrb[18].mxu0 %vm10131_vm0, %v8387_v35 }
  0x70   : > { %6755 = vmatprep.mubr.msk.f32.mxu0 %vm10131_vm0, %v5821_v4  ;;  %v1828_v4 = vld [vmem:[%s10039_s1 + $0x80] sm:$0xff] }
  0x71   : > { %v8451_v58 = vpack.c.bf16 %v1829_v25, %v1828_v4  ;;  %v8468_v25 = vadd.s32 88, %v8045_v14 }
  0x73   : > { %6756 = vmatmul.mubr.msk.f32.vlgmr.msra.gmra.mrb[0].mxu0 %vm10131_vm0, %v1247_v23  ;;  %v313_v23 = vand.u32 15, %v8422_v19  ;;  %v10219_v19 = vmov 0  ;;  %10221 = vst [vmem:[#allocation45_spill] sm:$0xff] %v8468_v25  ;;  %v341_v13 = vand.u32 15, %v8468_v25  ;;  %v8505_v25 = vld [vmem:[%s8041_s10 + $0x5a] sm:$0xff] }
  0x74   : > { %7328 = vmatpush3.bf16.msra.mxu0 %v8246_v7  ;;  %6758 = vmatprep.mubr.msk.f32.mxu0 %vm10131_vm0, %v8411_v57  ;;  %v8449_v7 = vadd.s32 72, %v8045_v14 }
  0x75   : > { %7330 = vmatprep.subr.bf16.mxu0 %v7329_v52  ;;  %vm8459_vm14 = vcmp.ne.s32.totalorder %v313_v23, 15  ;;  %v10222_v23 = vmov 0  ;;  %vm8500_vm11 = vcmp.ne.s32.totalorder %v341_v13, 15 }
  0x76   : > { %10218 = vst [vmem:[#allocation44_spill] sm:$0xff] %v8449_v7  ;;  %v10220_v19 = vsel %vm8459_vm14, 4294967295, %v10219_v19  ;;  %v327_v4 = vand.u32 15, %v8449_v7  ;;  %v8485_v7 = vld [vmem:[%s8041_s10 + $0x4a] sm:$0xff]  ;;  %v1257_v13 = vsel %vm8500_vm11, %v8505_v25, 0.0 }
  0x77   : > { %6759 = vmatmul.mubr.msk.f32.gmra.mrb[2].mxu0 %vm10131_vm0, %v1249_v2  ;;  %v8478_v2 = vld [vmem:[%s8041_s10 + $0x42] sm:$0xff] }
  0x78   : > { %6761 = vmatprep.mubr.msk.f32.mxu0 %vm10131_vm0, %v8438_v11  ;;  %7332 = vmatpush3.bf16.msra.mxu0 %v7329_v52  ;;  %v1253_v52 = vsel %vm8459_vm14, %v8464_v45, 0.0  ;;  %vm8480_vm15 = vcmp.ne.s32.totalorder %v327_v4, 15  ;;  %v10225_v11 = vmov 0 }
  0x79   : > { %7334 = vmatprep.subr.bf16.mxu0 %v8451_v58  ;;  %v10223_v23 = vsel %vm8480_vm15, 4294967295, %v10222_v23  ;;  %v1255_v4 = vsel %vm8480_vm15, %v8485_v7, 0.0  ;;  %v10226_v11 = vsel %vm8500_vm11, 4294967295, %v10225_v11 }
  0x7b   : > { %6762 = vmatmul.mubr.msk.f32.gmra.mrb[4].mxu0 %vm10131_vm0, %v1251_v20  ;;  %v8489_v20 = vadd.s32 104, %v8045_v14 }
  0x7c   : > { %6764 = vmatprep.mubr.msk.f32.mxu0 %vm10131_vm0, %v8108_v31  ;;  %v8498_v31 = vld [vmem:[%s8041_s10 + $0x52] sm:$0xff] }
  0x7d   : > { %10224 = vst [vmem:[#allocation46_spill] sm:$0xff] %v8489_v20  ;;  %v355_v57 = vand.u32 15, %v8489_v20  ;;  %v8525_v20 = vld [vmem:[%s8041_s10 + $0x6a] sm:$0xff] }
  0x7f   : > { %6765 = vmatmul.mubr.msk.f32.gmra.mrb[6].mxu0 %vm10131_vm0, %v1253_v52  ;;  %v8509_v52 = vadd.s32 120, %v8045_v14  ;;  %vm8520_vm15 = vcmp.ne.s32.totalorder %v355_v57, 15  ;;  %v10231_v57 = vmov 0 }
  0x80   : > { %6767 = vmatprep.mubr.msk.f32.mxu0 %vm10131_vm0, %v8478_v2  ;;  %v10229_v46 = vsel %vm8520_vm15, 4294967295, %v10228_v46 }
  0x81   : > { %10227 = vst [vmem:[#allocation47_spill] sm:$0xff] %v8509_v52  ;;  %10230 = vst [vmem:[#allocation48_spill] sm:$0xff] %v10229_v46  ;;  %v369_v14 = vand.u32 15, %v8509_v52  ;;  %v383_v52 = vand.u32 15, %v8116_v33 }
  0x83   : > { %6768 = vmatmul.mubr.msk.f32.gmra.mrb[8].mxu0 %vm10131_vm0, %v1255_v4  ;;  %v1259_v4 = vsel %vm8520_vm15, %v8525_v20, 0.0  ;;  %vm8537_vm11 = vcmp.ne.s32.totalorder %v369_v14, 15  ;;  %vm8554_vm15 = vcmp.ne.s32.totalorder %v383_v52, 15  ;;  %v10234_v14 = vmov 0 }
  0x84   : > { %6770 = vmatprep.mubr.msk.f32.mxu0 %vm10131_vm0, %v8498_v31  ;;  %v10232_v57 = vsel %vm8537_vm11, 4294967295, %v10231_v57  ;;  %v10235_v14 = vsel %vm8554_vm15, 4294967295, %v10234_v14  ;;  %v1263_v33 = vsel %vm8554_vm15, %v8559_v40, 0.0  ;;  %v10237_v52 = vmov 0 }
  0x85   : > { %10233 = vst [vmem:[#allocation49_spill] sm:$0xff] %v10232_v57  ;;  %10236 = vst [vmem:[#allocation50_spill] sm:$0xff] %v10235_v14  ;;  %v8576_v57 = vld [vmem:[%s8041_s10 + $0x9a] sm:$0xff] }
  0x86   : > { %v1831_v14 = vld [vmem:[%s10039_s1 + $0x98] sm:$0xff] }
  0x87   : > { %6771 = vmatmul.mubr.msk.f32.gmra.mrb[10].mxu0 %vm10131_vm0, %v1257_v13  ;;  %v1261_v13 = vsel %vm8537_vm11, %v8542_v42, 0.0  ;;  %vm8571_vm11 = vcmp.ne.s32.totalorder %v397_v38, 15  ;;  %v1830_v38 = vld [vmem:[%s10039_s1 + $0x90] sm:$0xff] }
  0x88   : > { %6773 = vmatprep.mubr.msk.f32.mxu0 %vm10131_vm0, %v8518_v47  ;;  %v10238_v52 = vsel %vm8571_vm11, 4294967295, %v10237_v52  ;;  %v1265_v36 = vsel %vm8571_vm11, %v8576_v57, 0.0 }
  0x89   : > { %10239 = vst [vmem:[#allocation51_spill] sm:$0xff] %v10238_v52  ;;  %v7337_v52 = vpack.c.bf16 %v1831_v14, %v1830_v38  ;;  %v2972_v38 = vld [vmem:[%s10039_s1 + $0x100] sm:$0xff] }
  0x8b   : > { %6774 = vmatmul.mubr.msk.f32.gmra.mrb[12].mxu0 %vm10131_vm0, %v1259_v4  ;;  %v8569_v4 = vld [vmem:[%s8041_s10 + $0x92] sm:$0xff] }
  0x8c   : > { %6776 = vmatprep.mubr.msk.f32.mxu0 %vm10131_vm0, %v8535_v43 }
  0x8f   : > { %6777 = vmatmul.mubr.msk.f32.gmra.mrb[14].mxu0 %vm10131_vm0, %v1261_v13  ;;  %v1537_v13 = vsel %vm8178_vm1, %v8201_v55, 0.0  ;;  %v2119_v55 = vld [vmem:[%s10039_s1 + $0xa0] sm:$0xff] }
  0x90   : > { %6779 = vmatprep.mubr.msk.f32.mxu0 %vm10131_vm0, %v8552_v41  ;;  %v7341_v14 = vpack.c.bf16 %v2120_v48, %v2119_v55  ;;  %v1545_v48 = vsel %vm8269_vm5, %v8294_v53, 0.0  ;;  %v1553_v55 = vsel %vm8343_vm9, %v8368_v21, 0.0  ;;  %vm10243_vm9 = vnez %v10226_v11 }
  0x93   : > { %6780 = vmatmul.mubr.msk.f32.gmra.mrb[16].mxu0 %vm10131_vm0, %v1263_v33  ;;  %v1539_v33 = vsel %vm8196_vm2, %v8225_v0, 0.0 }
  0x94   : > { %6782 = vmatprep.mubr.msk.f32.mxu0 %vm10131_vm0, %v8569_v4 }
  0x97   : > { %6783 = vmatmul.mubr.msk.f32.gmra.mrb[18].mxu0 %vm10131_vm0, %v1265_v36  ;;  %v1541_v36 = vsel %vm8220_vm3, %v8253_v9, 0.0 }
  0x98   : > { %6793 = vmatprep.mubr.msk.f32.mxu0 %vm10131_vm0, %v1537_v13  ;;  %v1551_v13 = vsel %vm8326_vm8, %v8348_v60, 0.0  ;;  %vm10244_vm8 = vnez %v10229_v46 }
  0x9b   : > { %6794 = vmatmul.mubr.msk.f32.vlgmr.msra.gmra.mrb[0].mxu0 %vm10131_vm0, %v8241_v5  ;;  %v1543_v5 = vsel %vm8248_vm4, %v8274_v17, 0.0 }
  0x9c   : > { %7336 = vmatpush3.bf16.msra.mxu0 %v8451_v58  ;;  %6796 = vmatprep.mubr.msk.f32.mxu0 %vm10131_vm0, %v1539_v33  ;;  %v1547_v58 = vsel %vm8289_vm6, %v8314_v62, 0.0  ;;  %v2973_v33 = vld [vmem:[%s10039_s1 + $0x108] sm:$0xff] }
  0x9d   : > { %7338 = vmatprep.subr.bf16.mxu0 %v7337_v52 }
  0x9f   : > { %6797 = vmatmul.mubr.msk.f32.gmra.mrb[2].mxu0 %vm10131_vm0, %v8263_v12 }
  0xa0   : > { %6799 = vmatprep.mubr.msk.f32.mxu0 %vm10131_vm0, %v1541_v36  ;;  %7340 = vmatpush3.bf16.msra.mxu0 %v7337_v52  ;;  %v1549_v52 = vsel %vm8309_vm7, %v8331_v10, 0.0  ;;  %v8653_v36 = vpack.c.bf16 %v2973_v33, %v2972_v38  ;;  %v8679_v38 = vld [vmem:[%s8041_s10 + $0xa8] sm:$0xff]  ;;  %v2121_v33 = vld [vmem:[%s10039_s1 + $0xb0] sm:$0xff] }
  0xa1   : > { %7342 = vmatprep.subr.bf16.mxu0 %v7341_v14  ;;  %10241 = vst [vmem:[#allocation53_spill] sm:$0xff] %v8679_v38 }
  0xa2   : > { %7445 = vmatprep.subr.bf16.mxu1 %v8653_v36 }
  0xa3   : > { %6800 = vmatmul.mubr.msk.f32.gmra.mrb[4].mxu0 %vm10131_vm0, %v8284_v44  ;;  %7447 = vmatpush3.bf16.msra.mxu1 %v8653_v36 }
  0xa4   : > { %6802 = vmatprep.mubr.msk.f32.mxu0 %vm10131_vm0, %v1543_v5  ;;  %v8656_v5 = vld [vmem:[%s8041_s10 + $0xa0] sm:$0xff] }
  0xa7   : > { %6803 = vmatmul.mubr.msk.f32.gmra.mrb[6].mxu0 %vm10131_vm0, %v8304_v59 }
  0xa8   : > { %6805 = vmatprep.mubr.msk.f32.mxu0 %vm10131_vm0, %v1545_v48  ;;  %v2974_v48 = vld [vmem:[%s10039_s1 + $0x110] sm:$0xff] }
  0xab   : > { %6806 = vmatmul.mubr.msk.f32.gmra.mrb[8].mxu0 %vm10131_vm0, %v8321_v3 }
  0xac   : > { %6808 = vmatprep.mubr.msk.f32.mxu0 %vm10131_vm0, %v1547_v58  ;;  %v2975_v58 = vld [vmem:[%s10039_s1 + $0x118] sm:$0xff] }
  0xaf   : > { %6809 = vmatmul.mubr.msk.f32.gmra.mrb[10].mxu0 %vm10131_vm0, %v8338_v18 }
  0xb0   : > { %6811 = vmatprep.mubr.msk.f32.mxu0 %vm10131_vm0, %v1549_v52  ;;  %v1555_v52 = vsel %vm8363_vm10, %v8656_v5, 0.0  ;;  %vm10242_vm10 = vnez %v10223_v23 }
  0xb3   : > { %6812 = vmatmul.mubr.msk.f32.gmra.mrb[12].mxu0 %vm10131_vm0, %v8355_v1 }
  0xb4   : > { %6814 = vmatprep.mubr.msk.f32.mxu0 %vm10131_vm0, %v1551_v13  ;;  %v8672_v13 = vpack.c.bf16 %v2975_v58, %v2974_v48  ;;  %v2955_v48 = vsel %vm8413_vm12, %v8464_v45, 0.0 }
  0xb6   : > { %10240 = vst [vmem:[#allocation52_spill] sm:$0xff] %v8672_v13  ;;  %7446 = vmatprep.subr.bf16.mxu1 %v8672_v13 }
  0xb7   : > { %6815 = vmatmul.mubr.msk.f32.gmra.mrb[14].mxu0 %vm10131_vm0, %v8374_v49  ;;  %7448 = vmatpush3.bf16.msra.mxu1 %v8672_v13  ;;  %v2411_v13 = vld [vmem:[%s10039_s1 + $0xc8] sm:$0xff] }
  0xb8   : > { %6817 = vmatprep.mubr.msk.f32.mxu0 %vm10131_vm0, %v1553_v55  ;;  %v2122_v55 = vld [vmem:[%s10039_s1 + $0xb8] sm:$0xff] }
  0xb9   : > { %v7345_v58 = vpack.c.bf16 %v2122_v55, %v2121_v33  ;;  %v2959_v33 = vsel %vm8459_vm14, %v8505_v25, 0.0  ;;  %v10246_v55 = vld [vmem:[#allocation49_spill] sm:$0xff] }
  0xba   : > { %6987 = vmatmul.mubr.msk.f32.vlgmr.msra.gmra.mrb[0].mxu1 %vm10131_vm0, %v2955_v48  ;;  %vm10247_vm7 = vnez %v10246_v55 }
  0xbb   : > { %6818 = vmatmul.mubr.msk.f32.gmra.mrb[16].mxu0 %vm10131_vm0, %v8387_v35  ;;  %6989 = vmatprep.mubr.msk.f32.mxu1 %vm10131_vm0, %v8478_v2  ;;  %v2967_v48 = vsel %vm10247_vm7, %v8576_v57, 0.0 }
  0xbc   : > { %6820 = vmatprep.mubr.msk.f32.mxu0 %vm10131_vm0, %v1555_v52  ;;  %v2410_v52 = vld [vmem:[%s10039_s1 + $0xc0] sm:$0xff] }
  0xbf   : > { %6821 = vmatmul.mubr.msk.f32.gmra.mrb[18].mxu0 %vm10131_vm0, %v8679_v38  ;;  %v2957_v38 = vsel %vm8440_vm13, %v8485_v7, 0.0 }
  0xc0   : > { %6831 = vmatprep.mubr.msk.f32.mxu0 %vm10131_vm0, %v8049_v15  ;;  %6990 = vmatmul.mubr.msk.f32.gmra.mrb[2].mxu1 %vm10131_vm0, %v2957_v38  ;;  %v7349_v15 = vpack.c.bf16 %v2411_v13, %v2410_v52  ;;  %v2965_v13 = vsel %vm10244_vm8, %v8559_v40, 0.0  ;;  %v10245_v38 = vld [vmem:[#allocation18_spill] sm:$0xff]  ;;  %v5962_v52 = vld [vmem:[%s8041_s10 + $0xa2] sm:$0xff] }
  0xc1   : > { %6992 = vmatprep.mubr.msk.f32.mxu1 %vm10131_vm0, %v8498_v31 }
  0xc3   : > { %6832 = vmatmul.mubr.msk.f32.vlgmr.msra.gmra.mrb[0].mxu0 %vm10131_vm0, %v8069_v22  ;;  %v2961_v22 = vsel %vm10242_vm10, %v8525_v20, 0.0 }
  0xc4   : > { %7344 = vmatpush3.bf16.msra.mxu0 %v7341_v14  ;;  %6834 = vmatprep.mubr.msk.f32.mxu0 %vm10131_vm0, %v8076_v24  ;;  %v2963_v14 = vsel %vm10243_vm9, %v8542_v42, 0.0 }
  0xc5   : > { %7346 = vmatprep.subr.bf16.mxu0 %v7345_v58  ;;  %6993 = vmatmul.mubr.msk.f32.gmra.mrb[4].mxu1 %vm10131_vm0, %v2959_v33  ;;  %v10249_v33 = vld [vmem:[#allocation21_spill] sm:$0xff] }
  0xc6   : > { %6995 = vmatprep.mubr.msk.f32.mxu1 %vm10131_vm0, %v8518_v47 }
  0xc7   : > { %6835 = vmatmul.mubr.msk.f32.gmra.mrb[2].mxu0 %vm10131_vm0, %v8089_v27 }
  0xc8   : > { %6837 = vmatprep.mubr.msk.f32.mxu0 %vm10131_vm0, %v8092_v28  ;;  %7348 = vmatpush3.bf16.msra.mxu0 %v7345_v58  ;;  %v10248_v58 = vld [vmem:[#allocation20_spill] sm:$0xff]  ;;  %v2682_v28 = vld [vmem:[%s10039_s1 + $0xe8] sm:$0xff] }
  0xc9   : > { %7350 = vmatprep.subr.bf16.mxu0 %v7349_v15  ;;  %6996 = vmatmul.mubr.msk.f32.gmra.mrb[6].mxu1 %vm10131_vm0, %v2961_v22  ;;  %v5963_v22 = vld [vmem:[%s8041_s10 + $0xaa] sm:$0xff] }
  0xca   : > { %6998 = vmatprep.mubr.msk.f32.mxu1 %vm10131_vm0, %v8535_v43 }
  0xcb   : > { %6838 = vmatmul.mubr.msk.f32.gmra.mrb[4].mxu0 %vm10131_vm0, %v8100_v29  ;;  %v2681_v29 = vld [vmem:[%s10039_s1 + $0xe0] sm:$0xff] }
  0xcc   : > { %6840 = vmatprep.mubr.msk.f32.mxu0 %vm10131_vm0, %v8103_v30  ;;  %v10255_v30 = vld [vmem:[#allocation26_spill] sm:$0xff] }
  0xcd   : > { %6999 = vmatmul.mubr.msk.f32.gmra.mrb[8].mxu1 %vm10131_vm0, %v2963_v14 }
  0xce   : > { %7001 = vmatprep.mubr.msk.f32.mxu1 %vm10131_vm0, %v8552_v41 }
  0xcf   : > { %6841 = vmatmul.mubr.msk.f32.gmra.mrb[6].mxu0 %vm10131_vm0, %v8113_v32  ;;  %v10254_v32 = vld [vmem:[#allocation25_spill] sm:$0xff] }
  0xd0   : > { %6843 = vmatprep.mubr.msk.f32.mxu0 %vm10131_vm0, %v8121_v34 }
  0xd1   : > { %7002 = vmatmul.mubr.msk.f32.gmra.mrb[10].mxu1 %vm10131_vm0, %v2965_v13  ;;  %v2969_v13 = vsel %vm8554_vm15, %v5963_v22, 0.0 }
  0xd2   : > { %7004 = vmatprep.mubr.msk.f32.mxu1 %vm10131_vm0, %v8569_v4 }
  0xd3   : > { %6844 = vmatmul.mubr.msk.f32.gmra.mrb[8].mxu0 %vm10131_vm0, %v8135_v37  ;;  %v6085_v37 = vld [vmem:[%s8041_s10 + $0xb2] sm:$0xff] }
  0xd4   : > { %6846 = vmatprep.mubr.msk.f32.mxu0 %vm10131_vm0, %v10245_v38  ;;  %v10251_v38 = vld [vmem:[#allocation22_spill] sm:$0xff] }
  0xd5   : > { %7005 = vmatmul.mubr.msk.f32.gmra.mrb[12].mxu1 %vm10131_vm0, %v2967_v48  ;;  %v6086_v48 = vld [vmem:[%s8041_s10 + $0xba] sm:$0xff] }
  0xd6   : > { %7007 = vmatprep.mubr.msk.f32.mxu1 %vm10131_vm0, %v5962_v52  ;;  %v2971_v34 = vsel %vm8571_vm11, %v6086_v48, 0.0  ;;  %v2412_v48 = vld [vmem:[%s10039_s1 + $0xd0] sm:$0xff] }
  0xd7   : > { %6847 = vmatmul.mubr.msk.f32.gmra.mrb[10].mxu0 %vm10131_vm0, %v10248_v58  ;;  %v10252_v58 = vld [vmem:[#allocation23_spill] sm:$0xff] }
  0xd8   : > { %6849 = vmatprep.mubr.msk.f32.mxu0 %vm10131_vm0, %v10249_v33  ;;  %v6045_v33 = vld [vmem:[%s8041_s10 + $0xb9] sm:$0xff] }
  0xd9   : > { %7008 = vmatmul.mubr.msk.f32.gmra.mrb[14].mxu1 %vm10131_vm0, %v2969_v13  ;;  %v10257_v13 = vld [vmem:[#allocation29_spill] sm:$0xff] }
  0xda   : > { %7010 = vmatprep.mubr.msk.f32.mxu1 %vm10131_vm0, %v6085_v37  ;;  %v8790_v37 = vld [vmem:[%s8041_s10 + $0xa9] sm:$0xff] }
  0xdb   : > { %6850 = vmatmul.mubr.msk.f32.gmra.mrb[12].mxu0 %vm10131_vm0, %v10251_v38  ;;  %v8783_v38 = vld [vmem:[%s8041_s10 + $0xa1] sm:$0xff]  ;;  %10258 = vst [vmem:[#allocation51_spill] sm:$0xff] %v8790_v37 }
  0xdc   : > { %6852 = vmatprep.mubr.msk.f32.mxu0 %vm10131_vm0, %v10252_v58  ;;  %10256 = vst [vmem:[#allocation50_spill] sm:$0xff] %v8783_v38 }
  0xdd   : > { %7011 = vmatmul.mubr.msk.f32.gmra.mrb[16].mxu1 %vm10131_vm0, %v2971_v34  ;;  %v2413_v34 = vld [vmem:[%s10039_s1 + $0xd8] sm:$0xff] }
  0xde   : > { %v7353_v58 = vpack.c.bf16 %v2413_v34, %v2412_v48  ;;  %v10265_v48 = vld [vmem:[#allocation13_spill] sm:$0xff]  ;;  %v2104_v34 = vsel %vm8440_vm13, %v8464_v45, 0.0  ;;  %v2114_v45 = vsel %vm10247_vm7, %v8559_v40, 0.0  ;;  %v2390_v40 = vsel %vm8178_vm1, %v8225_v0, 0.0 }
  0xdf   : > { %6853 = vmatmul.mubr.msk.f32.gmra.mrb[14].mxu0 %vm10131_vm0, %v10254_v32  ;;  %v10261_v32 = vld [vmem:[#allocation37_spill] sm:$0xff]  ;;  %v2394_v0 = vsel %vm8220_vm3, %v8274_v17, 0.0  ;;  %vm10269_vm7 = vnez %v10198_v6 }
  0xe0   : > { %6855 = vmatprep.mubr.msk.f32.mxu0 %vm10131_vm0, %v10255_v30  ;;  %v10259_v30 = vld [vmem:[#allocation39_spill] sm:$0xff]  ;;  %vm10262_vm6 = vnez %v10261_v32 }
  0xe3   : > { %6856 = vmatmul.mubr.msk.f32.gmra.mrb[16].mxu0 %vm10131_vm0, %v10257_v13  ;;  %v10260_v13 = vld [vmem:[#allocation40_spill] sm:$0xff] }
  0xe4   : > { %6858 = vmatprep.mubr.msk.f32.mxu0 %vm10131_vm0, %v8783_v38  ;;  %v2100_v38 = vsel %vm10262_vm6, %v10260_v13, 0.0  ;;  %v7357_v13 = vpack.c.bf16 %v2682_v28, %v2681_v29  ;;  %v2106_v28 = vsel %vm8459_vm14, %v8485_v7, 0.0  ;;  %v2108_v29 = vsel %vm10242_vm10, %v8505_v25, 0.0  ;;  %v2684_v7 = vld [vmem:[%s10039_s1 + $0xf8] sm:$0xff] }
  0xe5   : > { %v2392_v25 = vsel %vm8196_vm2, %v8253_v9, 0.0  ;;  %v2396_v9 = vsel %vm8248_vm4, %v8294_v53, 0.0  ;;  %v2404_v53 = vsel %vm10269_vm7, %v8368_v21, 0.0  ;;  %v10280_v21 = vld [vmem:[#allocation18_spill] sm:$0xff]  ;;  %vm10391_vm4 = vcmask 261120  }
  0xe7   : > { %6859 = vmatmul.mubr.msk.f32.gmra.mrb[18].mxu0 %vm10131_vm0, %v8790_v37  ;;  %v10263_v37 = vld [vmem:[#allocation42_spill] sm:$0xff] }
  0xe8   : > { %6869 = vmatprep.mubr.msk.f32.mxu0 %vm10131_vm0, %v10259_v30  ;;  %v10264_v30 = vld [vmem:[#allocation43_spill] sm:$0xff] }
  0xe9   : > { %v2102_v32 = vsel %vm8413_vm12, %v10264_v30, 0.0  ;;  %v2953_v14 = vsel %vm10262_vm6, %v10264_v30, 0.0 }
  0xeb   : > { %6870 = vmatmul.mubr.msk.f32.vlgmr.msra.gmra.mrb[0].mxu0 %vm10131_vm0, %v2100_v38  ;;  %v10288_v38 = vld [vmem:[#allocation50_spill] sm:$0xff] }
  0xec   : > { %7352 = vmatpush3.bf16.msra.mxu0 %v7349_v15  ;;  %6872 = vmatprep.mubr.msk.f32.mxu0 %vm10131_vm0, %v10263_v37  ;;  %v10287_v15 = vld [vmem:[#allocation29_spill] sm:$0xff] }
  0xed   : > { %7354 = vmatprep.subr.bf16.mxu0 %v7353_v58 }
  0xef   : > { %6873 = vmatmul.mubr.msk.f32.gmra.mrb[2].mxu0 %vm10131_vm0, %v2102_v32  ;;  %v2110_v32 = vsel %vm10243_vm9, %v8525_v20, 0.0  ;;  %vm10271_vm9 = vnez %v10203_v26  ;;  %v10274_v26 = vld [vmem:[#allocation52_spill] sm:$0xff]  ;;  %v10282_v20 = vld [vmem:[#allocation21_spill] sm:$0xff] }
  0xf0   : > { %6875 = vmatprep.mubr.msk.f32.mxu0 %vm10131_vm0, %v10265_v48  ;;  %7356 = vmatpush3.bf16.msra.mxu0 %v7353_v58  ;;  %v6044_v58 = vld [vmem:[%s8041_s10 + $0xb1] sm:$0xff] }
  0xf1   : > { %7358 = vmatprep.subr.bf16.mxu0 %v7357_v13 }
  0xf3   : > { %6876 = vmatmul.mubr.msk.f32.gmra.mrb[4].mxu0 %vm10131_vm0, %v2104_v34 }
  0xf4   : > { %6878 = vmatprep.mubr.msk.f32.mxu0 %vm10131_vm0, %v8478_v2 }
  0xf7   : > { %6879 = vmatmul.mubr.msk.f32.gmra.mrb[6].mxu0 %vm10131_vm0, %v2106_v28 }
  0xf8   : > { %6881 = vmatprep.mubr.msk.f32.mxu0 %vm10131_vm0, %v8498_v31  ;;  %v2112_v31 = vsel %vm10244_vm8, %v8542_v42, 0.0  ;;  %v10266_v42 = vld [vmem:[#allocation27_spill] sm:$0xff]  ;;  %vm10270_vm8 = vnez %v10200_v56 }
  0xf9   : > { %v10275_v56 = vld [vmem:[#allocation11_spill] sm:$0xff] }
  0xfb   : > { %6882 = vmatmul.mubr.msk.f32.gmra.mrb[8].mxu0 %vm10131_vm0, %v2108_v29 }
  0xfc   : > { %6884 = vmatprep.mubr.msk.f32.mxu0 %vm10131_vm0, %v8518_v47  ;;  %v2683_v47 = vld [vmem:[%s10039_s1 + $0xf0] sm:$0xff] }
  0xfd   : > { %v7361_v2 = vpack.c.bf16 %v2684_v7, %v2683_v47  ;;  %v3440_v7 = vld [vmem:[%s10041_s3 + $0x20] sm:$0xff] }
  0xff   : > { %6885 = vmatmul.mubr.msk.f32.gmra.mrb[10].mxu0 %vm10131_vm0, %v2110_v32 }
 0x100   : > { %6887 = vmatprep.mubr.msk.f32.mxu0 %vm10131_vm0, %v8535_v43  ;;  %v2116_v43 = vsel %vm8554_vm15, %v8576_v57, 0.0  ;;  %vm10268_vm15 = vnez %v10196_v61  ;;  %v10283_v57 = vld [vmem:[#allocation22_spill] sm:$0xff] }
 0x103   : > { %6888 = vmatmul.mubr.msk.f32.gmra.mrb[12].mxu0 %vm10131_vm0, %v2112_v31 }
 0x104   : > { %6890 = vmatprep.mubr.msk.f32.mxu0 %vm10131_vm0, %v8552_v41  ;;  %v2118_v41 = vsel %vm8571_vm11, %v5963_v22, 0.0  ;;  %vm10267_vm11 = vnez %v10193_v50  ;;  %v10290_v22 = vld [vmem:[#allocation37_spill] sm:$0xff] }
 0x105   : > { %v2400_v17 = vsel %vm10267_vm11, %v8331_v10, 0.0  ;;  %v10272_v10 = vld [vmem:[#allocation53_spill] sm:$0xff] }
 0x107   : > { %6891 = vmatmul.mubr.msk.f32.gmra.mrb[14].mxu0 %vm10131_vm0, %v2114_v45 }
 0x108   : > { %6893 = vmatprep.mubr.msk.f32.mxu0 %vm10131_vm0, %v8569_v4  ;;  %v10284_v4 = vld [vmem:[#allocation23_spill] sm:$0xff] }
 0x10b   : > { %6894 = vmatmul.mubr.msk.f32.gmra.mrb[16].mxu0 %vm10131_vm0, %v2116_v43 }
 0x10c   : > { %6896 = vmatprep.mubr.msk.f32.mxu0 %vm10131_vm0, %v5962_v52  ;;  %v10289_v52 = vld [vmem:[#allocation51_spill] sm:$0xff] }
 0x10f   : > { %6897 = vmatmul.mubr.msk.f32.gmra.mrb[18].mxu0 %vm10131_vm0, %v2118_v41 }
 0x110   : > { %6907 = vmatprep.mubr.msk.f32.mxu0 %vm10131_vm0, %v2390_v40 }
 0x113   : > { %6908 = vmatmul.mubr.msk.f32.vlgmr.msra.gmra.mrb[0].mxu0 %vm10131_vm0, %v8263_v12  ;;  %v2398_v12 = vsel %vm8269_vm5, %v8314_v62, 0.0  ;;  %v6003_v62 = vld [vmem:[%s8041_s10 + $0xb0] sm:$0xff] }
 0x114   : > { %7360 = vmatpush3.bf16.msra.mxu0 %v7357_v13  ;;  %6910 = vmatprep.mubr.msk.f32.mxu0 %vm10131_vm0, %v2392_v25  ;;  %v3441_v25 = vld [vmem:[%s10041_s3 + $0x28] sm:$0xff] }
 0x115   : > { %7362 = vmatprep.subr.bf16.mxu0 %v7361_v2 }
 0x117   : > { %6911 = vmatmul.mubr.msk.f32.gmra.mrb[2].mxu0 %vm10131_vm0, %v8284_v44  ;;  %v2402_v44 = vsel %vm10268_vm15, %v8348_v60, 0.0  ;;  %v10276_v60 = vld [vmem:[#allocation12_spill] sm:$0xff] }
 0x118   : > { %6913 = vmatprep.mubr.msk.f32.mxu0 %vm10131_vm0, %v2394_v0  ;;  %7364 = vmatpush3.bf16.msra.mxu0 %v7361_v2  ;;  %v7373_v2 = vpack.c.bf16 %v3441_v25, %v3440_v7  ;;  %v10299_v7 = vld [vmem:[#allocation31_spill] sm:$0xff] }
 0x119   : > { %7366 = vmatprep.subr.bf16.mxu0 %v8653_v36 }
 0x11a   : > { %7374 = vmatprep.subr.bf16.mxu1 %v7373_v2 }
 0x11b   : > { %6914 = vmatmul.mubr.msk.f32.gmra.mrb[4].mxu0 %vm10131_vm0, %v8304_v59  ;;  %v2406_v59 = vsel %vm10270_vm8, %v8656_v5, 0.0  ;;  %v10286_v5 = vld [vmem:[#allocation26_spill] sm:$0xff]  ;;  %7376 = vmatpush3.bf16.msra.mxu1 %v7373_v2 }
 0x11c   : > { %6916 = vmatprep.mubr.msk.f32.mxu0 %vm10131_vm0, %v2396_v9 }
 0x11f   : > { %6917 = vmatmul.mubr.msk.f32.gmra.mrb[6].mxu0 %vm10131_vm0, %v8321_v3  ;;  %v2408_v3 = vsel %vm10271_vm9, %v6003_v62, 0.0  ;;  %v3420_v62 = vld [vmem:[%s10041_s3] sm:$0xff] }
 0x120   : > { %6919 = vmatprep.mubr.msk.f32.mxu0 %vm10131_vm0, %v2398_v12 }
 0x123   : > { %6920 = vmatmul.mubr.msk.f32.gmra.mrb[8].mxu0 %vm10131_vm0, %v8338_v18  ;;  %v6004_v18 = vld [vmem:[%s8041_s10 + $0xb8] sm:$0xff] }
 0x124   : > { %6922 = vmatprep.mubr.msk.f32.mxu0 %vm10131_vm0, %v2400_v17 }
 0x127   : > { %6923 = vmatmul.mubr.msk.f32.gmra.mrb[10].mxu0 %vm10131_vm0, %v8355_v1  ;;  %v10279_v1 = vld [vmem:[#allocation17_spill] sm:$0xff] }
 0x128   : > { %6925 = vmatprep.mubr.msk.f32.mxu0 %vm10131_vm0, %v2402_v44  ;;  %v3442_v44 = vld [vmem:[%s10041_s3 + $0x30] sm:$0xff] }
 0x12b   : > { %6926 = vmatmul.mubr.msk.f32.gmra.mrb[12].mxu0 %vm10131_vm0, %v8374_v49  ;;  %v10281_v49 = vld [vmem:[#allocation20_spill] sm:$0xff] }
 0x12c   : > { %6928 = vmatprep.mubr.msk.f32.mxu0 %vm10131_vm0, %v2404_v53  ;;  %v3443_v53 = vld [vmem:[%s10041_s3 + $0x38] sm:$0xff] }
 0x12f   : > { %6929 = vmatmul.mubr.msk.f32.gmra.mrb[14].mxu0 %vm10131_vm0, %v8387_v35  ;;  %v10273_v35 = vld [vmem:[#allocation10_spill] sm:$0xff] }
 0x130   : > { %6931 = vmatprep.mubr.msk.f32.mxu0 %vm10131_vm0, %v2406_v59  ;;  %v7377_v59 = vpack.c.bf16 %v3443_v53, %v3442_v44 }
 0x132   : > { %7378 = vmatprep.subr.bf16.mxu1 %v7377_v59 }
 0x133   : > { %6932 = vmatmul.mubr.msk.f32.gmra.mrb[16].mxu0 %vm10131_vm0, %v10272_v10  ;;  %7380 = vmatpush3.bf16.msra.mxu1 %v7377_v59 }
 0x134   : > { %6934 = vmatprep.mubr.msk.f32.mxu0 %vm10131_vm0, %v2408_v3  ;;  %v3421_v3 = vld [vmem:[%s10041_s3 + $0x8] sm:$0xff] }
 0x135   : > { %v9028_v10 = vpack.c.bf16 %v3421_v3, %v3420_v62  ;;  %v10320_v62 = vld [vmem:[#allocation33_spill] sm:$0xff] }
 0x137   : > { %6935 = vmatmul.mubr.msk.f32.gmra.mrb[18].mxu0 %vm10131_vm0, %v6004_v18  ;;  %7382 = vmatprep.subr.bf16.mxu1 %v9028_v10  ;;  %v10291_v18 = vld [vmem:[#allocation36_spill] sm:$0xff] }
 0x138   : > { %6945 = vmatprep.mubr.msk.f32.mxu0 %vm10131_vm0, %v8076_v24  ;;  %v10277_v24 = vld [vmem:[#allocation14_spill] sm:$0xff] }
 0x13b   : > { %6946 = vmatmul.mubr.msk.f32.vlgmr.msra.gmra.mrb[0].mxu0 %vm10131_vm0, %v8089_v27  ;;  %v10278_v27 = vld [vmem:[#allocation15_spill] sm:$0xff] }
 0x13c   : > { %7368 = vmatpush3.bf16.msra.mxu0 %v8653_v36  ;;  %6948 = vmatprep.mubr.msk.f32.mxu0 %vm10131_vm0, %v10273_v35  ;;  %v10285_v36 = vld [vmem:[#allocation25_spill] sm:$0xff]  ;;  %v10292_v35 = vld [vmem:[#allocation7_spill] sm:$0xff] }
 0x13d   : > { %7370 = vmatprep.subr.bf16.mxu0 %v10274_v26  ;;  %v9059_v25 = vadd.s32 %v10292_v35, %v10299_v7 }
 0x13f   : > { %6949 = vmatmul.mubr.msk.f32.gmra.mrb[2].mxu0 %vm10131_vm0, %v10275_v56  ;;  %v10293_v56 = vld [vmem:[#allocation24_spill] sm:$0xff] }
 0x140   : > { %6951 = vmatprep.mubr.msk.f32.mxu0 %vm10131_vm0, %v10276_v60  ;;  %7372 = vmatpush3.bf16.msra.mxu0 %v10274_v26  ;;  %v545_v26 = vadd.s32 %v10292_v35, %v10291_v18  ;;  %v544_v60 = vadd.s32 %v10292_v35, %v10293_v56 }
 0x142   : > { %vm585_vm9 = vcmp.lt.s32.totalorder %v545_v26, 256  ;;  %vm10300_vm10 = vcmp.ge.s32.totalorder %v545_v26, 0  ;;  %vm10303_vm7 = vcmp.lt.s32.totalorder %v544_v60, 256  ;;  %vm10304_vm15 = vcmp.ge.s32.totalorder %v544_v60, 0  ;;  %v10307_v26 = vld [vmem:[#allocation45_spill] sm:$0xff]  ;;  %v10308_v60 = vld [vmem:[#allocation32_spill] sm:$0xff] }
 0x143   : > { %6952 = vmatmul.mubr.msk.f32.gmra.mrb[4].mxu0 %vm10131_vm0, %v10277_v24  ;;  %v10294_v24 = vld [vmem:[#allocation38_spill] sm:$0xff]  ;;  %vm9067_vm6 = vmand %vm10300_vm10, %vm585_vm9  ;;  %vm10309_vm10 = vcmask 261120  }
 0x144   : > { %6954 = vmatprep.mubr.msk.f32.mxu0 %vm10131_vm0, %v10278_v27  ;;  %v547_v27 = vadd.s32 %v10292_v35, %v10294_v24  ;;  %vm9074_vm11 = vmand %vm10304_vm15, %vm10303_vm7 }
 0x146   : > { %vm10311_vm7 = vcmp.ge.s32.totalorder %v547_v27, 0 }
 0x147   : > { %6955 = vmatmul.mubr.msk.f32.gmra.mrb[6].mxu0 %vm10131_vm0, %v10279_v1  ;;  %v10295_v1 = vld [vmem:[#allocation28_spill] sm:$0xff] }
 0x148   : > { %6957 = vmatprep.mubr.msk.f32.mxu0 %vm10131_vm0, %v10280_v21  ;;  %v546_v21 = vadd.s32 %v10292_v35, %v10295_v1  ;;  %v9089_v1 = vadd.s32 %v10292_v35, %v10308_v60 }
 0x14a   : > { %vm10316_vm15 = vcmp.ge.s32.totalorder %v546_v21, 0 }
 0x14b   : > { %6958 = vmatmul.mubr.msk.f32.gmra.mrb[8].mxu0 %vm10131_vm0, %v10281_v49 }
 0x14c   : > { %6960 = vmatprep.mubr.msk.f32.mxu0 %vm10131_vm0, %v10282_v20  ;;  %v9042_v20 = vld [vmem:[%s10040_s2] ss:$0 sm:$0xff] }
 0x14f   : > { %6961 = vmatmul.mubr.msk.f32.gmra.mrb[10].mxu0 %vm10131_vm0, %v10283_v57  ;;  %v10296_v57 = vld [vmem:[#allocation41_spill] sm:$0xff] }
 0x150   : > { %6963 = vmatprep.mubr.msk.f32.mxu0 %vm10131_vm0, %v10284_v4  ;;  %v9046_v4 = vadd.s32 %v10292_v35, %v10296_v57 }
 0x152   : > { %vm589_vm8 = vcmp.lt.s32.totalorder %v9046_v4, 256 }
 0x153   : > { %6964 = vmatmul.mubr.msk.f32.gmra.mrb[12].mxu0 %vm10131_vm0, %v10285_v36  ;;  %v10297_v36 = vld [vmem:[#allocation30_spill] sm:$0xff] }
 0x154   : > { %6966 = vmatprep.mubr.msk.f32.mxu0 %vm10131_vm0, %v10286_v5  ;;  %v9050_v5 = vadd.s32 %v10292_v35, %v10297_v36 }
 0x157   : > { %6967 = vmatmul.mubr.msk.f32.gmra.mrb[14].mxu0 %vm10131_vm0, %v10287_v15 }
 0x158   : > { %6969 = vmatprep.mubr.msk.f32.mxu0 %vm10131_vm0, %v10288_v38 }
 0x15b   : > { %6970 = vmatmul.mubr.msk.f32.gmra.mrb[16].mxu0 %vm10131_vm0, %v10289_v52  ;;  %v10298_v52 = vld [vmem:[#allocation44_spill] sm:$0xff] }
 0x15c   : > { %6972 = vmatprep.mubr.msk.f32.mxu0 %vm10131_vm0, %v6044_v58 }
 0x15f   : > { %6973 = vmatmul.mubr.msk.f32.gmra.mrb[18].mxu0 %vm10131_vm0, %v6045_v33  ;;  %v9054_v33 = vadd.s32 %v10292_v35, %v10298_v52 }
 0x160   : > { %6983 = vmatprep.mubr.msk.f32.mxu0 %vm10131_vm0, %v10263_v37 }
 0x163   : > { %6984 = vmatmul.mubr.msk.f32.vlgmr.msra.gmra.mrb[0].mxu0 %vm10131_vm0, %v2953_v14 }
 0x18d   : > { %v6988_v13 = vpop.f32.mrb[0].mxu1 }
 0x18e   : > { %v3112_v48 = vpop.f32.mrb[1].mxu1 }
 0x193   : > { %v6991_v34 = vpop.f32.mrb[2].mxu1 }
 0x194   : > { %v8980_v28 = vpop.f32.mrb[3].mxu1 }
 0x198   : > { %v8982_v29 = vpop.f32.mrb[4].mxu1 }
 0x199   : > { %v8984_v32 = vpop.f32.mrb[5].mxu1 }
 0x19c   : > { %v8986_v31 = vpop.f32.mrb[6].mxu1 }
 0x19d   : > { %v8988_v45 = vpop.f32.mrb[7].mxu1 }
 0x1a0   : > { %v8990_v37 = vpop.f32.mrb[8].mxu1 }
 0x1a1   : > { %v8992_v43 = vpop.f32.mrb[9].mxu1 }
 0x1a4   : > { %v8994_v30 = vpop.f32.mrb[10].mxu1 }
 0x1a5   : > { %v8996_v41 = vpop.f32.mrb[11].mxu1 }
 0x1a8   : > { %v8998_v40 = vpop.f32.mrb[12].mxu1 }
 0x1a9   : > { %v9000_v47 = vpop.f32.mrb[13].mxu1 }
 0x1ac   : > { %v9008_v0 = vpop.f32.mrb[14].mxu1 }
 0x1ad   : > { %v9010_v9 = vpop.f32.mrb[15].mxu1 }
 0x1b0   : > { %v9012_v12 = vpop.f32.mrb[16].mxu1 }
 0x1b1   : > { %v9014_v17 = vpop.f32.mrb[17].mxu1 }
 0x212   : > { %v6950_v49 = vpop.f32.mrb[2].mxu0 }
 0x213   : > { %v7449_v15 = vadd.f32 %v6988_v13, %v6950_v49  ;;  %v2821_v38 = vpop.f32.mrb[3].mxu0 }
 0x214   : > { %v7450_v58 = vadd.f32 %v3112_v48, %v2821_v38 }
 0x215   : > { %v3231_v14 = vadd.f32 %v7449_v15, %v9042_v20 }
 0x216   : > { %v3230_v13 = vadd.f32 %v7450_v58, %v9042_v20  ;;  %v6953_v2 = vpop.f32.mrb[4].mxu0 }
 0x217   : > { %vm3251_vm13 = vcmp.gt.f32.partialorder %v3231_v14, 0.0  ;;  %v3271_v44 = vmul.f32 0.01, %v3231_v14  ;;  %v7451_v53 = vadd.f32 %v6991_v34, %v6953_v2  ;;  %v2831_v59 = vpop.f32.mrb[5].mxu0  ;;  %v9083_v34 = vadd.s32 %v10292_v35, %v10307_v26  ;;  %v10319_v2 = vld [vmem:[#allocation46_spill] sm:$0xff] }
 0x218   : > { %vm3250_vm0 = vcmp.gt.f32.partialorder %v3230_v13, 0.0  ;;  %v3270_v3 = vmul.f32 0.01, %v3230_v13  ;;  %v7452_v18 = vadd.f32 %v8980_v28, %v2831_v59 }
 0x219   : > { %v3291_v56 = vsel %vm3251_vm13, %v3231_v14, %v3271_v44  ;;  %v3233_v24 = vadd.f32 %v7451_v53, %v9042_v20  ;;  %vm10310_vm13 = vcmp.lt.s32.totalorder %v547_v27, 256 }
 0x21a   : > { %v3351_v28 = vsel %vm9067_vm6, %v3291_v56, 0.0  ;;  %v3290_v49 = vsel %vm3250_vm0, %v3230_v13, %v3270_v3  ;;  %v3232_v57 = vadd.f32 %v7452_v18, %v9042_v20  ;;  %v6956_v36 = vpop.f32.mrb[6].mxu0  ;;  %vm9100_vm9 = vmand %vm10311_vm7, %vm10310_vm13  ;;  %vm10315_vm6 = vcmp.lt.s32.totalorder %v546_v21, 256 }
 0x21b   : > { %3371 = vst.msk [vmem:[#allocation2 + $0x20] sm:$0xff] %vm10309_vm10, %v3351_v28  ;;  %v3350_v15 = vsel %vm9074_vm11, %v3290_v49, 0.0  ;;  %vm3253_vm14 = vcmp.gt.f32.partialorder %v3233_v24, 0.0  ;;  %v3273_v58 = vmul.f32 0.01, %v3233_v24  ;;  %v7453_v52 = vadd.f32 %v8982_v29, %v6956_v36  ;;  %v2841_v14 = vpop.f32.mrb[7].mxu0  ;;  %vm10314_vm0 = vmmov %vm10309_vm10 }
 0x21c   : > { %3370 = vst.msk [vmem:[#allocation2 + $0x18] sm:$0xff] %vm10314_vm0, %v3350_v15  ;;  %vm9108_vm12 = vmand %vm10316_vm15, %vm10315_vm6  ;;  %vm3252_vm11 = vcmp.gt.f32.partialorder %v3232_v57, 0.0  ;;  %v3272_v13 = vmul.f32 0.01, %v3232_v57  ;;  %v7454_v27 = vadd.f32 %v8984_v32, %v2841_v14  ;;  %vm573_vm10 = vcmp.ge.s32.totalorder %v9083_v34, 0  ;;  %v10329_v36 = vld [vmem:[#allocation47_spill] sm:$0xff] }
 0x21d   : > { %vm593_vm7 = vcmp.lt.s32.totalorder %v9083_v34, 256  ;;  %v9117_v29 = vadd.s32 %v10292_v35, %v10319_v2  ;;  %v3293_v48 = vsel %vm3253_vm14, %v3233_v24, %v3273_v58  ;;  %v3235_v44 = vadd.f32 %v7453_v52, %v9042_v20 }
 0x21e   : > { %v3353_v21 = vsel %vm9100_vm9, %v3293_v48, 0.0  ;;  %v3292_v53 = vsel %vm3252_vm11, %v3232_v57, %v3272_v13  ;;  %v3234_v32 = vadd.f32 %v7454_v27, %v9042_v20  ;;  %v6959_v59 = vpop.f32.mrb[8].mxu0  ;;  %v9127_v3 = vadd.s32 %v10292_v35, %v10320_v62  ;;  %vm10324_vm11 = vmmov %vm10314_vm0 }
 0x21f   : > { %3373 = vst.msk [vmem:[#allocation2 + $0x30] sm:$0xff] %vm10314_vm0, %v3353_v21  ;;  %v3352_v18 = vsel %vm9108_vm12, %v3292_v53, 0.0  ;;  %vm10321_vm14 = vcmp.ge.s32.totalorder %v9046_v4, 0  ;;  %vm3255_vm9 = vcmp.gt.f32.partialorder %v3235_v44, 0.0  ;;  %v3275_v56 = vmul.f32 0.01, %v3235_v44 }
 0x220   : > { %vm9136_vm6 = vmand %vm10321_vm14, %vm589_vm8  ;;  %v7455_v24 = vadd.f32 %v8986_v31, %v6959_v59  ;;  %v2851_v60 = vpop.f32.mrb[9].mxu0  ;;  %3372 = vst.msk [vmem:[#allocation2 + $0x28] sm:$0xff] %vm10324_vm11, %v3352_v18  ;;  %vm10325_vm0 = vcmp.lt.s32.totalorder %v9050_v5, 256  ;;  %vm10326_vm15 = vcmp.ge.s32.totalorder %v9050_v5, 0  ;;  %vm3254_vm13 = vcmp.gt.f32.partialorder %v3234_v32, 0.0 }
 0x221   : > { %vm9146_vm12 = vmand %vm10326_vm15, %vm10325_vm0  ;;  %v3274_v4 = vmul.f32 0.01, %v3234_v32  ;;  %v7456_v49 = vadd.f32 %v8988_v45, %v2851_v60  ;;  %v3295_v57 = vsel %vm3255_vm9, %v3235_v44, %v3275_v56  ;;  %v9156_v15 = vadd.s32 %v10292_v35, %v10329_v36  ;;  %v10339_v44 = vld [vmem:[#allocation34_spill] sm:$0xff] }
 0x222   : > { %v3237_v31 = vadd.f32 %v7455_v24, %v9042_v20  ;;  %v3355_v5 = vsel %vm9136_vm6, %v3295_v57, 0.0  ;;  %v6962_v52 = vpop.f32.mrb[10].mxu0  ;;  %vm10330_vm9 = vcmp.lt.s32.totalorder %v9054_v33, 256  ;;  %vm10331_vm0 = vcmp.ge.s32.totalorder %v9054_v33, 0 }
 0x223   : > { %v3294_v38 = vsel %vm3254_vm13, %v3234_v32, %v3274_v4  ;;  %v3236_v58 = vadd.f32 %v7456_v49, %v9042_v20  ;;  %3375 = vst.msk [vmem:[#allocation2 + $0x40] sm:$0xff] %vm10324_vm11, %v3355_v5  ;;  %vm9169_vm8 = vmand %vm10331_vm0, %vm10330_vm9  ;;  %v7457_v13 = vadd.f32 %v8990_v37, %v6962_v52  ;;  %v2861_v27 = vpop.f32.mrb[11].mxu0  ;;  %vm10336_vm15 = vcmp.ge.s32.totalorder %v9059_v25, 0 }
 0x224   : > { %v3354_v45 = vsel %vm9146_vm12, %v3294_v38, 0.0  ;;  %vm3257_vm6 = vcmp.gt.f32.partialorder %v3237_v31, 0.0  ;;  %v3277_v7 = vmul.f32 0.01, %v3237_v31  ;;  %vm10334_vm13 = vmmov %vm10324_vm11  ;;  %vm10335_vm11 = vcmp.lt.s32.totalorder %v9059_v25, 256 }
 0x225   : > { %3374 = vst.msk [vmem:[#allocation2 + $0x38] sm:$0xff] %vm10334_vm13, %v3354_v45  ;;  %vm9179_vm12 = vmand %vm10336_vm15, %vm10335_vm11  ;;  %vm3256_vm14 = vcmp.gt.f32.partialorder %v3236_v58, 0.0  ;;  %v3276_v33 = vmul.f32 0.01, %v3236_v58  ;;  %v7458_v48 = vadd.f32 %v8992_v43, %v2861_v27  ;;  %v556_v21 = vadd.s32 %v10292_v35, %v10339_v44  ;;  %v10358_v27 = vld [vmem:[#allocation19_spill] sm:$0xff] }
 0x226   : > { %v3297_v53 = vsel %vm3257_vm6, %v3237_v31, %v3277_v7  ;;  %v3239_v37 = vadd.f32 %v7457_v13, %v9042_v20  ;;  %vm594_vm9 = vcmp.lt.s32.totalorder %v9127_v3, 256  ;;  %v6965_v62 = vpop.f32.mrb[12].mxu0  ;;  %vm9200_vm6 = vmand %vm573_vm10, %vm593_vm7  ;;  %vm10343_vm11 = vcmp.lt.s32.totalorder %v9089_v1, 256  ;;  %v10357_v7 = vld [vmem:[#allocation8_spill] sm:$0xff] }
 0x227   : > { %v3357_v25 = vsel %vm9169_vm8, %v3297_v53, 0.0  ;;  %v3296_v32 = vsel %vm3256_vm14, %v3236_v58, %v3276_v33  ;;  %v3238_v59 = vadd.f32 %v7458_v48, %v9042_v20  ;;  %v7459_v56 = vadd.f32 %v8994_v30, %v6965_v62  ;;  %v2871_v24 = vpop.f32.mrb[13].mxu0  ;;  %vm10342_vm14 = vmmov %vm10334_vm13  ;;  %v10347_v30 = vld [vmem:[#allocation16_spill] sm:$0xff]  ;;  %v10368_v62 = vld [vmem:[#allocation35_spill] sm:$0xff] }
 0x228   : > { %3377 = vst.msk [vmem:[#allocation2 + $0x50] sm:$0xff] %vm10334_vm13, %v3357_v25  ;;  %v3356_v43 = vsel %vm9179_vm12, %v3296_v32, 0.0  ;;  %vm3259_vm8 = vcmp.gt.f32.partialorder %v3239_v37, 0.0  ;;  %v3279_v26 = vmul.f32 0.01, %v3239_v37  ;;  %vm10344_vm13 = vcmp.ge.s32.totalorder %v9089_v1, 0 }
 0x229   : > { %3376 = vst.msk [vmem:[#allocation2 + $0x48] sm:$0xff] %vm10342_vm14, %v3356_v43  ;;  %vm9210_vm12 = vmand %vm10344_vm13, %vm10343_vm11  ;;  %vm3258_vm0 = vcmp.gt.f32.partialorder %v3238_v59, 0.0  ;;  %v3278_v34 = vmul.f32 0.01, %v3238_v59  ;;  %v7460_v28 = vadd.f32 %v8996_v41, %v2871_v24  ;;  %v3241_v49 = vadd.f32 %v7459_v56, %v9042_v20  ;;  %v10370_v56 = vld [vmem:[#allocation6_spill] sm:$0xff]  ;;  %v3423_v32 = vld [vmem:[%s10041_s3 + $0x18] sm:$0xff] }
 0x22a   : > { %v3299_v4 = vsel %vm3259_vm8, %v3239_v37, %v3279_v26  ;;  %vm596_vm7 = vcmp.lt.s32.totalorder %v556_v21, 256  ;;  %v6968_v36 = vpop.f32.mrb[14].mxu0  ;;  %vm599_vm14 = vcmp.lt.s32.totalorder %v10347_v30, 256  ;;  %vm10348_vm11 = vcmask 261120  }
 0x22b   : > { %v3359_v57 = vsel %vm9200_vm6, %v3299_v4, 0.0  ;;  %v3298_v31 = vsel %vm3258_vm0, %v3238_v59, %v3278_v34  ;;  %v3240_v1 = vadd.f32 %v7460_v28, %v9042_v20  ;;  %vm10349_vm8 = vcmp.lt.s32.totalorder %v9117_v29, 256  ;;  %v2881_v52 = vpop.f32.mrb[15].mxu0  ;;  %vm10353_vm0 = vmmov %vm10348_vm11 }
 0x22c   : > { %3379 = vst.msk [vmem:[#allocation2 + $0x60] sm:$0xff] %vm10348_vm11, %v3359_v57  ;;  %v3358_v41 = vsel %vm9210_vm12, %v3298_v31, 0.0  ;;  %vm10350_vm13 = vcmp.ge.s32.totalorder %v9117_v29, 0  ;;  %vm3261_vm6 = vcmp.gt.f32.partialorder %v3241_v49, 0.0  ;;  %v3281_v38 = vmul.f32 0.01, %v3241_v49 }
 0x22d   : > { %vm9228_vm10 = vmand %vm10350_vm13, %vm10349_vm8  ;;  %v7461_v58 = vadd.f32 %v8998_v40, %v6968_v36  ;;  %3378 = vst.msk [vmem:[#allocation2 + $0x58] sm:$0xff] %vm10353_vm0, %v3358_v41  ;;  %vm10354_vm11 = vcmp.ge.s32.totalorder %v9127_v3, 0  ;;  %vm3260_vm15 = vcmp.gt.f32.partialorder %v3240_v1, 0.0  ;;  %v3280_v29 = vmul.f32 0.01, %v3240_v1 }
 0x22e   : > { %vm9238_vm12 = vmand %vm10354_vm11, %vm594_vm9  ;;  %v7462_v14 = vadd.f32 %v9000_v47, %v2881_v52  ;;  %v3301_v13 = vsel %vm3261_vm6, %v3241_v49, %v3281_v38  ;;  %v6971_v48 = vpop.f32.mrb[16].mxu0  ;;  %vm601_vm9 = vcmp.lt.s32.totalorder %v10358_v27, 256  ;;  %vm10360_vm6 = vcmp.lt.s32.totalorder %v9156_v15, 256 }
 0x22f   : > { %v3243_v40 = vadd.f32 %v7461_v58, %v9042_v20  ;;  %v3361_v3 = vsel %vm9228_vm10, %v3301_v13, 0.0  ;;  %v3300_v2 = vsel %vm3260_vm15, %v3240_v1, %v3280_v29  ;;  %vm10359_vm11 = vmmov %vm10353_vm0  ;;  %vm10361_vm8 = vcmp.ge.s32.totalorder %v9156_v15, 0  ;;  %v2891_v25 = vpop.f32.mrb[17].mxu0 }
 0x230   : > { %v3242_v33 = vadd.f32 %v7462_v14, %v9042_v20  ;;  %3381 = vst.msk [vmem:[#allocation2 + $0x70] sm:$0xff] %vm10359_vm11, %v3361_v3  ;;  %v3360_v47 = vsel %vm9238_vm12, %v3300_v2, 0.0  ;;  %vm9258_vm13 = vmand %vm10361_vm8, %vm10360_vm6  ;;  %v7463_v37 = vadd.f32 %v9008_v0, %v6971_v48  ;;  %vm10365_vm11 = vcmp.ge.s32.totalorder %v556_v21, 0  ;;  %v10369_v0 = vld [vmem:[#allocation9_spill] sm:$0xff] }
 0x231   : > { %vm3263_vm10 = vcmp.gt.f32.partialorder %v3243_v40, 0.0  ;;  %v3283_v53 = vmul.f32 0.01, %v3243_v40  ;;  %vm10364_vm15 = vmmov %vm10353_vm0  ;;  %v7464_v15 = vadd.f32 %v9010_v9, %v2891_v25  ;;  %v543_v43 = vadd.s32 %v10292_v35, %v10368_v62  ;;  %v3422_v25 = vld [vmem:[%s10041_s3 + $0x10] sm:$0xff] }
 0x232   : > { %3380 = vst.msk [vmem:[#allocation2 + $0x68] sm:$0xff] %vm10364_vm15, %v3360_v47  ;;  %vm9266_vm0 = vmand %vm10365_vm11, %vm596_vm7  ;;  %vm3262_vm12 = vcmp.gt.f32.partialorder %v3242_v33, 0.0  ;;  %v3282_v59 = vmul.f32 0.01, %v3242_v33  ;;  %v3245_v26 = vadd.f32 %v7463_v37, %v9042_v20  ;;  %v542_v24 = vadd.s32 %v10292_v35, %v10370_v56  ;;  %v6974_v28 = vpop.f32.mrb[18].mxu0  ;;  %v9360_v56 = vld [vmem:[#allocation2 + $0x20] sm:$0xff] }
 0x233   : > { %v3303_v18 = vsel %vm3263_vm10, %v3243_v40, %v3283_v53  ;;  %v3244_v34 = vadd.f32 %v7464_v15, %v9042_v20  ;;  %vm10371_vm6 = vmmov %vm10364_vm15  ;;  %vm10372_vm10 = vcmp.ge.s32.totalorder %v10347_v30, 0  ;;  %v7465_v49 = vadd.f32 %v9012_v12, %v6974_v28  ;;  %v2901_v57 = vpop.f32.mrb[19].mxu0  ;;  %v9384_v28 = vld [vmem:[#allocation2 + $0x50] sm:$0xff]  ;;  %v9392_v35 = vld [vmem:[#allocation2 + $0x60] sm:$0xff] }
 0x234   : > { %v3363_v21 = vsel %vm9258_vm13, %v3303_v18, 0.0  ;;  %v3302_v60 = vsel %vm3262_vm12, %v3242_v33, %v3282_v59  ;;  %vm9288_vm15 = vmand %vm10372_vm10, %vm599_vm14  ;;  %vm3265_vm13 = vcmp.gt.f32.partialorder %v3245_v26, 0.0  ;;  %v3285_v4 = vmul.f32 0.01, %v3245_v26  ;;  %v3863_v18 = vld [vmem:[%s10041_s3 + $0x48] sm:$0xff] }
 0x235   : > { %3383 = vst.msk [vmem:[#allocation2 + $0x80] sm:$0xff] %vm10371_vm6, %v3363_v21  ;;  %v3362_v9 = vsel %vm9266_vm0, %v3302_v60, 0.0  ;;  %vm10375_vm11 = vmmov %vm10371_vm6  ;;  %vm10376_vm12 = vcmp.lt.s32.totalorder %v10357_v7, 256  ;;  %vm10377_vm6 = vcmp.ge.s32.totalorder %v10357_v7, 0  ;;  %vm3264_vm8 = vcmp.gt.f32.partialorder %v3244_v34, 0.0  ;;  %v9368_v21 = vld [vmem:[#allocation2 + $0x30] sm:$0xff] }
 0x236   : > { %3382 = vst.msk [vmem:[#allocation2 + $0x78] sm:$0xff] %vm10375_vm11, %v3362_v9  ;;  %vm9298_vm0 = vmand %vm10377_vm6, %vm10376_vm12  ;;  %v3284_v30 = vmul.f32 0.01, %v3244_v34  ;;  %v7466_v1 = vadd.f32 %v9014_v17, %v2901_v57  ;;  %vm563_vm14 = vcmp.ge.s32.totalorder %v543_v43, 0  ;;  %v3305_v36 = vsel %vm3265_vm13, %v3245_v26, %v3285_v4  ;;  %v6985_v58 = vpop.f32.mrb[0].mxu0  ;;  %v9355_v26 = vld [vmem:[#allocation2 + $0x18] sm:$0xff] }
 0x237   : > { %v3247_v41 = vadd.f32 %v7465_v49, %v9042_v20  ;;  %vm583_vm10 = vcmp.lt.s32.totalorder %v543_v43, 256  ;;  %v3365_v12 = vsel %vm9288_vm15, %v3305_v36, 0.0  ;;  %vm10380_vm12 = vmmov %vm10375_vm11  ;;  %vm10381_vm13 = vcmp.ge.s32.totalorder %v10358_v27, 0  ;;  %v3102_v14 = vpop.f32.mrb[1].mxu0  ;;  %v3862_v43 = vld [vmem:[%s10041_s3 + $0x40] sm:$0xff]  ;;  %v9388_v9 = vld [vmem:[#allocation2 + $0x58] sm:$0xff] }
 0x238   : > { %v3304_v5 = vsel %vm3264_vm8, %v3244_v34, %v3284_v30  ;;  %v3246_v38 = vadd.f32 %v7466_v1, %v9042_v20  ;;  %3385 = vst.msk [vmem:[#allocation2 + $0x90] sm:$0xff] %vm10380_vm12, %v3365_v12  ;;  %vm9314_vm6 = vmand %vm10381_vm13, %vm601_vm9  ;;  %v3229_v29 = vadd.f32 %v6985_v58, %v9042_v20  ;;  %vm10385_vm15 = vcmp.lt.s32.totalorder %v10369_v0, 256  ;;  %v9376_v60 = vld [vmem:[#allocation2 + $0x40] sm:$0xff]  ;;  %v9380_v34 = vld [vmem:[#allocation2 + $0x48] sm:$0xff] }
 0x239   : > { %v3364_v52 = vsel %vm9298_vm0, %v3304_v5, 0.0  ;;  %vm3267_vm7 = vcmp.gt.f32.partialorder %v3247_v41, 0.0  ;;  %v3287_v45 = vmul.f32 0.01, %v3247_v41  ;;  %vm10384_vm8 = vmmov %vm10375_vm11  ;;  %vm10386_vm12 = vcmp.ge.s32.totalorder %v10369_v0, 0  ;;  %v9396_v4 = vld [vmem:[#allocation2 + $0x68] sm:$0xff] }
 0x23a   : > { %3384 = vst.msk [vmem:[#allocation2 + $0x88] sm:$0xff] %vm10384_vm8, %v3364_v52  ;;  %vm9324_vm0 = vmand %vm10386_vm12, %vm10385_vm15  ;;  %vm3266_vm11 = vcmp.gt.f32.partialorder %v3246_v38, 0.0  ;;  %v3286_v13 = vmul.f32 0.01, %v3246_v38  ;;  %v3228_v40 = vadd.f32 %v9042_v20, %v3102_v14  ;;  %vm3249_vm13 = vcmp.gt.f32.partialorder %v3229_v29, 0.0  ;;  %v9400_v49 = vld [vmem:[#allocation2 + $0x70] sm:$0xff] }
 0x23b   : > { %v3307_v27 = vsel %vm3267_vm7, %v3247_v41, %v3287_v45  ;;  %vm603_vm9 = vmand %vm563_vm14, %vm583_vm10  ;;  %v3269_v3 = vmul.f32 0.01, %v3229_v29  ;;  %vm10389_vm8 = vcmp.lt.s32.totalorder %v542_v24, 256  ;;  %vm10390_vm5 = vcmp.ge.s32.totalorder %v542_v24, 0  ;;  %v9364_v24 = vld [vmem:[#allocation2 + $0x28] sm:$0xff]  ;;  %v3864_v1 = vld [vmem:[%s10041_s3 + $0x50] sm:$0xff] }
 0x23c   : > { %v3367_v2 = vsel %vm9314_vm6, %v3307_v27, 0.0  ;;  %v3306_v33 = vsel %vm3266_vm11, %v3246_v38, %v3286_v13  ;;  %vm602_vm15 = vmand %vm10390_vm5, %vm10389_vm8  ;;  %vm3248_vm12 = vcmp.gt.f32.partialorder %v3228_v40, 0.0  ;;  %v3268_v48 = vmul.f32 0.01, %v3228_v40  ;;  %v9408_v30 = vld [vmem:[#allocation2 + $0x80] sm:$0xff]  ;;  %v3865_v36 = vld [vmem:[%s10041_s3 + $0x58] sm:$0xff] }
 0x23d   : > { %3387 = vst.msk [vmem:[#allocation2 + $0xa0] sm:$0xff] %vm10391_vm4, %v3367_v2  ;;  %v3366_v20 = vsel %vm9324_vm0, %v3306_v33, 0.0  ;;  %v3289_v47 = vsel %vm3249_vm13, %v3229_v29, %v3269_v3  ;;  %vm10392_vm7 = vmmov %vm10391_vm4  ;;  %v7385_v15 = vpack.c.bf16 %v3423_v32, %v3422_v25  ;;  %v7389_v0 = vpack.c.bf16 %v3863_v18, %v3862_v43  ;;  %v9404_v57 = vld [vmem:[#allocation2 + $0x78] sm:$0xff]  ;;  %v4107_v58 = vld [vmem:[%s10041_s3 + $0x60] sm:$0xff] }
 0x23e   : > { %3386 = vst.msk [vmem:[#allocation2 + $0x98] sm:$0xff] %vm10392_vm7, %v3366_v20  ;;  %v3349_v44 = vsel %vm603_vm9, %v3289_v47, 0.0  ;;  %v3288_v53 = vsel %vm3248_vm12, %v3228_v40, %v3268_v48  ;;  %vm10393_vm14 = vmmov %vm10391_vm4  ;;  %v7393_v5 = vpack.c.bf16 %v3865_v36, %v3864_v1  ;;  %v4108_v52 = vld [vmem:[%s10041_s3 + $0x68] sm:$0xff]  ;;  %v9436_v14 = vld [vmem:[#allocation2 + $0x1f] sm:$0xff] }
 0x23f   : > { %3369 = vst.msk [vmem:[#allocation2 + $0x10] sm:$0xff] %vm10393_vm14, %v3349_v44  ;;  %v3348_v37 = vsel %vm602_vm15, %v3288_v53, 0.0  ;;  %vm10394_vm10 = vmmov %vm10391_vm4  ;;  %v9434_v45 = vld [vmem:[#allocation2 + $0x27] sm:$0xff]  ;;  %v7397_v29 = vpack.c.bf16 %v4108_v52, %v4107_v58  ;;  %v9444_v13 = vld [vmem:[#allocation2 + $0x37] sm:$0xff] }
 0x240   : > { %3368 = vst.msk [vmem:[#allocation2 + $0x8] sm:$0xff] %vm10394_vm10, %v3348_v37  ;;  %vm10395_vm5 = vmmov %vm10391_vm4  ;;  %v3408_v7 = vsel %vm8220_vm3, %v9434_v45, 0.0  ;;  %v9446_v40 = vld [vmem:[#allocation2 + $0x2f] sm:$0xff]  ;;  %v9454_v3 = vld [vmem:[#allocation2 + $0x47] sm:$0xff] }
 0x241   : > { %vm10396_vm11 = vmmov %vm10391_vm4  ;;  %v9456_v2 = vld [vmem:[#allocation2 + $0x3f] sm:$0xff]  ;;  %v9464_v48 = vld [vmem:[#allocation2 + $0x57] sm:$0xff] }
 0x242   : > { %vm10397_vm6 = vmmov %vm10391_vm4  ;;  %v9466_v20 = vld [vmem:[#allocation2 + $0x4f] sm:$0xff]  ;;  %v9474_v44 = vld [vmem:[#allocation2 + $0x67] sm:$0xff] }
 0x243   : > { %vm10398_vm0 = vmmov %vm10391_vm4  ;;  %v9476_v53 = vld [vmem:[#allocation2 + $0x5f] sm:$0xff]  ;;  %v9484_v25 = vld [vmem:[#allocation2 + $0x77] sm:$0xff] }
 0x244   : > { %vm10399_vm9 = vmmov %vm10398_vm0  ;;  %v9486_v32 = vld [vmem:[#allocation2 + $0x6f] sm:$0xff]  ;;  %v4110_v43 = vld [vmem:[%s10041_s3 + $0x78] sm:$0xff] }
 0x245   : > { %vm10400_vm13 = vmmov %vm10398_vm0  ;;  %v4336_v36 = vld [vmem:[%s10041_s3 + $0x80] sm:$0xff] }
 0x246   : > { %v3425_v62 = vld [vmem:[#allocation2 + $0x10] sm:$0xff]  ;;  %vm10401_vm8 = vmmov %vm10398_vm0 }
 0x247   : > { %v3424_v59 = vld [vmem:[#allocation2 + $0x8] sm:$0xff]  ;;  %vm10402_vm15 = vmmov %vm10398_vm0  ;;  %v9421_v12 = vld [vmem:[#allocation2 + $0x17] sm:$0xff] }
 0x248   : > { %7021 = vmatprep.mubr.msk.f32.mxu1 %vm10391_vm4, %v3424_v59  ;;  %vm10403_vm12 = vmmov %vm10398_vm0  ;;  %v3388_v31 = vld [vmem:[#allocation2 + $0x7] sm:$0xff]  ;;  %v3389_v38 = vld [vmem:[#allocation2 + $0xf] sm:$0xff]  ;;  %v3406_v17 = vsel %vm8196_vm2, %v9421_v12, 0.0 }
 0x249   : > { %7022 = vmatmul.mubr.msk.f32.vlgmr.msra.gmra.mrb[18].mxu1 %vm10395_vm5, %v3425_v62  ;;  %vm10404_vm7 = vmmov %vm10398_vm0  ;;  %v3404_v41 = vsel %vm8178_vm1, %v3388_v31, 0.0  ;;  %v4109_v62 = vld [vmem:[%s10041_s3 + $0x70] sm:$0xff] }
 0x24a   : > { %7024 = vmatprep.mubr.msk.f32.mxu1 %vm10396_vm11, %v9355_v26  ;;  %7384 = vmatpush3.bf16.msra.mxu1 %v9028_v10  ;;  %v9372_v10 = vld [vmem:[#allocation2 + $0x38] sm:$0xff]  ;;  %vm10405_vm14 = vmmov %vm10398_vm0  ;;  %v3830_v18 = vld [vmem:[#allocation2 + $0x9] sm:$0xff]  ;;  %v7401_v31 = vpack.c.bf16 %v4110_v43, %v4109_v62 }
 0x24b   : > { %7386 = vmatprep.subr.bf16.mxu1 %v7385_v15  ;;  %vm10406_vm10 = vmmov %vm10398_vm0  ;;  %v9554_v43 = vld [vmem:[#allocation2 + $0x59] sm:$0xff] }
 0x24c   : > { %vm10407_vm4 = vmmov %vm10398_vm0 }
 0x24d   : > { %7025 = vmatmul.mubr.msk.f32.gmra.mrb[20].mxu1 %vm10397_vm6, %v9360_v56  ;;  %vm10408_vm5 = vmmov %vm10398_vm0 }
 0x24e   : > { %7027 = vmatprep.mubr.msk.f32.mxu1 %vm10398_vm0, %v9364_v24  ;;  %7388 = vmatpush3.bf16.msra.mxu1 %v7385_v15  ;;  %vm10409_vm11 = vmmov %vm10398_vm0  ;;  %v9494_v15 = vld [vmem:[#allocation2 + $0x7f] sm:$0xff] }
 0x24f   : > { %7390 = vmatprep.subr.bf16.mxu1 %v7389_v0  ;;  %vm10410_vm6 = vmmov %vm10398_vm0 }
 0x251   : > { %7028 = vmatmul.mubr.msk.f32.gmra.mrb[22].mxu1 %vm10399_vm9, %v9368_v21  ;;  %vm10411_vm9 = vmmov %vm10398_vm0 }
 0x252   : > { %7030 = vmatprep.mubr.msk.f32.mxu1 %vm10400_vm13, %v9372_v10  ;;  %vm10412_vm13 = vmmov %vm10398_vm0 }
 0x255   : > { %7031 = vmatmul.mubr.msk.f32.gmra.mrb[24].mxu1 %vm10401_vm8, %v9376_v60  ;;  %vm10413_vm8 = vmmov %vm10398_vm0 }
 0x256   : > { %7033 = vmatprep.mubr.msk.f32.mxu1 %vm10402_vm15, %v9380_v34  ;;  %vm10414_vm15 = vmmov %vm10398_vm0 }
 0x259   : > { %7034 = vmatmul.mubr.msk.f32.gmra.mrb[26].mxu1 %vm10403_vm12, %v9384_v28  ;;  %vm10415_vm12 = vnez %v10187_v8 }
 0x25a   : > { %7036 = vmatprep.mubr.msk.f32.mxu1 %vm10404_vm7, %v9388_v9  ;;  %v3410_v27 = vsel %vm10415_vm12, %v9444_v13, 0.0  ;;  %vm10416_vm7 = vmmov %vm10398_vm0 }
 0x25d   : > { %7037 = vmatmul.mubr.msk.f32.gmra.mrb[28].mxu1 %vm10405_vm14, %v9392_v35  ;;  %vm10417_vm14 = vmmov %vm10398_vm0 }
 0x25e   : > { %7039 = vmatprep.mubr.msk.f32.mxu1 %vm10406_vm10, %v9396_v4  ;;  %vm10418_vm10 = vnez %v10190_v16  ;;  %v4808_v16 = vld [vmem:[#allocation2 + $0x97] sm:$0xff] }
 0x25f   : > { %v3412_v33 = vsel %vm10418_vm10, %v9454_v3, 0.0  ;;  %v4818_v63 = vsel %vm10418_vm10, %v9474_v44, 0.0 }
 0x261   : > { %7040 = vmatmul.mubr.msk.f32.gmra.mrb[30].mxu1 %vm10407_vm4, %v9400_v49  ;;  %vm10419_vm4 = vmmov %vm10398_vm0 }
 0x262   : > { %7042 = vmatprep.mubr.msk.f32.mxu1 %vm10408_vm5, %v9404_v57  ;;  %vm10420_vm5 = vmmov %vm10398_vm0 }
 0x265   : > { %7043 = vmatmul.mubr.msk.f32.gmra.mrb[32].mxu1 %vm10409_vm11, %v9408_v30  ;;  %vm10421_vm11 = vnez %v10193_v50  ;;  %v4809_v50 = vld [vmem:[#allocation2 + $0x9f] sm:$0xff] }
 0x266   : > { %7053 = vmatprep.mubr.msk.f32.mxu1 %vm10410_vm6, %v3404_v41  ;;  %v3414_v47 = vsel %vm10421_vm11, %v9464_v48, 0.0  ;;  %vm10422_vm6 = vmmov %vm10398_vm0  ;;  %v4337_v41 = vld [vmem:[%s10041_s3 + $0x88] sm:$0xff] }
 0x267   : > { %v7405_v58 = vpack.c.bf16 %v4337_v41, %v4336_v36  ;;  %v9574_v41 = vld [vmem:[#allocation2 + $0x79] sm:$0xff] }
 0x269   : > { %7054 = vmatmul.mubr.msk.f32.vlgmr.msra.gmra.mrb[18].mxu1 %vm10398_vm0, %v3389_v38  ;;  %v9516_v38 = vld [vmem:[#allocation2 + $0x21] sm:$0xff] }
 0x26a   : > { %7056 = vmatprep.mubr.msk.f32.mxu1 %vm10411_vm9, %v3406_v17  ;;  %7392 = vmatpush3.bf16.msra.mxu1 %v7389_v0  ;;  %vm10423_vm9 = vnez %v10196_v61  ;;  %v3831_v0 = vld [vmem:[#allocation2 + $0x11] sm:$0xff]  ;;  %v9524_v17 = vld [vmem:[#allocation2 + $0x29] sm:$0xff] }
 0x26b   : > { %7394 = vmatprep.subr.bf16.mxu1 %v7393_v5  ;;  %v3416_v37 = vsel %vm10423_vm9, %v9474_v44, 0.0 }
 0x26d   : > { %7057 = vmatmul.mubr.msk.f32.gmra.mrb[20].mxu1 %vm10412_vm13, %v9436_v14  ;;  %vm10424_vm13 = vmmov %vm10398_vm0 }
 0x26e   : > { %7059 = vmatprep.mubr.msk.f32.mxu1 %vm10413_vm8, %v3408_v7  ;;  %7396 = vmatpush3.bf16.msra.mxu1 %v7393_v5  ;;  %vm10425_vm8 = vmmov %vm10398_vm0  ;;  %v9514_v5 = vld [vmem:[#allocation2 + $0x19] sm:$0xff]  ;;  %v9526_v7 = vld [vmem:[#allocation2 + $0x31] sm:$0xff] }
 0x26f   : > { %7398 = vmatprep.subr.bf16.mxu1 %v7397_v29 }
 0x271   : > { %7060 = vmatmul.mubr.msk.f32.gmra.mrb[22].mxu1 %vm10414_vm15, %v9446_v40  ;;  %vm10426_vm15 = vnez %v10198_v6 }
 0x272   : > { %7062 = vmatprep.mubr.msk.f32.mxu1 %vm10416_vm7, %v3410_v27  ;;  %v3418_v59 = vsel %vm10426_vm15, %v9484_v25, 0.0  ;;  %vm10427_vm7 = vmmov %vm10398_vm0  ;;  %v9534_v27 = vld [vmem:[#allocation2 + $0x39] sm:$0xff] }
 0x275   : > { %7063 = vmatmul.mubr.msk.f32.gmra.mrb[24].mxu1 %vm10417_vm14, %v9456_v2  ;;  %vm10428_vm14 = vmmov %vm10398_vm0 }
 0x276   : > { %7065 = vmatprep.mubr.msk.f32.mxu1 %vm10419_vm4, %v3412_v33  ;;  %vm10429_vm4 = vmmov %vm10398_vm0  ;;  %v9536_v33 = vld [vmem:[#allocation2 + $0x41] sm:$0xff] }
 0x279   : > { %7066 = vmatmul.mubr.msk.f32.gmra.mrb[26].mxu1 %vm10420_vm5, %v9466_v20  ;;  %vm10430_vm5 = vnez %v10290_v22 }
 0x27a   : > { %7068 = vmatprep.mubr.msk.f32.mxu1 %vm10422_vm6, %v3414_v47  ;;  %v3847_v1 = vsel %vm10430_vm5, %v3831_v0, 0.0  ;;  %vm10431_vm6 = vmmov %vm10398_vm0 }
 0x27d   : > { %7069 = vmatmul.mubr.msk.f32.gmra.mrb[28].mxu1 %vm10398_vm0, %v9476_v53 }
 0x27e   : > { %7071 = vmatprep.mubr.msk.f32.mxu1 %vm10424_vm13, %v3416_v37  ;;  %vm10432_vm13 = vnez %v10211_v51  ;;  %v9544_v37 = vld [vmem:[#allocation2 + $0x49] sm:$0xff] }
 0x27f   : > { %v3849_v52 = vsel %vm10432_vm13, %v9516_v38, 0.0 }
 0x281   : > { %7072 = vmatmul.mubr.msk.f32.gmra.mrb[30].mxu1 %vm10425_vm8, %v9486_v32  ;;  %vm10433_vm8 = vmmov %vm10398_vm0 }
 0x282   : > { %7074 = vmatprep.mubr.msk.f32.mxu1 %vm10427_vm7, %v3418_v59  ;;  %vm10434_vm7 = vmmov %vm10398_vm0  ;;  %v9546_v59 = vld [vmem:[#allocation2 + $0x51] sm:$0xff] }
 0x285   : > { %7075 = vmatmul.mubr.msk.f32.gmra.mrb[32].mxu1 %vm10428_vm14, %v9494_v15  ;;  %vm10435_vm14 = vnez %v10216_v39 }
 0x286   : > { %7085 = vmatprep.mubr.msk.f32.mxu1 %vm10429_vm4, %v3830_v18  ;;  %vm10436_vm4 = vmmov %vm10398_vm0  ;;  %v9556_v18 = vld [vmem:[#allocation2 + $0x61] sm:$0xff] }
 0x289   : > { %7086 = vmatmul.mubr.msk.f32.vlgmr.msra.gmra.mrb[18].mxu1 %vm10431_vm6, %v3847_v1  ;;  %vm10437_vm6 = vmmov %vm10398_vm0  ;;  %v9566_v1 = vld [vmem:[#allocation2 + $0x71] sm:$0xff] }
 0x28a   : > { %7088 = vmatprep.mubr.msk.f32.mxu1 %vm10398_vm0, %v9514_v5  ;;  %7400 = vmatpush3.bf16.msra.mxu1 %v7397_v29  ;;  %v3851_v29 = vsel %vm10435_vm14, %v9526_v7, 0.0  ;;  %vm10438_vm0 = vnez %v10220_v19  ;;  %vm10442_vm14 = vmmov %vm10437_vm6 }
 0x28b   : > { %7402 = vmatprep.subr.bf16.mxu1 %v7401_v31  ;;  %v3853_v47 = vsel %vm10438_vm0, %v9536_v33, 0.0  ;;  %vm10444_vm0 = vmmov %vm10437_vm6 }
 0x28d   : > { %7089 = vmatmul.mubr.msk.f32.gmra.mrb[20].mxu1 %vm10433_vm8, %v3849_v52  ;;  %vm10439_vm8 = vmmov %vm10436_vm4  ;;  %v9576_v52 = vld [vmem:[#allocation2 + $0x81] sm:$0xff] }
 0x28e   : > { %7091 = vmatprep.mubr.msk.f32.mxu1 %vm10434_vm7, %v9524_v17  ;;  %7404 = vmatpush3.bf16.msra.mxu1 %v7401_v31  ;;  %vm10440_vm7 = vmmov %vm10436_vm4  ;;  %v9564_v31 = vld [vmem:[#allocation2 + $0x69] sm:$0xff] }
 0x28f   : > { %7406 = vmatprep.subr.bf16.mxu1 %v7405_v58 }
 0x291   : > { %7092 = vmatmul.mubr.msk.f32.gmra.mrb[22].mxu1 %vm10436_vm4, %v3851_v29  ;;  %vm10441_vm4 = vnez %v10223_v23 }
 0x292   : > { %7094 = vmatprep.mubr.msk.f32.mxu1 %vm10437_vm6, %v9534_v27  ;;  %v3855_v62 = vsel %vm10441_vm4, %v9546_v59, 0.0  ;;  %vm10447_vm4 = vmmov %vm10444_vm0 }
 0x295   : > { %7095 = vmatmul.mubr.msk.f32.gmra.mrb[24].mxu1 %vm10439_vm8, %v3853_v47  ;;  %vm10443_vm8 = vnez %v10226_v11  ;;  %v4338_v47 = vld [vmem:[%s10041_s3 + $0x90] sm:$0xff] }
 0x296   : > { %7097 = vmatprep.mubr.msk.f32.mxu1 %vm10440_vm7, %v9544_v37  ;;  %v3857_v0 = vsel %vm10443_vm8, %v9556_v18, 0.0  ;;  %vm10445_vm7 = vmmov %vm10444_vm0 }
 0x299   : > { %7098 = vmatmul.mubr.msk.f32.gmra.mrb[26].mxu1 %vm10442_vm14, %v3855_v62  ;;  %vm10446_vm14 = vnez %v10229_v46  ;;  %v4339_v62 = vld [vmem:[%s10041_s3 + $0x98] sm:$0xff]  ;;  %v4582_v46 = vld [vmem:[%s10041_s3 + $0xa8] sm:$0xff] }
 0x29a   : > { %7100 = vmatprep.mubr.msk.f32.mxu1 %vm10437_vm6, %v9554_v43  ;;  %v3859_v36 = vsel %vm10446_vm14, %v9566_v1, 0.0  ;;  %vm10448_vm6 = vmmov %vm10444_vm0 }
 0x29d   : > { %7101 = vmatmul.mubr.msk.f32.gmra.mrb[28].mxu1 %vm10444_vm0, %v3857_v0  ;;  %vm10449_vm0 = vnez %v10246_v55  ;;  %v4091_v0 = vsel %vm8178_vm1, %v9421_v12, 0.0  ;;  %v4581_v55 = vld [vmem:[%s10041_s3 + $0xa0] sm:$0xff]  ;;  %vm10453_vm1 = vmmov %vm10447_vm4 }
 0x29e   : > { %7103 = vmatprep.mubr.msk.f32.mxu1 %vm10445_vm7, %v9564_v31  ;;  %v3861_v29 = vsel %vm10449_vm0, %v9576_v52, 0.0  ;;  %vm10450_vm7 = vmmov %vm10447_vm4  ;;  %v7413_v12 = vpack.c.bf16 %v4582_v46, %v4581_v55  ;;  %v4099_v46 = vsel %vm10418_vm10, %v9464_v48, 0.0  ;;  %v4101_v55 = vsel %vm10421_vm11, %v9474_v44, 0.0 }
 0x2a1   : > { %7104 = vmatmul.mubr.msk.f32.gmra.mrb[30].mxu1 %vm10447_vm4, %v3859_v36  ;;  %v7409_v36 = vpack.c.bf16 %v4339_v62, %v4338_v47  ;;  %v4095_v47 = vsel %vm8220_vm3, %v9444_v13, 0.0  ;;  %v9636_v62 = vld [vmem:[#allocation2 + $0x87] sm:$0xff] }
 0x2a2   : > { %7106 = vmatprep.mubr.msk.f32.mxu1 %vm10448_vm6, %v9574_v41  ;;  %vm10451_vm6 = vmmov %vm10447_vm4 }
 0x2a5   : > { %7107 = vmatmul.mubr.msk.f32.gmra.mrb[32].mxu1 %vm10447_vm4, %v3861_v29  ;;  %v4093_v29 = vsel %vm8196_vm2, %v9434_v45, 0.0  ;;  %vm10456_vm2 = vmmov %vm10453_vm1 }
 0x2a6   : > { %7117 = vmatprep.mubr.msk.f32.mxu1 %vm10450_vm7, %v4091_v0  ;;  %vm10452_vm7 = vmmov %vm10447_vm4  ;;  %v4105_v0 = vsel %vm10426_vm15, %v9636_v62, 0.0 }
 0x2a7   : > { %vm10468_vm15 = vmmov %vm10453_vm1 }
 0x2a9   : > { %7118 = vmatmul.mubr.msk.f32.vlgmr.msra.gmra.mrb[18].mxu1 %vm10451_vm6, %v9436_v14  ;;  %vm10454_vm6 = vmmov %vm10453_vm1  ;;  %v4097_v14 = vsel %vm10415_vm12, %v9454_v3, 0.0 }
 0x2aa   : > { %7120 = vmatprep.mubr.msk.f32.mxu1 %vm10447_vm4, %v4093_v29  ;;  %7408 = vmatpush3.bf16.msra.mxu1 %v7405_v58  ;;  %vm10455_vm4 = vmmov %vm10453_vm1  ;;  %v4103_v58 = vsel %vm10423_vm9, %v9484_v25, 0.0  ;;  %v4583_v29 = vld [vmem:[%s10041_s3 + $0xb0] sm:$0xff] }
 0x2ab   : > { %7410 = vmatprep.subr.bf16.mxu1 %v7409_v36  ;;  %vm10471_vm9 = vmmov %vm10453_vm1 }
 0x2ad   : > { %7121 = vmatmul.mubr.msk.f32.gmra.mrb[20].mxu1 %vm10452_vm7, %v9446_v40  ;;  %vm10457_vm7 = vmmov %vm10453_vm1 }
 0x2ae   : > { %7123 = vmatprep.mubr.msk.f32.mxu1 %vm10453_vm1, %v4095_v47  ;;  %7412 = vmatpush3.bf16.msra.mxu1 %v7409_v36  ;;  %v9644_v36 = vld [vmem:[#allocation2 + $0x8f] sm:$0xff]  ;;  %v4584_v47 = vld [vmem:[%s10041_s3 + $0xb8] sm:$0xff] }
 0x2af   : > { %7414 = vmatprep.subr.bf16.mxu1 %v7413_v12 }
 0x2b1   : > { %7124 = vmatmul.mubr.msk.f32.gmra.mrb[22].mxu1 %vm10454_vm6, %v9456_v2  ;;  %vm10458_vm6 = vmmov %vm10453_vm1 }
 0x2b2   : > { %7126 = vmatprep.mubr.msk.f32.mxu1 %vm10455_vm4, %v4097_v14  ;;  %vm10459_vm4 = vmmov %vm10453_vm1  ;;  %v7417_v14 = vpack.c.bf16 %v4584_v47, %v4583_v29  ;;  %v4566_v47 = vsel %vm10430_vm5, %v9516_v38, 0.0  ;;  %v4568_v38 = vsel %vm10432_vm13, %v9526_v7, 0.0 }
 0x2b5   : > { %7127 = vmatmul.mubr.msk.f32.gmra.mrb[24].mxu1 %vm10456_vm2, %v9466_v20  ;;  %vm10460_vm2 = vmmov %vm10453_vm1 }
 0x2b6   : > { %7129 = vmatprep.mubr.msk.f32.mxu1 %vm10457_vm7, %v4099_v46  ;;  %vm10461_vm7 = vmmov %vm10453_vm1  ;;  %v4826_v46 = vld [vmem:[%s10041_s3 + $0xc0] sm:$0xff] }
 0x2b9   : > { %7130 = vmatmul.mubr.msk.f32.gmra.mrb[26].mxu1 %vm10453_vm1, %v9476_v53 }
 0x2ba   : > { %7132 = vmatprep.mubr.msk.f32.mxu1 %vm10458_vm6, %v4101_v55  ;;  %vm10462_vm6 = vmmov %vm10453_vm1  ;;  %v4827_v55 = vld [vmem:[%s10041_s3 + $0xc8] sm:$0xff] }
 0x2bd   : > { %7133 = vmatmul.mubr.msk.f32.gmra.mrb[28].mxu1 %vm10459_vm4, %v9486_v32  ;;  %vm10463_vm4 = vmmov %vm10453_vm1 }
 0x2be   : > { %7135 = vmatprep.mubr.msk.f32.mxu1 %vm10460_vm2, %v4103_v58  ;;  %vm10464_vm2 = vmmov %vm10453_vm1  ;;  %v7421_v58 = vpack.c.bf16 %v4827_v55, %v4826_v46  ;;  %v5056_v46 = vld [vmem:[%s10041_s3 + $0xe8] sm:$0xff] }
 0x2c1   : > { %7136 = vmatmul.mubr.msk.f32.gmra.mrb[30].mxu1 %vm10461_vm7, %v9494_v15  ;;  %vm10465_vm7 = vmmov %vm10453_vm1 }
 0x2c2   : > { %7138 = vmatprep.mubr.msk.f32.mxu1 %vm10453_vm1, %v4105_v0  ;;  %v4829_v0 = vld [vmem:[%s10041_s3 + $0xd8] sm:$0xff] }
 0x2c5   : > { %7139 = vmatmul.mubr.msk.f32.gmra.mrb[32].mxu1 %vm10462_vm6, %v9644_v36  ;;  %vm10466_vm6 = vmmov %vm10453_vm1 }
 0x2c6   : > { %7149 = vmatprep.mubr.msk.f32.mxu1 %vm10463_vm4, %v9355_v26  ;;  %vm10467_vm4 = vmmov %vm10453_vm1  ;;  %v9688_v26 = vld [vmem:[#allocation2 + $0x88] sm:$0xff] }
 0x2c9   : > { %7150 = vmatmul.mubr.msk.f32.vlgmr.msra.gmra.mrb[18].mxu1 %vm10464_vm2, %v9360_v56  ;;  %vm10469_vm2 = vmmov %vm10453_vm1  ;;  %v9692_v56 = vld [vmem:[#allocation2 + $0x90] sm:$0xff] }
 0x2ca   : > { %7152 = vmatprep.mubr.msk.f32.mxu1 %vm10465_vm7, %v9364_v24  ;;  %7416 = vmatpush3.bf16.msra.mxu1 %v7413_v12  ;;  %vm10470_vm7 = vmmov %vm10453_vm1  ;;  %v4828_v12 = vld [vmem:[%s10041_s3 + $0xd0] sm:$0xff] }
 0x2cb   : > { %7418 = vmatprep.subr.bf16.mxu1 %v7417_v14  ;;  %v7425_v29 = vpack.c.bf16 %v4829_v0, %v4828_v12  ;;  %v4576_v0 = vsel %vm10443_vm8, %v9566_v1, 0.0 }
 0x2cd   : > { %7153 = vmatmul.mubr.msk.f32.gmra.mrb[20].mxu1 %vm10453_vm1, %v9368_v21 }
 0x2ce   : > { %7155 = vmatprep.mubr.msk.f32.mxu1 %vm10466_vm6, %v9372_v10  ;;  %7420 = vmatpush3.bf16.msra.mxu1 %v7417_v14  ;;  %vm10472_vm6 = vmmov %vm10453_vm1  ;;  %v5055_v14 = vld [vmem:[%s10041_s3 + $0xe0] sm:$0xff] }
 0x2cf   : > { %7422 = vmatprep.subr.bf16.mxu1 %v7421_v58 }
 0x2d1   : > { %7156 = vmatmul.mubr.msk.f32.gmra.mrb[22].mxu1 %vm10467_vm4, %v9376_v60  ;;  %vm10473_vm4 = vmmov %vm10453_vm1 }
 0x2d2   : > { %7158 = vmatprep.mubr.msk.f32.mxu1 %vm10468_vm15, %v9380_v34  ;;  %vm10474_vm15 = vmmov %vm10453_vm1 }
 0x2d5   : > { %7159 = vmatmul.mubr.msk.f32.gmra.mrb[24].mxu1 %vm10469_vm2, %v9384_v28  ;;  %vm10475_vm2 = vmmov %vm10453_vm1 }
 0x2d6   : > { %7161 = vmatprep.mubr.msk.f32.mxu1 %vm10470_vm7, %v9388_v9  ;;  %vm10477_vm7 = vmmov %vm10453_vm1 }
 0x2d9   : > { %7162 = vmatmul.mubr.msk.f32.gmra.mrb[26].mxu1 %vm10471_vm9, %v9392_v35  ;;  %vm10476_vm9 = vmmov %vm10453_vm1 }
 0x2da   : > { %7164 = vmatprep.mubr.msk.f32.mxu1 %vm10453_vm1, %v9396_v4 }
 0x2dd   : > { %7165 = vmatmul.mubr.msk.f32.gmra.mrb[28].mxu1 %vm10472_vm6, %v9400_v49  ;;  %vm10478_vm6 = vmmov %vm10453_vm1 }
 0x2de   : > { %7167 = vmatprep.mubr.msk.f32.mxu1 %vm10473_vm4, %v9404_v57  ;;  %vm10479_vm4 = vmmov %vm10453_vm1 }
 0x2df   : > { %vm10487_vm13 = vmmov %vm10479_vm4 }
 0x2e1   : > { %7168 = vmatmul.mubr.msk.f32.gmra.mrb[30].mxu1 %vm10474_vm15, %v9408_v30  ;;  %vm10480_vm15 = vmmov %vm10453_vm1 }
 0x2e2   : > { %7170 = vmatprep.mubr.msk.f32.mxu1 %vm10475_vm2, %v9688_v26  ;;  %vm10481_vm2 = vnez %v10216_v39 }
 0x2e3   : > { %v4570_v55 = vsel %vm10481_vm2, %v9536_v33, 0.0 }
 0x2e5   : > { %7171 = vmatmul.mubr.msk.f32.gmra.mrb[32].mxu1 %vm10476_vm9, %v9692_v56  ;;  %vm10482_vm9 = vmmov %vm10453_vm1 }
 0x2e6   : > { %7181 = vmatprep.mubr.msk.f32.mxu1 %vm10477_vm7, %v9514_v5  ;;  %v7429_v5 = vpack.c.bf16 %v5056_v46, %v5055_v14  ;;  %vm10483_vm7 = vmmov %vm10453_vm1  ;;  %v9750_v14 = vld [vmem:[#allocation2 + $0x89] sm:$0xff]  ;;  %v9752_v46 = vld [vmem:[#allocation2 + $0x91] sm:$0xff] }
 0x2e9   : > { %7182 = vmatmul.mubr.msk.f32.vlgmr.msra.gmra.mrb[18].mxu1 %vm10453_vm1, %v4566_v47  ;;  %vm10484_vm1 = vnez %v10220_v19  ;;  %v4578_v47 = vsel %vm10446_vm14, %v9576_v52, 0.0  ;;  %v5295_v19 = vsel %vm10443_vm8, %v9576_v52, 0.0 }
 0x2ea   : > { %7184 = vmatprep.mubr.msk.f32.mxu1 %vm10478_vm6, %v9524_v17  ;;  %7424 = vmatpush3.bf16.msra.mxu1 %v7421_v58  ;;  %v4572_v58 = vsel %vm10484_vm1, %v9546_v59, 0.0  ;;  %vm10485_vm6 = vmmov %vm10479_vm4  ;;  %v5291_v22 = vsel %vm10484_vm1, %v9556_v18, 0.0 }
 0x2eb   : > { %7426 = vmatprep.subr.bf16.mxu1 %v7425_v29 }
 0x2ed   : > { %7185 = vmatmul.mubr.msk.f32.gmra.mrb[20].mxu1 %vm10479_vm4, %v4568_v38  ;;  %v5300_v38 = vld [vmem:[%s10041_s3 + $0x100] sm:$0xff] }
 0x2ee   : > { %7187 = vmatprep.mubr.msk.f32.mxu1 %vm10480_vm15, %v9534_v27  ;;  %7428 = vmatpush3.bf16.msra.mxu1 %v7425_v29  ;;  %vm10486_vm15 = vnez %v10223_v23  ;;  %v5301_v29 = vld [vmem:[%s10041_s3 + $0x108] sm:$0xff]  ;;  %v5297_v23 = vsel %vm10446_vm14, %v9752_v46, 0.0 }
 0x2ef   : > { %7430 = vmatprep.subr.bf16.mxu1 %v7429_v5  ;;  %v4574_v12 = vsel %vm10486_vm15, %v9556_v18, 0.0 }
 0x2f1   : > { %7188 = vmatmul.mubr.msk.f32.gmra.mrb[22].mxu1 %vm10482_vm9, %v4570_v55  ;;  %vm10488_vm9 = vmmov %vm10479_vm4  ;;  %v4580_v55 = vsel %vm10449_vm0, %v9752_v46, 0.0 }
 0x2f2   : > { %7190 = vmatprep.mubr.msk.f32.mxu1 %vm10483_vm7, %v9544_v37  ;;  %vm10489_vm7 = vmmov %vm10479_vm4 }
 0x2f5   : > { %7191 = vmatmul.mubr.msk.f32.gmra.mrb[24].mxu1 %vm10485_vm6, %v4572_v58  ;;  %vm10490_vm6 = vmmov %vm10479_vm4  ;;  %v5057_v58 = vld [vmem:[%s10041_s3 + $0xf0] sm:$0xff] }
 0x2f6   : > { %7193 = vmatprep.mubr.msk.f32.mxu1 %vm10479_vm4, %v9554_v43 }
 0x2f9   : > { %7194 = vmatmul.mubr.msk.f32.gmra.mrb[26].mxu1 %vm10487_vm13, %v4574_v12  ;;  %vm10492_vm13 = vmmov %vm10479_vm4  ;;  %v5058_v12 = vld [vmem:[%s10041_s3 + $0xf8] sm:$0xff] }
 0x2fa   : > { %7196 = vmatprep.mubr.msk.f32.mxu1 %vm10488_vm9, %v9564_v31  ;;  %vm10494_vm9 = vmmov %vm10479_vm4 }
 0x2fd   : > { %7197 = vmatmul.mubr.msk.f32.gmra.mrb[28].mxu1 %vm10489_vm7, %v4576_v0  ;;  %vm10495_vm7 = vnez %v10266_v42  ;;  %v7437_v42 = vpack.c.bf16 %v5301_v29, %v5300_v38  ;;  %v6257_v38 = vld [vmem:[%s8041_s10 + $0x41] sm:$0xff] }
 0x2fe   : > { %7199 = vmatprep.mubr.msk.f32.mxu1 %vm10490_vm6, %v9574_v41  ;;  %v4810_v0 = vsel %vm10495_vm7, %v9434_v45, 0.0  ;;  %vm10496_vm6 = vmmov %vm10479_vm4  ;;  %v4814_v45 = vsel %vm8220_vm3, %v9454_v3, 0.0  ;;  %v5302_v3 = vld [vmem:[%s10041_s3 + $0x110] sm:$0xff] }
 0x2ff   : > { %vm10499_vm7 = vmmov %vm10479_vm4 }
 0x300   : > { %vm10503_vm3 = vmmov %vm10479_vm4 }
 0x301   : > { %7200 = vmatmul.mubr.msk.f32.gmra.mrb[30].mxu1 %vm10479_vm4, %v4578_v47  ;;  %v7433_v47 = vpack.c.bf16 %v5058_v12, %v5057_v58  ;;  %vm10509_vm10 = vmmov %vm10503_vm3 }
 0x302   : > { %7202 = vmatprep.mubr.msk.f32.mxu1 %vm10492_vm13, %v9750_v14  ;;  %vm10497_vm13 = vnez %v10181_v54  ;;  %v4816_v54 = vsel %vm10415_vm12, %v9464_v48, 0.0  ;;  %vm10506_vm12 = vmmov %vm10503_vm3 }
 0x305   : > { %7203 = vmatmul.mubr.msk.f32.gmra.mrb[32].mxu1 %vm10494_vm9, %v4580_v55  ;;  %v4812_v55 = vsel %vm10497_vm13, %v9444_v13, 0.0  ;;  %vm10498_vm9 = vmmov %vm10479_vm4  ;;  %v4820_v13 = vsel %vm10421_vm11, %v9484_v25, 0.0 }
 0x306   : > { %7213 = vmatprep.mubr.msk.f32.mxu1 %vm10496_vm6, %v4810_v0  ;;  %vm10500_vm6 = vmmov %vm10479_vm4 }
 0x307   : > { %vm10501_vm13 = vmmov %vm10479_vm4 }
 0x308   : > { %vm10511_vm11 = vmmov %vm10503_vm3 }
 0x309   : > { %7214 = vmatmul.mubr.msk.f32.vlgmr.msra.gmra.mrb[18].mxu1 %vm10479_vm4, %v9446_v40 }
 0x30a   : > { %7216 = vmatprep.mubr.msk.f32.mxu1 %vm10498_vm9, %v4812_v55  ;;  %7432 = vmatpush3.bf16.msra.mxu1 %v7429_v5  ;;  %vm10502_vm9 = vmmov %vm10479_vm4 }
 0x30b   : > { %7434 = vmatprep.subr.bf16.mxu1 %v7433_v47 }
 0x30d   : > { %7217 = vmatmul.mubr.msk.f32.gmra.mrb[20].mxu1 %vm10499_vm7, %v9456_v2  ;;  %vm10504_vm7 = vmmov %vm10503_vm3 }
 0x30e   : > { %7219 = vmatprep.mubr.msk.f32.mxu1 %vm10500_vm6, %v4814_v45  ;;  %7436 = vmatpush3.bf16.msra.mxu1 %v7433_v47  ;;  %vm10505_vm6 = vmmov %vm10503_vm3 }
 0x30f   : > { %7438 = vmatprep.subr.bf16.mxu1 %v7437_v42 }
 0x311   : > { %7220 = vmatmul.mubr.msk.f32.gmra.mrb[22].mxu1 %vm10479_vm4, %v9466_v20  ;;  %vm10507_vm4 = vnez %v10196_v61  ;;  %v5303_v61 = vld [vmem:[%s10041_s3 + $0x118] sm:$0xff]  ;;  %v6254_v20 = vld [vmem:[%s8041_s10 + $0x29] sm:$0xff] }
 0x312   : > { %7222 = vmatprep.mubr.msk.f32.mxu1 %vm10501_vm13, %v4816_v54  ;;  %v4822_v8 = vsel %vm10507_vm4, %v9636_v62, 0.0  ;;  %vm10508_vm13 = vmmov %vm10503_vm3  ;;  %v7441_v2 = vpack.c.bf16 %v5303_v61, %v5302_v3 }
 0x313   : > { %vm10515_vm4 = vmmov %vm10503_vm3 }
 0x315   : > { %7223 = vmatmul.mubr.msk.f32.gmra.mrb[24].mxu1 %vm10502_vm9, %v9476_v53  ;;  %vm10510_vm9 = vnez %v10198_v6  ;;  %v5053_v6 = vld [vmem:[#allocation2 + $0x98] sm:$0xff]  ;;  %v6253_v53 = vld [vmem:[%s8041_s10 + $0x21] sm:$0xff] }
 0x316   : > { %7225 = vmatprep.mubr.msk.f32.mxu1 %vm10503_vm3, %v4818_v63  ;;  %v4824_v40 = vsel %vm10510_vm9, %v4808_v16, 0.0  ;;  %vm10518_vm9 = vmmov %vm10503_vm3  ;;  %v6259_v16 = vld [vmem:[%s8041_s10 + $0x51] sm:$0xff] }
 0x319   : > { %7226 = vmatmul.mubr.msk.f32.gmra.mrb[26].mxu1 %vm10504_vm7, %v9486_v32  ;;  %vm10512_vm7 = vmmov %vm10503_vm3 }
 0x31a   : > { %7228 = vmatprep.mubr.msk.f32.mxu1 %vm10505_vm6, %v4820_v13  ;;  %vm10513_vm6 = vmmov %vm10503_vm3  ;;  %v6260_v13 = vld [vmem:[%s8041_s10 + $0x59] sm:$0xff] }
 0x31d   : > { %7229 = vmatmul.mubr.msk.f32.gmra.mrb[28].mxu1 %vm10506_vm12, %v9494_v15  ;;  %vm10514_vm12 = vmmov %vm10503_vm3 }
 0x31e   : > { %7231 = vmatprep.mubr.msk.f32.mxu1 %vm10508_vm13, %v4822_v8  ;;  %vm10516_vm13 = vmmov %vm10503_vm3 }
 0x321   : > { %7232 = vmatmul.mubr.msk.f32.gmra.mrb[30].mxu1 %vm10509_vm10, %v9644_v36  ;;  %vm10517_vm10 = vmmov %vm10503_vm3 }
 0x322   : > { %7234 = vmatprep.mubr.msk.f32.mxu1 %vm10503_vm3, %v4824_v40 }
 0x325   : > { %7235 = vmatmul.mubr.msk.f32.gmra.mrb[32].mxu1 %vm10511_vm11, %v4809_v50  ;;  %vm10519_vm11 = vmmov %vm10503_vm3 }
 0x326   : > { %7245 = vmatprep.mubr.msk.f32.mxu1 %vm10512_vm7, %v9364_v24  ;;  %vm10520_vm7 = vmmov %vm10503_vm3  ;;  %v5054_v24 = vld [vmem:[#allocation2 + $0xa0] sm:$0xff] }
 0x329   : > { %7246 = vmatmul.mubr.msk.f32.vlgmr.msra.gmra.mrb[18].mxu1 %vm10513_vm6, %v9368_v21  ;;  %vm10521_vm6 = vmmov %vm10503_vm3  ;;  %v5285_v21 = vsel %vm10430_vm5, %v9526_v7, 0.0 }
 0x32a   : > { %7248 = vmatprep.mubr.msk.f32.mxu1 %vm10514_vm12, %v9372_v10  ;;  %7440 = vmatpush3.bf16.msra.mxu1 %v7437_v42  ;;  %vm10522_vm12 = vmmov %vm10503_vm3 }
 0x32b   : > { %7442 = vmatprep.subr.bf16.mxu1 %v7441_v2  ;;  %vm10533_vm5 = vmmov %vm10503_vm3 }
 0x32d   : > { %7249 = vmatmul.mubr.msk.f32.gmra.mrb[20].mxu1 %vm10515_vm4, %v9376_v60  ;;  %vm10523_vm4 = vmmov %vm10503_vm3  ;;  %v5289_v60 = vsel %vm10481_vm2, %v9546_v59, 0.0 }
 0x32e   : > { %7251 = vmatprep.mubr.msk.f32.mxu1 %vm10516_vm13, %v9380_v34  ;;  %7444 = vmatpush3.bf16.msra.mxu1 %v7441_v2  ;;  %vm10524_vm13 = vmmov %vm10503_vm3  ;;  %v5282_v34 = vld [vmem:[#allocation2 + $0x99] sm:$0xff] }
 0x32f   : > { %vm10536_vm2 = vmmov %vm10503_vm3 }
 0x330   : > { %vm10538_vm1 = vmmov %vm10536_vm2 }
 0x331   : > { %7252 = vmatmul.mubr.msk.f32.gmra.mrb[22].mxu1 %vm10517_vm10, %v9384_v28  ;;  %vm10525_vm10 = vmmov %vm10503_vm3  ;;  %v5283_v28 = vld [vmem:[#allocation2 + $0xa1] sm:$0xff] }
 0x332   : > { %7254 = vmatprep.mubr.msk.f32.mxu1 %vm10518_vm9, %v9388_v9  ;;  %vm10526_vm9 = vmmov %vm10503_vm3  ;;  %v5299_v9 = vsel %vm10449_vm0, %v5283_v28, 0.0 }
 0x333   : > { %vm10544_vm8 = vmmov %vm10538_vm1 }
 0x335   : > { %7255 = vmatmul.mubr.msk.f32.gmra.mrb[24].mxu1 %vm10503_vm3, %v9392_v35  ;;  %v9903_v35 = vld [vmem:[%s10042_s4] ss:$0 sm:$0xff] }
 0x336   : > { %7257 = vmatprep.mubr.msk.f32.mxu1 %vm10519_vm11, %v9396_v4  ;;  %vm10527_vm11 = vmmov %vm10503_vm3 }
 0x339   : > { %7258 = vmatmul.mubr.msk.f32.gmra.mrb[26].mxu1 %vm10520_vm7, %v9400_v49  ;;  %vm10528_vm7 = vmmov %vm10503_vm3 }
 0x33a   : > { %7260 = vmatprep.mubr.msk.f32.mxu1 %vm10521_vm6, %v9404_v57  ;;  %vm10529_vm6 = vnez %v10211_v51  ;;  %v5293_v51 = vsel %vm10486_vm15, %v9566_v1, 0.0  ;;  %vm10541_vm15 = vmmov %vm10538_vm1 }
 0x33b   : > { %v5287_v10 = vsel %vm10529_vm6, %v9536_v33, 0.0 }
 0x33d   : > { %7261 = vmatmul.mubr.msk.f32.gmra.mrb[28].mxu1 %vm10522_vm12, %v9408_v30  ;;  %vm10530_vm12 = vmmov %vm10503_vm3 }
 0x33e   : > { %7263 = vmatprep.mubr.msk.f32.mxu1 %vm10523_vm4, %v9688_v26  ;;  %vm10531_vm4 = vmmov %vm10503_vm3 }
 0x341   : > { %7264 = vmatmul.mubr.msk.f32.gmra.mrb[30].mxu1 %vm10524_vm13, %v9692_v56  ;;  %vm10532_vm13 = vmmov %vm10503_vm3 }
 0x342   : > { %7266 = vmatprep.mubr.msk.f32.mxu1 %vm10525_vm10, %v5053_v6  ;;  %vm10534_vm10 = vmmov %vm10503_vm3 }
 0x345   : > { %7267 = vmatmul.mubr.msk.f32.gmra.mrb[32].mxu1 %vm10526_vm9, %v5054_v24  ;;  %vm10535_vm9 = vmmov %vm10503_vm3 }
 0x346   : > { %7277 = vmatprep.mubr.msk.f32.mxu1 %vm10503_vm3, %v9524_v17  ;;  %vm10537_vm3 = vmmov %vm10536_vm2 }
 0x349   : > { %7278 = vmatmul.mubr.msk.f32.vlgmr.msra.gmra.mrb[18].mxu1 %vm10527_vm11, %v5285_v21  ;;  %vm10539_vm11 = vmmov %vm10538_vm1 }
 0x34a   : > { %7280 = vmatprep.mubr.msk.f32.mxu1 %vm10528_vm7, %v9534_v27  ;;  %vm10542_vm7 = vmmov %vm10538_vm1 }
 0x34d   : > { %7281 = vmatmul.mubr.msk.f32.gmra.mrb[20].mxu1 %vm10530_vm12, %v5287_v10  ;;  %vm10545_vm12 = vmmov %vm10538_vm1 }
 0x34e   : > { %7283 = vmatprep.mubr.msk.f32.mxu1 %vm10531_vm4, %v9544_v37 }
 0x351   : > { %7284 = vmatmul.mubr.msk.f32.gmra.mrb[22].mxu1 %vm10532_vm13, %v5289_v60  ;;  %vm10546_vm13 = vmmov %vm10538_vm1  ;;  %v6262_v60 = vld [vmem:[%s8041_s10 + $0x69] sm:$0xff] }
 0x352   : > { %7286 = vmatprep.mubr.msk.f32.mxu1 %vm10533_vm5, %v9554_v43  ;;  %v6256_v43 = vld [vmem:[%s8041_s10 + $0x39] sm:$0xff] }
 0x355   : > { %7287 = vmatmul.mubr.msk.f32.gmra.mrb[24].mxu1 %vm10534_vm10, %v5291_v22  ;;  %vm10547_vm10 = vmmov %vm10538_vm1 }
 0x356   : > { %7289 = vmatprep.mubr.msk.f32.mxu1 %vm10535_vm9, %v9564_v31  ;;  %v6255_v31 = vld [vmem:[%s8041_s10 + $0x31] sm:$0xff] }
 0x359   : > { %7290 = vmatmul.mubr.msk.f32.gmra.mrb[26].mxu1 %vm10536_vm2, %v5293_v51  ;;  %vm10548_vm2 = vmmov %vm10538_vm1  ;;  %v6261_v51 = vld [vmem:[%s8041_s10 + $0x61] sm:$0xff] }
 0x35a   : > { %7292 = vmatprep.mubr.msk.f32.mxu1 %vm10537_vm3, %v9574_v41 }
 0x35d   : > { %7293 = vmatmul.mubr.msk.f32.gmra.mrb[28].mxu1 %vm10538_vm1, %v5295_v19 }
 0x35e   : > { %7295 = vmatprep.mubr.msk.f32.mxu1 %vm10539_vm11, %v9750_v14  ;;  %v6258_v14 = vld [vmem:[%s8041_s10 + $0x49] sm:$0xff] }
 0x361   : > { %7296 = vmatmul.mubr.msk.f32.gmra.mrb[30].mxu1 %vm10541_vm15, %v5297_v23  ;;  %vm10549_vm15 = vmmov %vm10538_vm1 }
 0x362   : > { %7298 = vmatprep.mubr.msk.f32.mxu1 %vm10542_vm7, %v5282_v34 }
 0x365   : > { %7299 = vmatmul.mubr.msk.f32.gmra.mrb[32].mxu1 %vm10544_vm8, %v5299_v9  ;;  %vm10550_vm8 = vmmov %vm10538_vm1 }
 0x41c   : > { %v7279_v4 = vpop.f32.mrb[18].mxu1 }
 0x41d   : > { %v5521_v49 = vadd.f32 %v7279_v4, %v9903_v35  ;;  %v5418_v57 = vpop.f32.mrb[19].mxu1 }
 0x41e   : > { %v5520_v30 = vadd.f32 %v9903_v35, %v5418_v57  ;;  %v6264_v57 = vld [vmem:[%s8041_s10 + $0x79] sm:$0xff] }
 0x41f   : > { %vm5537_vm14 = vcmp.gt.f32.partialorder %v5521_v49, 0.0  ;;  %v5553_v48 = vmul.f32 0.01, %v5521_v49 }
 0x420   : > { %vm5536_vm0 = vcmp.gt.f32.partialorder %v5520_v30, 0.0  ;;  %v5552_v44 = vmul.f32 0.01, %v5520_v30  ;;  %v7282_v25 = vpop.f32.mrb[20].mxu1 }
 0x421   : > { %v5569_v32 = vsel %vm5537_vm14, %v5521_v49, %v5553_v48  ;;  %v5523_v15 = vadd.f32 %v7282_v25, %v9903_v35  ;;  %v5428_v17 = vpop.f32.mrb[21].mxu1  ;;  %v6263_v48 = vld [vmem:[%s8041_s10 + $0x71] sm:$0xff] }
 0x422   : > { %v5601_v7 = vadd.f32 %v6254_v20, %v5569_v32  ;;  %v5568_v27 = vsel %vm5536_vm0, %v5520_v30, %v5552_v44  ;;  %v5522_v33 = vadd.f32 %v9903_v35, %v5428_v17  ;;  %vm10551_vm0 = vmmov %vm10538_vm1 }
 0x423   : > { %v5600_v37 = vadd.f32 %v6253_v53, %v5568_v27  ;;  %vm5539_vm6 = vcmp.gt.f32.partialorder %v5523_v15, 0.0  ;;  %v5555_v59 = vmul.f32 0.01, %v5523_v15 }
 0x424   : > { %5617 = vst.msk [vmem:[%s9915_s15 + $0x8] sm:$0xff] %vm10545_vm12, %v5601_v7  ;;  %vm5538_vm4 = vcmp.gt.f32.partialorder %v5522_v33, 0.0  ;;  %v5554_v18 = vmul.f32 0.01, %v5522_v33  ;;  %v7285_v1 = vpop.f32.mrb[22].mxu1  ;;  %vm10552_vm12 = vmmov %vm10551_vm0 }
 0x425   : > { %5616 = vst.msk [vmem:[%s9915_s15] sm:$0xff] %vm10546_vm13, %v5600_v37  ;;  %v5571_v41 = vsel %vm5539_vm6, %v5523_v15, %v5555_v59  ;;  %v5525_v52 = vadd.f32 %v7285_v1, %v9903_v35  ;;  %v5438_v62 = vpop.f32.mrb[23].mxu1  ;;  %vm10553_vm13 = vmmov %vm10551_vm0  ;;  %v6265_v59 = vld [vmem:[%s8041_s10 + $0x81] sm:$0xff] }
 0x426   : > { %v5603_v36 = vadd.f32 %v6256_v43, %v5571_v41  ;;  %v5570_v26 = vsel %vm5538_vm4, %v5522_v33, %v5554_v18  ;;  %v5524_v56 = vadd.f32 %v9903_v35, %v5438_v62  ;;  %v6266_v33 = vld [vmem:[%s8041_s10 + $0x89] sm:$0xff] }
 0x427   : > { %v5602_v5 = vadd.f32 %v6255_v31, %v5570_v26  ;;  %vm5541_vm5 = vcmp.gt.f32.partialorder %v5525_v52, 0.0  ;;  %v5557_v29 = vmul.f32 0.01, %v5525_v52 }
 0x428   : > { %5619 = vst.msk [vmem:[%s9915_s15 + $0x18] sm:$0xff] %vm10547_vm10, %v5603_v36  ;;  %vm5540_vm9 = vcmp.gt.f32.partialorder %v5524_v56, 0.0  ;;  %v5556_v46 = vmul.f32 0.01, %v5524_v56  ;;  %v7288_v58 = vpop.f32.mrb[24].mxu1  ;;  %vm10554_vm10 = vmmov %vm10551_vm0 }
 0x429   : > { %5618 = vst.msk [vmem:[%s9915_s15 + $0x10] sm:$0xff] %vm10548_vm2, %v5602_v5  ;;  %v5573_v12 = vsel %vm5541_vm5, %v5525_v52, %v5557_v29  ;;  %v5527_v0 = vadd.f32 %v7288_v58, %v9903_v35  ;;  %v5448_v47 = vpop.f32.mrb[25].mxu1  ;;  %vm10555_vm2 = vmmov %vm10551_vm0  ;;  %v6267_v29 = vld [vmem:[%s8041_s10 + $0x91] sm:$0xff] }
 0x42a   : > { %v5605_v55 = vadd.f32 %v6258_v14, %v5573_v12  ;;  %v5572_v42 = vsel %vm5540_vm9, %v5524_v56, %v5556_v46  ;;  %v5526_v45 = vadd.f32 %v9903_v35, %v5448_v47  ;;  %v6268_v56 = vld [vmem:[%s8041_s10 + $0x99] sm:$0xff]  ;;  %s9986_s10 = scalar_lea.sflag [#allocation4], %s229_s12 }
 0x42b   : > { %v5604_v54 = vadd.f32 %v6257_v38, %v5572_v42  ;;  %vm5543_vm3 = vcmp.gt.f32.partialorder %v5527_v0, 0.0  ;;  %v5559_v63 = vmul.f32 0.01, %v5527_v0 }
 0x42c   : > { %5621 = vst.msk [vmem:[%s9915_s15 + $0x28] sm:$0xff] %vm10538_vm1, %v5605_v55  ;;  %vm5542_vm11 = vcmp.gt.f32.partialorder %v5526_v45, 0.0  ;;  %v5558_v8 = vmul.f32 0.01, %v5526_v45  ;;  %v7291_v40 = vpop.f32.mrb[26].mxu1  ;;  %vm10556_vm1 = vmmov %vm10551_vm0 }
 0x42d   : > { %5620 = vst.msk [vmem:[%s9915_s15 + $0x20] sm:$0xff] %vm10549_vm15, %v5604_v54  ;;  %v5575_v50 = vsel %vm5543_vm3, %v5527_v0, %v5559_v63  ;;  %v5529_v3 = vadd.f32 %v7291_v40, %v9903_v35  ;;  %v5458_v61 = vpop.f32.mrb[27].mxu1  ;;  %vm10557_vm15 = vmmov %vm10551_vm0 }
 0x42e   : > { %v5607_v2 = vadd.f32 %v6260_v13, %v5575_v50  ;;  %v5574_v6 = vsel %vm5542_vm11, %v5526_v45, %v5558_v8  ;;  %v5528_v24 = vadd.f32 %v9903_v35, %v5458_v61 }
 0x42f   : > { %v5606_v21 = vadd.f32 %v6259_v16, %v5574_v6  ;;  %vm5545_vm7 = vcmp.gt.f32.partialorder %v5529_v3, 0.0  ;;  %v5561_v10 = vmul.f32 0.01, %v5529_v3 }
 0x430   : > { %5623 = vst.msk [vmem:[%s9915_s15 + $0x38] sm:$0xff] %vm10550_vm8, %v5607_v2  ;;  %vm5544_vm14 = vcmp.gt.f32.partialorder %v5528_v24, 0.0  ;;  %v5560_v22 = vmul.f32 0.01, %v5528_v24  ;;  %v7294_v19 = vpop.f32.mrb[28].mxu1  ;;  %vm10559_vm8 = vmmov %vm10551_vm0 }
 0x431   : > { %5622 = vst.msk [vmem:[%s9915_s15 + $0x30] sm:$0xff] %vm10551_vm0, %v5606_v21  ;;  %v5577_v39 = vsel %vm5545_vm7, %v5529_v3, %v5561_v10  ;;  %v5531_v23 = vadd.f32 %v7294_v19, %v9903_v35  ;;  %v5468_v34 = vpop.f32.mrb[29].mxu1  ;;  %vm10558_vm7 = vmmov %vm10551_vm0 }
 0x432   : > { %v5609_v28 = vadd.f32 %v6262_v60, %v5577_v39  ;;  %v5576_v11 = vsel %vm5544_vm14, %v5528_v24, %v5560_v22  ;;  %v5530_v9 = vadd.f32 %v9903_v35, %v5468_v34 }
 0x433   : > { %v5608_v4 = vadd.f32 %v6261_v51, %v5576_v11  ;;  %vm5547_vm6 = vcmp.gt.f32.partialorder %v5531_v23, 0.0  ;;  %v5563_v49 = vmul.f32 0.01, %v5531_v23 }
 0x434   : > { %5625 = vst.msk [vmem:[%s9915_s15 + $0x48] sm:$0xff] %vm10552_vm12, %v5609_v28  ;;  %vm5546_vm4 = vcmp.gt.f32.partialorder %v5530_v9, 0.0  ;;  %v5562_v30 = vmul.f32 0.01, %v5530_v9  ;;  %v7297_v20 = vpop.f32.mrb[30].mxu1 }
 0x435   : > { %5624 = vst.msk [vmem:[%s9915_s15 + $0x40] sm:$0xff] %vm10553_vm13, %v5608_v4  ;;  %v5579_v44 = vsel %vm5547_vm6, %v5531_v23, %v5563_v49  ;;  %v5533_v53 = vadd.f32 %v7297_v20, %v9903_v35  ;;  %v5478_v25 = vpop.f32.mrb[31].mxu1 }
 0x436   : > { %v5611_v32 = vadd.f32 %v6264_v57, %v5579_v44  ;;  %v5578_v15 = vsel %vm5546_vm4, %v5530_v9, %v5562_v30  ;;  %v5532_v17 = vadd.f32 %v9903_v35, %v5478_v25 }
 0x437   : > { %v5610_v7 = vadd.f32 %v6263_v48, %v5578_v15  ;;  %vm5549_vm5 = vcmp.gt.f32.partialorder %v5533_v53, 0.0  ;;  %v5565_v27 = vmul.f32 0.01, %v5533_v53 }
 0x438   : > { %5627 = vst.msk [vmem:[%s9915_s15 + $0x58] sm:$0xff] %vm10554_vm10, %v5611_v32  ;;  %vm5548_vm9 = vcmp.gt.f32.partialorder %v5532_v17, 0.0  ;;  %v5564_v37 = vmul.f32 0.01, %v5532_v17  ;;  %v7300_v43 = vpop.f32.mrb[32].mxu1 }
 0x439   : > { %5626 = vst.msk [vmem:[%s9915_s15 + $0x50] sm:$0xff] %vm10555_vm2, %v5610_v7  ;;  %v5581_v18 = vsel %vm5549_vm5, %v5533_v53, %v5565_v27  ;;  %v5535_v31 = vadd.f32 %v7300_v43, %v9903_v35  ;;  %v5488_v1 = vpop.f32.mrb[33].mxu1 }
 0x43a   : > { %v5613_v41 = vadd.f32 %v6266_v33, %v5581_v18  ;;  %v5580_v52 = vsel %vm5548_vm9, %v5532_v17, %v5564_v37  ;;  %v5534_v62 = vadd.f32 %v9903_v35, %v5488_v1 }
 0x43b   : > { %v5612_v36 = vadd.f32 %v6265_v59, %v5580_v52  ;;  %vm5551_vm3 = vcmp.gt.f32.partialorder %v5535_v31, 0.0  ;;  %v5567_v26 = vmul.f32 0.01, %v5535_v31 }
 0x43c   : > { %5629 = vst.msk [vmem:[%s9915_s15 + $0x68] sm:$0xff] %vm10556_vm1, %v5613_v41  ;;  %vm5550_vm11 = vcmp.gt.f32.partialorder %v5534_v62, 0.0  ;;  %v5566_v5 = vmul.f32 0.01, %v5534_v62 }
 0x43d   : > { %5628 = vst.msk [vmem:[%s9915_s15 + $0x60] sm:$0xff] %vm10557_vm15, %v5612_v36  ;;  %v5583_v14 = vsel %vm5551_vm3, %v5535_v31, %v5567_v26 }
 0x43e   : > { %v5615_v46 = vadd.f32 %v6268_v56, %v5583_v14  ;;  %v5582_v35 = vsel %vm5550_vm11, %v5534_v62, %v5566_v5 }
 0x43f   : > { %v5614_v38 = vadd.f32 %v6267_v29, %v5582_v35 }
 0x440   : > { %5631 = vst.msk [vmem:[%s9915_s15 + $0x78] sm:$0xff] %vm10558_vm7, %v5615_v46 }
 0x441   : > { %5630 = vst.msk [vmem:[%s9915_s15 + $0x70] sm:$0xff] %vm10559_vm8, %v5614_v38 }
 0x442   : > { %7824 = shalt.err (!%p7821_p6)
}
 0x443   : > { %s7825_s12 = scalar_lea.hbm %s9976_s8, 2048  ;;  %s7829_s17 = scalar_lea.hbm %s10043_s5, 8192 }
 0x444   : > { %p7826_p7 = scmp.ne.s32.totalorder %s9976_s8, %s7825_s12  ;;  %p7830_p11 = scmp.lt.u32.totalorder %s9976_s8, %s10043_s5 }
 0x445   : > { %p7831_p12 = scmp.lt.u32.totalorder %s7829_s17, %s7825_s12  ;;  %p7833_p0 = scmp.lt.u32.totalorder %s7825_s12, %s9976_s8 }
 0x446   : > { %p7827_p9 = pnand %p7826_p7, %p7991_p3 }
 0x447   : > { %p7832_p13 = por %p7831_p12, %p7830_p11 }
 0x448   : > { %p7828_p10 = pneg %p7827_p9 }
 0x449   : > { %p7834_p1 = por %p7833_p0, %p7832_p13 }
 0x44b   : > { %p7835_p2 = pnand %p7834_p1, %p7828_p10 }
 0x44d   : > { %7838 = shalt.err (!%p7835_p2)
}
 0x44e   : > { %s7908_s27 = smov 128   ;;  %s7909_s9 = smov 8  }
 0x44f   : > { %7738 = dma.vmem_to_hbm [thread:$0]  (%p7991_p3), %s9978_s22, 2048, %s9976_s8, %s9986_s10, %s7908_s27, %s7908_s27, %s7909_s9  }
 0x450 PF: > { %p7744_p4 = scmp.ge.s32.totalorder %s7905_s25, 2  ;;  %s5663_s30 = sand.u32 1, %s7877_s18  }
 0x451   : > { %s5664_s13 = scalar_lea.sflag [#allocation4], %s5663_s30 }
 0x452   : > { %p7741_p5 = pnand %p7744_p4, %p8000_p8 }
 0x454   : > { %7872 = dma.done.wait (!%p7741_p5), %s5664_s13, 2048  }
 0x455   : > { %7874 = vsyncadd (!%p7741_p5), %s5664_s13, 4294965248  ;;  %s18_s25 = sadd.s32 1, %s7905_s25   ;;  %s10560_s18 = smov %s7881_s19 }
 0x456   : > { %p15_p6 = scmp.ge.s32.totalorder %s18_s25, 6   ;;  %s10561_s19 = smov %s7885_s20 }
 0x457   : > { %s10562_s20 = smov %s8009_s11  ;;  %s10563_s21 = smov %s7897_s23 }
 0x458   : > { %s10564_s22 = smov %s7901_s24  ;;  %s10565_s23 = smov %s10568_s28 }
 0x459   : > { %s10566_s24 = smov %s10572_s29  ;;  %17 = sbr.rel (!%p15_p6) target bundleno = 5 (0x5), region = 84 }
 0x460   :  { %5669 = vsyncpa [#allocation4], 1 }
 0x461   :  { %5671 = vsyncpa [#allocation4 + $0x1], 1 }

</bundles_post_ra>
